<compile_context>
chip_gen: v7x
topology: tpu7x:2x2x1
jax: 0.10.0
libtpu: 0.0.40
codegen_flags: <defaults>
</compile_context>

<pallas_src>
import functools

import numpy as np
import jax
import jax.numpy as jnp
from jax.experimental import pallas as pl
from jax.experimental.pallas import tpu as pltpu

PAD = 0  # Constants.PAD


def _round_up(x, m):
    return ((x + m - 1) // m) * m


# ----------------------------------------------------------------------------
# Fused decoder kernel: one grid step = (token block i, layer l)
# ----------------------------------------------------------------------------
def _decoder_kernel(
    # token-block inputs
    x0_ref, enc_ref, nonpad_ref, tgt_kbias_ref, src_kbias_ref,
    # layer-indexed (stacked) weights: self-attention
    w_qkv_ref, b_qkv_ref, w_o1_ref, b_o1_ref, g1_ref, be1_ref,
    # enc-dec attention
    w_q2_ref, b_q2_ref, w_kv2_ref, b_kv2_ref, w_o2_ref, b_o2_ref, g2_ref, be2_ref,
    # position-wise FFN
    w1_ref, b1_ref, w2_ref, b2_ref, g3_ref, be3_ref,
    # output (resident across the layer axis)
    o_ref,
    # VMEM scratch (bf16)
    qkv_scr, q2_scr, kv_scr, attn_scr,
    *, n_head, d_kp, d_vp, n_batch, l_q, l_s):

    l = pl.program_id(1)

    @pl.when(l == 0)
    def _():
        o_ref[...] = x0_ref[...]          # initialize resident activation (embeddings)

    x = o_ref[...]                        # (Bb*Lq, d_model) f32 running activation
    scale = nonpad_ref[...]               # (Bb*Lq, 1) non_pad_mask

    H, dkp, dvp = n_head, d_kp, d_vp
    bf16 = jnp.bfloat16

    def mm(a_bf16, w_ref):                # bf16 MXU operands, f32 accumulation
        return jnp.dot(a_bf16, w_ref[0], preferred_element_type=jnp.float32)

    def ln_res(y, res, g_ref, b_ref):
        # layer_norm(y + res) * non_pad_mask  (biased variance, eps=1e-5, nn.LayerNorm)
        z = y + res
        mean = jnp.mean(z, axis=-1, keepdims=True)
        zc = z - mean
        var = jnp.mean(zc * zc, axis=-1, keepdims=True)
        return (zc * jax.lax.rsqrt(var + 1e-5) * g_ref[0] + b_ref[0]) * scale

    def softmax_bf16(s):                  # f32 in, bf16 probabilities out
        s = s - jnp.max(s, axis=-1, keepdims=True)
        p = jnp.exp(s)
        inv = pl.reciprocal(jnp.sum(p, axis=-1, keepdims=True), approx=True)
        return (p * inv).astype(bf16)

    # Causal additive bias built in-kernel (no (B,Lq,Lq) HBM traffic).  Stays f32.
    row = jax.lax.broadcasted_iota(jnp.int32, (l_q, l_q), 0)
    col = jax.lax.broadcasted_iota(jnp.int32, (l_q, l_q), 1)
    causal = jnp.where(col > row, jnp.float32(-1e30), jnp.float32(0.0))

    # ---------------- self attention (fused QKV projection) ----------------
    xb = x.astype(bf16)
    qkv_scr[...] = (mm(xb, w_qkv_ref) + b_qkv_ref[0]).astype(bf16)
    for b in range(n_batch):              # static unroll over batch elements in block
        bias = causal + tgt_kbias_ref[b]  # (Lq,Lq) + (1,Lq) key-pad bias
        for h in range(H):                # 128-lane-aligned per-head slices
            q = qkv_scr[b * l_q:(b + 1) * l_q, h * dkp:(h + 1) * dkp]
            k = qkv_scr[b * l_q:(b + 1) * l_q, H * dkp + h * dkp: H * dkp + (h + 1) * dkp]
            v = qkv_scr[b * l_q:(b + 1) * l_q, 2 * H * dkp + h * dvp: 2 * H * dkp + (h + 1) * dvp]
            s = jax.lax.dot_general(q, k, (((1,), (1,)), ((), ())),
                                    preferred_element_type=jnp.float32) + bias
            p = softmax_bf16(s)
            attn_scr[b * l_q:(b + 1) * l_q, h * dvp:(h + 1) * dvp] = jnp.dot(
                p, v, preferred_element_type=jnp.float32).astype(bf16)
    y = mm(attn_scr[...], w_o1_ref) + b_o1_ref[0]
    x = ln_res(y, x, g1_ref, be1_ref)

    # ---------------- encoder-decoder attention -----------------------------
    xb = x.astype(bf16)
    q2_scr[...] = (mm(xb, w_q2_ref) + b_q2_ref[0]).astype(bf16)
    kv_scr[...] = (mm(enc_ref[...], w_kv2_ref) + b_kv2_ref[0]).astype(bf16)
    for b in range(n_batch):
        bias = src_kbias_ref[b]           # (1, Ls) key-pad bias, f32
        for h in range(H):
            q = q2_scr[b * l_q:(b + 1) * l_q, h * dkp:(h + 1) * dkp]
            k = kv_scr[b * l_s:(b + 1) * l_s, h * dkp:(h + 1) * dkp]
            v = kv_scr[b * l_s:(b + 1) * l_s, H * dkp + h * dvp: H * dkp + (h + 1) * dvp]
            s = jax.lax.dot_general(q, k, (((1,), (1,)), ((), ())),
                                    preferred_element_type=jnp.float32) + bias
            p = softmax_bf16(s)
            attn_scr[b * l_q:(b + 1) * l_q, h * dvp:(h + 1) * dvp] = jnp.dot(
                p, v, preferred_element_type=jnp.float32).astype(bf16)
    y = mm(attn_scr[...], w_o2_ref) + b_o2_ref[0]
    x = ln_res(y, x, g2_ref, be2_ref)

    # ---------------- position-wise FFN (Conv1d k=1 == dense) ---------------
    xb = x.astype(bf16)
    h1 = jnp.maximum(mm(xb, w1_ref) + b1_ref[0], 0.0).astype(bf16)
    y = mm(h1, w2_ref) + b2_ref[0]
    x = ln_res(y, x, g3_ref, be3_ref)

    o_ref[...] = x


# ----------------------------------------------------------------------------
# Plain-JAX glue: masks, embedding gathers, and the single fused pallas_call
# ----------------------------------------------------------------------------
def decoder_forward(packed, tgt_seq, tgt_pos, src_seq, enc_output, n_head, d_k, d_v,
                    max_tokens_per_block=512):
    B, Lq = tgt_seq.shape
    Ls = src_seq.shape[1]
    d_model = enc_output.shape[-1]
    n_layers = packed["w_qkv"].shape[0]
    dkp = _round_up(d_k, 128)
    dvp = _round_up(d_v, 128)

    # Pick the largest batch block Bb (divisor of B) so Bb*Lq fills the MXU / amortizes
    # weight DMA, bounded by a token budget (VMEM).
    Bb = 1
    for cand in range(1, B + 1):
        if B % cand == 0 and cand * Lq <= max_tokens_per_block:
            Bb = cand
    nblk = B // Bb

    # Compact masks (O(B*L), never O(B*Lq*Lk)).  Biases stay f32: -1e30 must not be bf16.
    # NOTE: -1e30 instead of -inf => fully masked rows give uniform probs, not NaN.
    non_pad = (tgt_seq != PAD).astype(jnp.float32).reshape(B * Lq, 1)
    tgt_kbias = jnp.where(tgt_seq == PAD, -1e30, 0.0).astype(jnp.float32)[:, None, :]  # (B,1,Lq)
    src_kbias = jnp.where(src_seq == PAD, -1e30, 0.0).astype(jnp.float32)[:, None, :]  # (B,1,Ls)

    # Embedding lookups (gather) -- glue; flatten tokens.
    x0 = (packed["word_emb"][tgt_seq] + packed["pos_table"][tgt_pos]).astype(jnp.float32)
    x0 = x0.reshape(B * Lq, d_model)
    enc = enc_output.astype(jnp.bfloat16).reshape(B * Ls, d_model)  # MXU operand only

    batch_inputs = [x0, enc, non_pad, tgt_kbias, src_kbias]
    batch_specs = [
        pl.BlockSpec((Bb * Lq, d_model), lambda i, l: (i, 0)),
        pl.BlockSpec((Bb * Ls, d_model), lambda i, l: (i, 0)),
        pl.BlockSpec((Bb * Lq, 1), lambda i, l: (i, 0)),
        pl.BlockSpec((Bb, 1, Lq), lambda i, l: (i, 0, 0)),
        pl.BlockSpec((Bb, 1, Ls), lambda i, l: (i, 0, 0)),
    ]

    weight_names = ["w_qkv", "b_qkv", "w_o1", "b_o1", "ln1_g", "ln1_b",
                    "w_q2", "b_q2", "w_kv2", "b_kv2", "w_o2", "b_o2", "ln2_g", "ln2_b",
                    "w1", "b1", "w2", "b2", "ln3_g", "ln3_b"]
    weights = [packed[n] for n in weight_names]
    weight_specs = [pl.BlockSpec((1,) + w.shape[1:], lambda i, l: (l, 0, 0))
                    for w in weights]

    kern = functools.partial(_decoder_kernel, n_head=n_head, d_kp=dkp, d_vp=dvp,
                             n_batch=Bb, l_q=Lq, l_s=Ls)

    out = pl.pallas_call(
        kern,
        grid=(nblk, n_layers),
        out_shape=jax.ShapeDtypeStruct((B * Lq, d_model), jnp.float32),
        in_specs=batch_specs + weight_specs,
        out_specs=pl.BlockSpec((Bb * Lq, d_model), lambda i, l: (i, 0)),
        scratch_shapes=[
            pltpu.VMEM((Bb * Lq, n_head * (2 * dkp + dvp)), jnp.bfloat16),  # fused QKV
            pltpu.VMEM((Bb * Lq, n_head * dkp), jnp.bfloat16),              # enc-attn Q
            pltpu.VMEM((Bb * Ls, n_head * (dkp + dvp)), jnp.bfloat16),      # fused enc K|V
            pltpu.VMEM((Bb * Lq, n_head * dvp), jnp.bfloat16),              # attn output
        ],
        compiler_params=pltpu.CompilerParams(
            dimension_semantics=("parallel", "arbitrary"),
            vmem_limit_bytes=48 * 1024 * 1024),   # above 16/32 MiB defaults, < physical
    )(*batch_inputs, *weights)
    # TODO(synk): return_attns path (per-layer attention maps) is not implemented.
    return (out.reshape(B, Lq, d_model),)


# ----------------------------------------------------------------------------
# Parameter init (shapes per Decoder.__init__) and packing into stacked layout
# ----------------------------------------------------------------------------
def get_sinusoid_encoding_table(n_position, d_hid, padding_idx=None):
    def cal_angle(position, hid_idx):
        return position / np.power(10000, 2 * (hid_idx // 2) / d_hid)

    table = np.array(
        [[cal_angle(pos, j) for j in range(d_hid)] for pos in range(n_position)])
    table[:, 0::2] = np.sin(table[:, 0::2])
    table[:, 1::2] = np.cos(table[:, 1::2])
    if padding_idx is not None:
        table[padding_idx] = 0.0
    return jnp.asarray(table, dtype=jnp.float32)


def init_params(key, n_tgt_vocab, len_max_seq, d_word_vec,
                n_layers, n_head, d_k, d_v, d_model, d_inner):
    keys = jax.random.split(key, 1 + n_layers)

    def nrm(k, shape, s=0.1):
        return jax.random.normal(k, shape, jnp.float32) * s

    word_emb = nrm(keys[0], (n_tgt_vocab, d_word_vec)).at[PAD].set(0.0)  # padding_idx=PAD
    pos_table = get_sinusoid_encoding_table(len_max_seq + 1, d_word_vec, padding_idx=0)

    def mha_params(ks):
        return dict(
            w_qs=nrm(ks[0], (d_model, n_head * d_k)), b_qs=jnp.zeros((n_head * d_k,), jnp.float32),
            w_ks=nrm(ks[1], (d_model, n_head * d_k)), b_ks=jnp.zeros((n_head * d_k,), jnp.float32),
            w_vs=nrm(ks[2], (d_model, n_head * d_v)), b_vs=jnp.zeros((n_head * d_v,), jnp.float32),
            w_fc=nrm(ks[3], (n_head * d_v, d_model)), b_fc=jnp.zeros((d_model,), jnp.float32),
            ln_g=jnp.ones((d_model,), jnp.float32), ln_b=jnp.zeros((d_model,), jnp.float32))

    layers = []
    for li in range(n_layers):
        lk = jax.random.split(keys[1 + li], 10)
        layers.append(dict(
            slf_attn=mha_params(lk[0:4]),
            enc_attn=mha_params(lk[4:8]),
            ffn=dict(
                w1=nrm(lk[8], (d_model, d_inner)), b1=jnp.zeros((d_inner,), jnp.float32),
                w2=nrm(lk[9], (d_inner, d_model)), b2=jnp.zeros((d_model,), jnp.float32),
                ln_g=jnp.ones((d_model,), jnp.float32), ln_b=jnp.zeros((d_model,), jnp.float32))))
    return dict(word_emb=word_emb, pos_table=pos_table, layers=layers)


def pack_params(params, n_head, d_k, d_v):
    """Stack per-layer weights along a layer axis; fuse QKV / KV; pad each head to a
    128-lane tile (zero columns/rows -> exact math); fold 1/sqrt(d_k) into Q; bf16 weights."""
    L = params["layers"]
    d_model = L[0]["slf_attn"]["w_qs"].shape[0]
    dkp = _round_up(d_k, 128)
    dvp = _round_up(d_v, 128)
    inv_temp = jnp.float32(1.0 / np.sqrt(d_k))

    def pad_in_cols(w, d, dp):   # (d_model, H*d) -> (d_model, H*dp), per-head zero pad
        w = w.reshape(d_model, n_head, d)
        w = jnp.pad(w, ((0, 0), (0, 0), (0, dp - d)))
        return w.reshape(d_model, n_head * dp)

    def pad_bias(b, d, dp):      # (H*d,) -> (1, H*dp)
        b = b.reshape(n_head, d)
        b = jnp.pad(b, ((0, 0), (0, dp - d)))
        return b.reshape(1, n_head * dp)

    def pad_out_rows(w, d, dp):  # (H*d, d_model) -> (H*dp, d_model), zero pad rows
        w = w.reshape(n_head, d, d_model)
        w = jnp.pad(w, ((0, 0), (0, dp - d), (0, 0)))
        return w.reshape(n_head * dp, d_model)

    def st(fn, dtype=jnp.float32):
        return jnp.stack([fn(layer) for layer in L], axis=0).astype(dtype)

    def row(v):
        return v[None, :]

    return dict(
        word_emb=params["word_emb"], pos_table=params["pos_table"],
        # self attention (fused Q|K|V, Q pre-scaled by 1/sqrt(d_k), heads lane-padded)
        w_qkv=st(lambda l: jnp.concatenate([
            pad_in_cols(l["slf_attn"]["w_qs"] * inv_temp, d_k, dkp),
            pad_in_cols(l["slf_attn"]["w_ks"], d_k, dkp),
            pad_in_cols(l["slf_attn"]["w_vs"], d_v, dvp)], 1), jnp.bfloat16),
        b_qkv=st(lambda l: jnp.concatenate([
            pad_bias(l["slf_attn"]["b_qs"] * inv_temp, d_k, dkp),
            pad_bias(l["slf_attn"]["b_ks"], d_k, dkp),
            pad_bias(l["slf_attn"]["b_vs"], d_v, dvp)], 1)),
        w_o1=st(lambda l: pad_out_rows(l["slf_attn"]["w_fc"], d_v, dvp), jnp.bfloat16),
        b_o1=st(lambda l: row(l["slf_attn"]["b_fc"])),
        ln1_g=st(lambda l: row(l["slf_attn"]["ln_g"])),
        ln1_b=st(lambda l: row(l["slf_attn"]["ln_b"])),
        # enc-dec attention (Q pre-scaled; fused K|V)
        w_q2=st(lambda l: pad_in_cols(l["enc_attn"]["w_qs"] * inv_temp, d_k, dkp), jnp.bfloat16),
        b_q2=st(lambda l: pad_bias(l["enc_attn"]["b_qs"] * inv_temp, d_k, dkp)),
        w_kv2=st(lambda l: jnp.concatenate([
            pad_in_cols(l["enc_attn"]["w_ks"], d_k, dkp),
            pad_in_cols(l["enc_attn"]["w_vs"], d_v, dvp)], 1), jnp.bfloat16),
        b_kv2=st(lambda l: jnp.concatenate([
            pad_bias(l["enc_attn"]["b_ks"], d_k, dkp),
            pad_bias(l["enc_attn"]["b_vs"], d_v, dvp)], 1)),
        w_o2=st(lambda l: pad_out_rows(l["enc_attn"]["w_fc"], d_v, dvp), jnp.bfloat16),
        b_o2=st(lambda l: row(l["enc_attn"]["b_fc"])),
        ln2_g=st(lambda l: row(l["enc_attn"]["ln_g"])),
        ln2_b=st(lambda l: row(l["enc_attn"]["ln_b"])),
        # FFN (Conv1d k=1 == dense)
        w1=st(lambda l: l["ffn"]["w1"], jnp.bfloat16),
        b1=st(lambda l: row(l["ffn"]["b1"])),
        w2=st(lambda l: l["ffn"]["w2"], jnp.bfloat16),
        b2=st(lambda l: row(l["ffn"]["b2"])),
        ln3_g=st(lambda l: row(l["ffn"]["ln_g"])),
        ln3_b=st(lambda l: row(l["ffn"]["ln_b"])))


# ----------------------------------------------------------------------------
if __name__ == "__main__":
    n_tgt_vocab, len_max_seq = 50, 16
    d_word_vec = d_model = 128           # multiple of 128 -> lane-dense activations
    n_layers, n_head, d_k, d_v, d_inner = 2, 2, 64, 64, 256
    B, Lq, Ls = 2, 8, 16

    key = jax.random.PRNGKey(0)
    k_param, k_enc, k_src = jax.random.split(key, 3)

    params = init_params(k_param, n_tgt_vocab, len_max_seq, d_word_vec,
                         n_layers, n_head, d_k, d_v, d_model, d_inner)
    packed = pack_params(params, n_head, d_k, d_v)

    tgt_seq = jnp.array([[5, 7, 3, 9, 2, 0, 0, 0],
                         [4, 1, 8, 6, 3, 2, 7, 0]], dtype=jnp.int32)
    tgt_pos = jnp.array([[1, 2, 3, 4, 5, 0, 0, 0],
                         [1, 2, 3, 4, 5, 6, 7, 0]], dtype=jnp.int32)
    src_seq = jnp.concatenate(
        [jax.random.randint(k_src, (B, Ls - 2), 1, n_tgt_vocab, dtype=jnp.int32),
         jnp.zeros((B, 2), jnp.int32)], axis=1)                  # trailing PAD tokens
    enc_output = jax.random.normal(k_enc, (B, Ls, d_model), jnp.float32)

    (dec_out,) = decoder_forward(packed, tgt_seq, tgt_pos, src_seq, enc_output,
                                 n_head, d_k, d_v)
    dec_out = jax.block_until_ready(dec_out)
    assert dec_out.shape == (B, Lq, d_model)
    assert bool(jnp.all(jnp.isfinite(dec_out)))
    print("KERNEL_OK")
</pallas_src>

<mosaic_0001>
module attributes {stable_mosaic.version = 11 : i64} {
  func.func @_decoder_kernel(%arg0: i32, %arg1: i32, %arg2: memref<16x128xf32, #tpu.memory_space<vmem>>, %arg3: memref<32x128xbf16, #tpu.memory_space<vmem>>, %arg4: memref<16x1xf32, #tpu.memory_space<vmem>>, %arg5: memref<2x1x8xf32, #tpu.memory_space<vmem>>, %arg6: memref<2x1x16xf32, #tpu.memory_space<vmem>>, %arg7: memref<1x128x768xbf16, #tpu.memory_space<vmem>>, %arg8: memref<1x1x768xf32, #tpu.memory_space<vmem>>, %arg9: memref<1x256x128xbf16, #tpu.memory_space<vmem>>, %arg10: memref<1x1x128xf32, #tpu.memory_space<vmem>>, %arg11: memref<1x1x128xf32, #tpu.memory_space<vmem>>, %arg12: memref<1x1x128xf32, #tpu.memory_space<vmem>>, %arg13: memref<1x128x256xbf16, #tpu.memory_space<vmem>>, %arg14: memref<1x1x256xf32, #tpu.memory_space<vmem>>, %arg15: memref<1x128x512xbf16, #tpu.memory_space<vmem>>, %arg16: memref<1x1x512xf32, #tpu.memory_space<vmem>>, %arg17: memref<1x256x128xbf16, #tpu.memory_space<vmem>>, %arg18: memref<1x1x128xf32, #tpu.memory_space<vmem>>, %arg19: memref<1x1x128xf32, #tpu.memory_space<vmem>>, %arg20: memref<1x1x128xf32, #tpu.memory_space<vmem>>, %arg21: memref<1x128x256xbf16, #tpu.memory_space<vmem>>, %arg22: memref<1x1x256xf32, #tpu.memory_space<vmem>>, %arg23: memref<1x256x128xbf16, #tpu.memory_space<vmem>>, %arg24: memref<1x1x128xf32, #tpu.memory_space<vmem>>, %arg25: memref<1x1x128xf32, #tpu.memory_space<vmem>>, %arg26: memref<1x1x128xf32, #tpu.memory_space<vmem>>, %arg27: memref<16x128xf32, #tpu.memory_space<vmem>>, %arg28: memref<16x768xbf16, #tpu.memory_space<vmem>>, %arg29: memref<16x256xbf16, #tpu.memory_space<vmem>>, %arg30: memref<32x512xbf16, #tpu.memory_space<vmem>>, %arg31: memref<16x256xbf16, #tpu.memory_space<vmem>>) attributes {dimension_semantics = [#tpu.dimension_semantics<parallel>, #tpu.dimension_semantics<arbitrary>], iteration_bounds = array<i64: 1, 2>, scalar_prefetch = 0 : i64, scratch_operands = 4 : i64, tpu.core_type = #tpu.core_type<tc>, window_params = [{transform_indices = @transform_0, window_bounds = array<i64: 16, 128>}, {transform_indices = @transform_1, window_bounds = array<i64: 32, 128>}, {transform_indices = @transform_2, window_bounds = array<i64: 16, 1>}, {transform_indices = @transform_3, window_bounds = array<i64: 2, 1, 8>}, {transform_indices = @transform_4, window_bounds = array<i64: 2, 1, 16>}, {transform_indices = @transform_5, window_bounds = array<i64: 1, 128, 768>}, {transform_indices = @transform_6, window_bounds = array<i64: 1, 1, 768>}, {transform_indices = @transform_7, window_bounds = array<i64: 1, 256, 128>}, {transform_indices = @transform_8, window_bounds = array<i64: 1, 1, 128>}, {transform_indices = @transform_9, window_bounds = array<i64: 1, 1, 128>}, {transform_indices = @transform_10, window_bounds = array<i64: 1, 1, 128>}, {transform_indices = @transform_11, window_bounds = array<i64: 1, 128, 256>}, {transform_indices = @transform_12, window_bounds = array<i64: 1, 1, 256>}, {transform_indices = @transform_13, window_bounds = array<i64: 1, 128, 512>}, {transform_indices = @transform_14, window_bounds = array<i64: 1, 1, 512>}, {transform_indices = @transform_15, window_bounds = array<i64: 1, 256, 128>}, {transform_indices = @transform_16, window_bounds = array<i64: 1, 1, 128>}, {transform_indices = @transform_17, window_bounds = array<i64: 1, 1, 128>}, {transform_indices = @transform_18, window_bounds = array<i64: 1, 1, 128>}, {transform_indices = @transform_19, window_bounds = array<i64: 1, 128, 256>}, {transform_indices = @transform_20, window_bounds = array<i64: 1, 1, 256>}, {transform_indices = @transform_21, window_bounds = array<i64: 1, 256, 128>}, {transform_indices = @transform_22, window_bounds = array<i64: 1, 1, 128>}, {transform_indices = @transform_23, window_bounds = array<i64: 1, 1, 128>}, {transform_indices = @transform_24, window_bounds = array<i64: 1, 1, 128>}, {transform_indices = @transform_25, window_bounds = array<i64: 16, 128>}]} {
    %c0_i32 = arith.constant 0 : i32
    %0 = arith.cmpi eq, %arg1, %c0_i32 : i32
    %1 = arith.extui %0 : i1 to i32
    %c0_i32_0 = arith.constant 0 : i32
    %2 = arith.cmpi ne, %1, %c0_i32_0 : i32
    scf.if %2 {
      %c0_202 = arith.constant 0 : index
      %c0_203 = arith.constant 0 : index
      %325 = vector.load %arg2[%c0_202, %c0_203] : memref<16x128xf32, #tpu.memory_space<vmem>>, vector<16x128xf32>
      %c0_204 = arith.constant 0 : index
      %c0_205 = arith.constant 0 : index
      %326 = vector.load %arg27[%c0_204, %c0_205] : memref<16x128xf32, #tpu.memory_space<vmem>>, vector<16x128xf32>
      tpu.vector_store %arg27[%c0_204, %c0_205], %325 {strides = array<i32>} : memref<16x128xf32, #tpu.memory_space<vmem>>, vector<16x128xf32>,
    } else {
    }
    %c0 = arith.constant 0 : index
    %c0_1 = arith.constant 0 : index
    %3 = vector.load %arg27[%c0, %c0_1] : memref<16x128xf32, #tpu.memory_space<vmem>>, vector<16x128xf32>
    %c0_2 = arith.constant 0 : index
    %c0_3 = arith.constant 0 : index
    %4 = vector.load %arg4[%c0_2, %c0_3] : memref<16x1xf32, #tpu.memory_space<vmem>>, vector<16x1xf32>
    %5 = tpu.iota {dimensions = array<i32: 0>} : vector<8x8xi32>
    %6 = tpu.iota {dimensions = array<i32: 1>} : vector<8x8xi32>
    %7 = arith.cmpi sgt, %6, %5 : vector<8x8xi32>
    %cst = arith.constant -1.000000e+30 : f32
    %cst_4 = arith.constant 0.000000e+00 : f32
    %8 = vector.broadcast %cst : f32 to vector<8x8xf32>
    %9 = vector.broadcast %cst_4 : f32 to vector<8x8xf32>
    %10 = arith.select %7, %8, %9 : vector<8x8xi1>, vector<8x8xf32>
    %11 = arith.truncf %3 : vector<16x128xf32> to vector<16x128xbf16>
    %c0_5 = arith.constant 0 : index
    %c0_6 = arith.constant 0 : index
    %c0_7 = arith.constant 0 : index
    %12 = vector.load %arg7[%c0_5, %c0_6, %c0_7] : memref<1x128x768xbf16, #tpu.memory_space<vmem>>, vector<1x128x768xbf16>
    %13 = vector.shape_cast %12 : vector<1x128x768xbf16> to vector<128x768xbf16>
    %cst_8 = arith.constant dense<0.000000e+00> : vector<16x768xf32>
    %14 = tpu.matmul %11, %13, %cst_8 {dimension_numbers = #tpu.dot_dimension_numbers<[1], [0], [0], [1], [0, 0, 1, 1], [], []>} : vector<16x128xbf16>, vector<128x768xbf16>, vector<16x768xf32> -> vector<16x768xf32>
    %c0_9 = arith.constant 0 : index
    %c0_10 = arith.constant 0 : index
    %c0_11 = arith.constant 0 : index
    %15 = vector.load %arg8[%c0_9, %c0_10, %c0_11] : memref<1x1x768xf32, #tpu.memory_space<vmem>>, vector<1x1x768xf32>
    %16 = vector.shape_cast %15 : vector<1x1x768xf32> to vector<1x768xf32>
    %17 = vector.broadcast %16 : vector<1x768xf32> to vector<16x768xf32>
    %18 = arith.addf %14, %17 : vector<16x768xf32>
    %19 = arith.truncf %18 : vector<16x768xf32> to vector<16x768xbf16>
    %c0_12 = arith.constant 0 : index
    %c0_13 = arith.constant 0 : index
    %20 = vector.load %arg28[%c0_12, %c0_13] : memref<16x768xbf16, #tpu.memory_space<vmem>>, vector<16x768xbf16>
    tpu.vector_store %arg28[%c0_12, %c0_13], %19 {strides = array<i32>} : memref<16x768xbf16, #tpu.memory_space<vmem>>, vector<16x768xbf16>,
    %c0_14 = arith.constant 0 : index
    %c0_15 = arith.constant 0 : index
    %c0_16 = arith.constant 0 : index
    %21 = vector.load %arg5[%c0_14, %c0_15, %c0_16] : memref<2x1x8xf32, #tpu.memory_space<vmem>>, vector<1x1x8xf32>
    %22 = vector.shape_cast %21 : vector<1x1x8xf32> to vector<1x8xf32>
    %23 = vector.broadcast %22 : vector<1x8xf32> to vector<8x8xf32>
    %24 = arith.addf %10, %23 : vector<8x8xf32>
    %c0_17 = arith.constant 0 : index
    %c0_18 = arith.constant 0 : index
    %25 = vector.load %arg28[%c0_17, %c0_18] : memref<16x768xbf16, #tpu.memory_space<vmem>>, vector<8x128xbf16>
    %c0_19 = arith.constant 0 : index
    %c256 = arith.constant 256 : index
    %26 = vector.load %arg28[%c0_19, %c256] : memref<16x768xbf16, #tpu.memory_space<vmem>>, vector<8x128xbf16>
    %c0_20 = arith.constant 0 : index
    %c512 = arith.constant 512 : index
    %27 = vector.load %arg28[%c0_20, %c512] : memref<16x768xbf16, #tpu.memory_space<vmem>>, vector<8x128xbf16>
    %cst_21 = arith.constant dense<0.000000e+00> : vector<8x8xf32>
    %28 = tpu.matmul %25, %26, %cst_21 {dimension_numbers = #tpu.dot_dimension_numbers<[1], [1], [0], [0], [0, 0, 1, 0], [], []>} : vector<8x128xbf16>, vector<8x128xbf16>, vector<8x8xf32> -> vector<8x8xf32>
    %29 = arith.addf %28, %24 : vector<8x8xf32>
    %cst_22 = arith.constant dense<0xFF800000> : vector<8xf32>
    %30 = vector.multi_reduction <maximumf>, %29, %cst_22 [1] : vector<8x8xf32> to vector<8xf32>
    %31 = vector.shape_cast %30 : vector<8xf32> to vector<8x1xf32>
    %32 = vector.broadcast %31 : vector<8x1xf32> to vector<8x8xf32>
    %33 = arith.subf %29, %32 : vector<8x8xf32>
    %34 = math.exp %33 : vector<8x8xf32>
    %cst_23 = arith.constant dense<0.000000e+00> : vector<8xf32>
    %35 = vector.multi_reduction <add>, %34, %cst_23 [1] : vector<8x8xf32> to vector<8xf32>
    %36 = vector.shape_cast %35 : vector<8xf32> to vector<8x1xf32>
    %37 = tpu.reciprocal %36 {approx = true} : vector<8x1xf32> -> vector<8x1xf32>
    %38 = vector.broadcast %37 : vector<8x1xf32> to vector<8x8xf32>
    %39 = arith.mulf %34, %38 : vector<8x8xf32>
    %40 = arith.truncf %39 : vector<8x8xf32> to vector<8x8xbf16>
    %cst_24 = arith.constant dense<0.000000e+00> : vector<8x128xf32>
    %41 = tpu.matmul %40, %27, %cst_24 {dimension_numbers = #tpu.dot_dimension_numbers<[1], [0], [0], [1], [0, 0, 1, 1], [], []>} : vector<8x8xbf16>, vector<8x128xbf16>, vector<8x128xf32> -> vector<8x128xf32>
    %42 = arith.truncf %41 : vector<8x128xf32> to vector<8x128xbf16>
    %c0_25 = arith.constant 0 : index
    %c0_26 = arith.constant 0 : index
    %43 = vector.load %arg31[%c0_25, %c0_26] : memref<16x256xbf16, #tpu.memory_space<vmem>>, vector<8x128xbf16>
    tpu.vector_store %arg31[%c0_25, %c0_26], %42 {strides = array<i32>} : memref<16x256xbf16, #tpu.memory_space<vmem>>, vector<8x128xbf16>,
    %c0_27 = arith.constant 0 : index
    %c128 = arith.constant 128 : index
    %44 = vector.load %arg28[%c0_27, %c128] : memref<16x768xbf16, #tpu.memory_space<vmem>>, vector<8x128xbf16>
    %c0_28 = arith.constant 0 : index
    %c384 = arith.constant 384 : index
    %45 = vector.load %arg28[%c0_28, %c384] : memref<16x768xbf16, #tpu.memory_space<vmem>>, vector<8x128xbf16>
    %c0_29 = arith.constant 0 : index
    %c640 = arith.constant 640 : index
    %46 = vector.load %arg28[%c0_29, %c640] : memref<16x768xbf16, #tpu.memory_space<vmem>>, vector<8x128xbf16>
    %cst_30 = arith.constant dense<0.000000e+00> : vector<8x8xf32>
    %47 = tpu.matmul %44, %45, %cst_30 {dimension_numbers = #tpu.dot_dimension_numbers<[1], [1], [0], [0], [0, 0, 1, 0], [], []>} : vector<8x128xbf16>, vector<8x128xbf16>, vector<8x8xf32> -> vector<8x8xf32>
    %48 = arith.addf %47, %24 : vector<8x8xf32>
    %cst_31 = arith.constant dense<0xFF800000> : vector<8xf32>
    %49 = vector.multi_reduction <maximumf>, %48, %cst_31 [1] : vector<8x8xf32> to vector<8xf32>
    %50 = vector.shape_cast %49 : vector<8xf32> to vector<8x1xf32>
    %51 = vector.broadcast %50 : vector<8x1xf32> to vector<8x8xf32>
    %52 = arith.subf %48, %51 : vector<8x8xf32>
    %53 = math.exp %52 : vector<8x8xf32>
    %cst_32 = arith.constant dense<0.000000e+00> : vector<8xf32>
    %54 = vector.multi_reduction <add>, %53, %cst_32 [1] : vector<8x8xf32> to vector<8xf32>
    %55 = vector.shape_cast %54 : vector<8xf32> to vector<8x1xf32>
    %56 = tpu.reciprocal %55 {approx = true} : vector<8x1xf32> -> vector<8x1xf32>
    %57 = vector.broadcast %56 : vector<8x1xf32> to vector<8x8xf32>
    %58 = arith.mulf %53, %57 : vector<8x8xf32>
    %59 = arith.truncf %58 : vector<8x8xf32> to vector<8x8xbf16>
    %cst_33 = arith.constant dense<0.000000e+00> : vector<8x128xf32>
    %60 = tpu.matmul %59, %46, %cst_33 {dimension_numbers = #tpu.dot_dimension_numbers<[1], [0], [0], [1], [0, 0, 1, 1], [], []>} : vector<8x8xbf16>, vector<8x128xbf16>, vector<8x128xf32> -> vector<8x128xf32>
    %61 = arith.truncf %60 : vector<8x128xf32> to vector<8x128xbf16>
    %c0_34 = arith.constant 0 : index
    %c128_35 = arith.constant 128 : index
    %62 = vector.load %arg31[%c0_34, %c128_35] : memref<16x256xbf16, #tpu.memory_space<vmem>>, vector<8x128xbf16>
    tpu.vector_store %arg31[%c0_34, %c128_35], %61 {strides = array<i32>} : memref<16x256xbf16, #tpu.memory_space<vmem>>, vector<8x128xbf16>,
    %c1 = arith.constant 1 : index
    %c0_36 = arith.constant 0 : index
    %c0_37 = arith.constant 0 : index
    %63 = vector.load %arg5[%c1, %c0_36, %c0_37] : memref<2x1x8xf32, #tpu.memory_space<vmem>>, vector<1x1x8xf32>
    %64 = vector.shape_cast %63 : vector<1x1x8xf32> to vector<1x8xf32>
    %65 = vector.broadcast %64 : vector<1x8xf32> to vector<8x8xf32>
    %66 = arith.addf %10, %65 : vector<8x8xf32>
    %c8 = arith.constant 8 : index
    %c0_38 = arith.constant 0 : index
    %67 = vector.load %arg28[%c8, %c0_38] : memref<16x768xbf16, #tpu.memory_space<vmem>>, vector<8x128xbf16>
    %c8_39 = arith.constant 8 : index
    %c256_40 = arith.constant 256 : index
    %68 = vector.load %arg28[%c8_39, %c256_40] : memref<16x768xbf16, #tpu.memory_space<vmem>>, vector<8x128xbf16>
    %c8_41 = arith.constant 8 : index
    %c512_42 = arith.constant 512 : index
    %69 = vector.load %arg28[%c8_41, %c512_42] : memref<16x768xbf16, #tpu.memory_space<vmem>>, vector<8x128xbf16>
    %cst_43 = arith.constant dense<0.000000e+00> : vector<8x8xf32>
    %70 = tpu.matmul %67, %68, %cst_43 {dimension_numbers = #tpu.dot_dimension_numbers<[1], [1], [0], [0], [0, 0, 1, 0], [], []>} : vector<8x128xbf16>, vector<8x128xbf16>, vector<8x8xf32> -> vector<8x8xf32>
    %71 = arith.addf %70, %66 : vector<8x8xf32>
    %cst_44 = arith.constant dense<0xFF800000> : vector<8xf32>
    %72 = vector.multi_reduction <maximumf>, %71, %cst_44 [1] : vector<8x8xf32> to vector<8xf32>
    %73 = vector.shape_cast %72 : vector<8xf32> to vector<8x1xf32>
    %74 = vector.broadcast %73 : vector<8x1xf32> to vector<8x8xf32>
    %75 = arith.subf %71, %74 : vector<8x8xf32>
    %76 = math.exp %75 : vector<8x8xf32>
    %cst_45 = arith.constant dense<0.000000e+00> : vector<8xf32>
    %77 = vector.multi_reduction <add>, %76, %cst_45 [1] : vector<8x8xf32> to vector<8xf32>
    %78 = vector.shape_cast %77 : vector<8xf32> to vector<8x1xf32>
    %79 = tpu.reciprocal %78 {approx = true} : vector<8x1xf32> -> vector<8x1xf32>
    %80 = vector.broadcast %79 : vector<8x1xf32> to vector<8x8xf32>
    %81 = arith.mulf %76, %80 : vector<8x8xf32>
    %82 = arith.truncf %81 : vector<8x8xf32> to vector<8x8xbf16>
    %cst_46 = arith.constant dense<0.000000e+00> : vector<8x128xf32>
    %83 = tpu.matmul %82, %69, %cst_46 {dimension_numbers = #tpu.dot_dimension_numbers<[1], [0], [0], [1], [0, 0, 1, 1], [], []>} : vector<8x8xbf16>, vector<8x128xbf16>, vector<8x128xf32> -> vector<8x128xf32>
    %84 = arith.truncf %83 : vector<8x128xf32> to vector<8x128xbf16>
    %c8_47 = arith.constant 8 : index
    %c0_48 = arith.constant 0 : index
    %85 = vector.load %arg31[%c8_47, %c0_48] : memref<16x256xbf16, #tpu.memory_space<vmem>>, vector<8x128xbf16>
    tpu.vector_store %arg31[%c8_47, %c0_48], %84 {strides = array<i32>} : memref<16x256xbf16, #tpu.memory_space<vmem>>, vector<8x128xbf16>,
    %c8_49 = arith.constant 8 : index
    %c128_50 = arith.constant 128 : index
    %86 = vector.load %arg28[%c8_49, %c128_50] : memref<16x768xbf16, #tpu.memory_space<vmem>>, vector<8x128xbf16>
    %c8_51 = arith.constant 8 : index
    %c384_52 = arith.constant 384 : index
    %87 = vector.load %arg28[%c8_51, %c384_52] : memref<16x768xbf16, #tpu.memory_space<vmem>>, vector<8x128xbf16>
    %c8_53 = arith.constant 8 : index
    %c640_54 = arith.constant 640 : index
    %88 = vector.load %arg28[%c8_53, %c640_54] : memref<16x768xbf16, #tpu.memory_space<vmem>>, vector<8x128xbf16>
    %cst_55 = arith.constant dense<0.000000e+00> : vector<8x8xf32>
    %89 = tpu.matmul %86, %87, %cst_55 {dimension_numbers = #tpu.dot_dimension_numbers<[1], [1], [0], [0], [0, 0, 1, 0], [], []>} : vector<8x128xbf16>, vector<8x128xbf16>, vector<8x8xf32> -> vector<8x8xf32>
    %90 = arith.addf %89, %66 : vector<8x8xf32>
    %cst_56 = arith.constant dense<0xFF800000> : vector<8xf32>
    %91 = vector.multi_reduction <maximumf>, %90, %cst_56 [1] : vector<8x8xf32> to vector<8xf32>
    %92 = vector.shape_cast %91 : vector<8xf32> to vector<8x1xf32>
    %93 = vector.broadcast %92 : vector<8x1xf32> to vector<8x8xf32>
    %94 = arith.subf %90, %93 : vector<8x8xf32>
    %95 = math.exp %94 : vector<8x8xf32>
    %cst_57 = arith.constant dense<0.000000e+00> : vector<8xf32>
    %96 = vector.multi_reduction <add>, %95, %cst_57 [1] : vector<8x8xf32> to vector<8xf32>
    %97 = vector.shape_cast %96 : vector<8xf32> to vector<8x1xf32>
    %98 = tpu.reciprocal %97 {approx = true} : vector<8x1xf32> -> vector<8x1xf32>
    %99 = vector.broadcast %98 : vector<8x1xf32> to vector<8x8xf32>
    %100 = arith.mulf %95, %99 : vector<8x8xf32>
    %101 = arith.truncf %100 : vector<8x8xf32> to vector<8x8xbf16>
    %cst_58 = arith.constant dense<0.000000e+00> : vector<8x128xf32>
    %102 = tpu.matmul %101, %88, %cst_58 {dimension_numbers = #tpu.dot_dimension_numbers<[1], [0], [0], [1], [0, 0, 1, 1], [], []>} : vector<8x8xbf16>, vector<8x128xbf16>, vector<8x128xf32> -> vector<8x128xf32>
    %103 = arith.truncf %102 : vector<8x128xf32> to vector<8x128xbf16>
    %c8_59 = arith.constant 8 : index
    %c128_60 = arith.constant 128 : index
    %104 = vector.load %arg31[%c8_59, %c128_60] : memref<16x256xbf16, #tpu.memory_space<vmem>>, vector<8x128xbf16>
    tpu.vector_store %arg31[%c8_59, %c128_60], %103 {strides = array<i32>} : memref<16x256xbf16, #tpu.memory_space<vmem>>, vector<8x128xbf16>,
    %c0_61 = arith.constant 0 : index
    %c0_62 = arith.constant 0 : index
    %105 = vector.load %arg31[%c0_61, %c0_62] : memref<16x256xbf16, #tpu.memory_space<vmem>>, vector<16x256xbf16>
    %c0_63 = arith.constant 0 : index
    %c0_64 = arith.constant 0 : index
    %c0_65 = arith.constant 0 : index
    %106 = vector.load %arg9[%c0_63, %c0_64, %c0_65] : memref<1x256x128xbf16, #tpu.memory_space<vmem>>, vector<1x256x128xbf16>
    %107 = vector.shape_cast %106 : vector<1x256x128xbf16> to vector<256x128xbf16>
    %cst_66 = arith.constant dense<0.000000e+00> : vector<16x128xf32>
    %108 = tpu.matmul %105, %107, %cst_66 {dimension_numbers = #tpu.dot_dimension_numbers<[1], [0], [0], [1], [0, 0, 1, 1], [], []>} : vector<16x256xbf16>, vector<256x128xbf16>, vector<16x128xf32> -> vector<16x128xf32>
    %c0_67 = arith.constant 0 : index
    %c0_68 = arith.constant 0 : index
    %c0_69 = arith.constant 0 : index
    %109 = vector.load %arg10[%c0_67, %c0_68, %c0_69] : memref<1x1x128xf32, #tpu.memory_space<vmem>>, vector<1x1x128xf32>
    %110 = vector.shape_cast %109 : vector<1x1x128xf32> to vector<1x128xf32>
    %111 = vector.broadcast %110 : vector<1x128xf32> to vector<16x128xf32>
    %112 = arith.addf %108, %111 : vector<16x128xf32>
    %113 = arith.addf %112, %3 : vector<16x128xf32>
    %cst_70 = arith.constant dense<0.000000e+00> : vector<16xf32>
    %114 = vector.multi_reduction <add>, %113, %cst_70 [1] : vector<16x128xf32> to vector<16xf32>
    %115 = vector.shape_cast %114 : vector<16xf32> to vector<16x1xf32>
    %cst_71 = arith.constant 1.280000e+02 : f32
    %116 = vector.broadcast %cst_71 : f32 to vector<16x1xf32>
    %117 = arith.divf %115, %116 : vector<16x1xf32>
    %118 = vector.broadcast %117 : vector<16x1xf32> to vector<16x128xf32>
    %119 = arith.subf %113, %118 : vector<16x128xf32>
    %120 = arith.mulf %119, %119 : vector<16x128xf32>
    %cst_72 = arith.constant dense<0.000000e+00> : vector<16xf32>
    %121 = vector.multi_reduction <add>, %120, %cst_72 [1] : vector<16x128xf32> to vector<16xf32>
    %122 = vector.shape_cast %121 : vector<16xf32> to vector<16x1xf32>
    %cst_73 = arith.constant 1.280000e+02 : f32
    %123 = vector.broadcast %cst_73 : f32 to vector<16x1xf32>
    %124 = arith.divf %122, %123 : vector<16x1xf32>
    %cst_74 = arith.constant 9.99999974E-6 : f32
    %125 = vector.broadcast %cst_74 : f32 to vector<16x1xf32>
    %126 = arith.addf %124, %125 : vector<16x1xf32>
    %127 = math.rsqrt %126 : vector<16x1xf32>
    %128 = vector.broadcast %127 : vector<16x1xf32> to vector<16x128xf32>
    %129 = arith.mulf %119, %128 : vector<16x128xf32>
    %c0_75 = arith.constant 0 : index
    %c0_76 = arith.constant 0 : index
    %c0_77 = arith.constant 0 : index
    %130 = vector.load %arg11[%c0_75, %c0_76, %c0_77] : memref<1x1x128xf32, #tpu.memory_space<vmem>>, vector<1x1x128xf32>
    %131 = vector.shape_cast %130 : vector<1x1x128xf32> to vector<1x128xf32>
    %132 = vector.broadcast %131 : vector<1x128xf32> to vector<16x128xf32>
    %133 = arith.mulf %129, %132 : vector<16x128xf32>
    %c0_78 = arith.constant 0 : index
    %c0_79 = arith.constant 0 : index
    %c0_80 = arith.constant 0 : index
    %134 = vector.load %arg12[%c0_78, %c0_79, %c0_80] : memref<1x1x128xf32, #tpu.memory_space<vmem>>, vector<1x1x128xf32>
    %135 = vector.shape_cast %134 : vector<1x1x128xf32> to vector<1x128xf32>
    %136 = vector.broadcast %135 : vector<1x128xf32> to vector<16x128xf32>
    %137 = arith.addf %133, %136 : vector<16x128xf32>
    %138 = vector.broadcast %4 : vector<16x1xf32> to vector<16x128xf32>
    %139 = arith.mulf %137, %138 : vector<16x128xf32>
    %140 = arith.truncf %139 : vector<16x128xf32> to vector<16x128xbf16>
    %c0_81 = arith.constant 0 : index
    %c0_82 = arith.constant 0 : index
    %c0_83 = arith.constant 0 : index
    %141 = vector.load %arg13[%c0_81, %c0_82, %c0_83] : memref<1x128x256xbf16, #tpu.memory_space<vmem>>, vector<1x128x256xbf16>
    %142 = vector.shape_cast %141 : vector<1x128x256xbf16> to vector<128x256xbf16>
    %cst_84 = arith.constant dense<0.000000e+00> : vector<16x256xf32>
    %143 = tpu.matmul %140, %142, %cst_84 {dimension_numbers = #tpu.dot_dimension_numbers<[1], [0], [0], [1], [0, 0, 1, 1], [], []>} : vector<16x128xbf16>, vector<128x256xbf16>, vector<16x256xf32> -> vector<16x256xf32>
    %c0_85 = arith.constant 0 : index
    %c0_86 = arith.constant 0 : index
    %c0_87 = arith.constant 0 : index
    %144 = vector.load %arg14[%c0_85, %c0_86, %c0_87] : memref<1x1x256xf32, #tpu.memory_space<vmem>>, vector<1x1x256xf32>
    %145 = vector.shape_cast %144 : vector<1x1x256xf32> to vector<1x256xf32>
    %146 = vector.broadcast %145 : vector<1x256xf32> to vector<16x256xf32>
    %147 = arith.addf %143, %146 : vector<16x256xf32>
    %148 = arith.truncf %147 : vector<16x256xf32> to vector<16x256xbf16>
    %c0_88 = arith.constant 0 : index
    %c0_89 = arith.constant 0 : index
    %149 = vector.load %arg29[%c0_88, %c0_89] : memref<16x256xbf16, #tpu.memory_space<vmem>>, vector<16x256xbf16>
    tpu.vector_store %arg29[%c0_88, %c0_89], %148 {strides = array<i32>} : memref<16x256xbf16, #tpu.memory_space<vmem>>, vector<16x256xbf16>,
    %c0_90 = arith.constant 0 : index
    %c0_91 = arith.constant 0 : index
    %150 = vector.load %arg3[%c0_90, %c0_91] : memref<32x128xbf16, #tpu.memory_space<vmem>>, vector<32x128xbf16>
    %c0_92 = arith.constant 0 : index
    %c0_93 = arith.constant 0 : index
    %c0_94 = arith.constant 0 : index
    %151 = vector.load %arg15[%c0_92, %c0_93, %c0_94] : memref<1x128x512xbf16, #tpu.memory_space<vmem>>, vector<1x128x512xbf16>
    %152 = vector.shape_cast %151 : vector<1x128x512xbf16> to vector<128x512xbf16>
    %cst_95 = arith.constant dense<0.000000e+00> : vector<32x512xf32>
    %153 = tpu.matmul %150, %152, %cst_95 {dimension_numbers = #tpu.dot_dimension_numbers<[1], [0], [0], [1], [0, 0, 1, 1], [], []>} : vector<32x128xbf16>, vector<128x512xbf16>, vector<32x512xf32> -> vector<32x512xf32>
    %c0_96 = arith.constant 0 : index
    %c0_97 = arith.constant 0 : index
    %c0_98 = arith.constant 0 : index
    %154 = vector.load %arg16[%c0_96, %c0_97, %c0_98] : memref<1x1x512xf32, #tpu.memory_space<vmem>>, vector<1x1x512xf32>
    %155 = vector.shape_cast %154 : vector<1x1x512xf32> to vector<1x512xf32>
    %156 = vector.broadcast %155 : vector<1x512xf32> to vector<32x512xf32>
    %157 = arith.addf %153, %156 : vector<32x512xf32>
    %158 = arith.truncf %157 : vector<32x512xf32> to vector<32x512xbf16>
    %c0_99 = arith.constant 0 : index
    %c0_100 = arith.constant 0 : index
    %159 = vector.load %arg30[%c0_99, %c0_100] : memref<32x512xbf16, #tpu.memory_space<vmem>>, vector<32x512xbf16>
    tpu.vector_store %arg30[%c0_99, %c0_100], %158 {strides = array<i32>} : memref<32x512xbf16, #tpu.memory_space<vmem>>, vector<32x512xbf16>,
    %c0_101 = arith.constant 0 : index
    %c0_102 = arith.constant 0 : index
    %c0_103 = arith.constant 0 : index
    %160 = vector.load %arg6[%c0_101, %c0_102, %c0_103] : memref<2x1x16xf32, #tpu.memory_space<vmem>>, vector<1x1x16xf32>
    %161 = vector.shape_cast %160 : vector<1x1x16xf32> to vector<1x16xf32>
    %c0_104 = arith.constant 0 : index
    %c0_105 = arith.constant 0 : index
    %162 = vector.load %arg29[%c0_104, %c0_105] : memref<16x256xbf16, #tpu.memory_space<vmem>>, vector<8x128xbf16>
    %c0_106 = arith.constant 0 : index
    %c0_107 = arith.constant 0 : index
    %163 = vector.load %arg30[%c0_106, %c0_107] : memref<32x512xbf16, #tpu.memory_space<vmem>>, vector<16x128xbf16>
    %c0_108 = arith.constant 0 : index
    %c256_109 = arith.constant 256 : index
    %164 = vector.load %arg30[%c0_108, %c256_109] : memref<32x512xbf16, #tpu.memory_space<vmem>>, vector<16x128xbf16>
    %cst_110 = arith.constant dense<0.000000e+00> : vector<8x16xf32>
    %165 = tpu.matmul %162, %163, %cst_110 {dimension_numbers = #tpu.dot_dimension_numbers<[1], [1], [0], [0], [0, 0, 1, 0], [], []>} : vector<8x128xbf16>, vector<16x128xbf16>, vector<8x16xf32> -> vector<8x16xf32>
    %166 = vector.broadcast %161 : vector<1x16xf32> to vector<8x16xf32>
    %167 = arith.addf %165, %166 : vector<8x16xf32>
    %cst_111 = arith.constant dense<0xFF800000> : vector<8xf32>
    %168 = vector.multi_reduction <maximumf>, %167, %cst_111 [1] : vector<8x16xf32> to vector<8xf32>
    %169 = vector.shape_cast %168 : vector<8xf32> to vector<8x1xf32>
    %170 = vector.broadcast %169 : vector<8x1xf32> to vector<8x16xf32>
    %171 = arith.subf %167, %170 : vector<8x16xf32>
    %172 = math.exp %171 : vector<8x16xf32>
    %cst_112 = arith.constant dense<0.000000e+00> : vector<8xf32>
    %173 = vector.multi_reduction <add>, %172, %cst_112 [1] : vector<8x16xf32> to vector<8xf32>
    %174 = vector.shape_cast %173 : vector<8xf32> to vector<8x1xf32>
    %175 = tpu.reciprocal %174 {approx = true} : vector<8x1xf32> -> vector<8x1xf32>
    %176 = vector.broadcast %175 : vector<8x1xf32> to vector<8x16xf32>
    %177 = arith.mulf %172, %176 : vector<8x16xf32>
    %178 = arith.truncf %177 : vector<8x16xf32> to vector<8x16xbf16>
    %cst_113 = arith.constant dense<0.000000e+00> : vector<8x128xf32>
    %179 = tpu.matmul %178, %164, %cst_113 {dimension_numbers = #tpu.dot_dimension_numbers<[1], [0], [0], [1], [0, 0, 1, 1], [], []>} : vector<8x16xbf16>, vector<16x128xbf16>, vector<8x128xf32> -> vector<8x128xf32>
    %180 = arith.truncf %179 : vector<8x128xf32> to vector<8x128xbf16>
    %c0_114 = arith.constant 0 : index
    %c0_115 = arith.constant 0 : index
    %181 = vector.load %arg31[%c0_114, %c0_115] : memref<16x256xbf16, #tpu.memory_space<vmem>>, vector<8x128xbf16>
    tpu.vector_store %arg31[%c0_114, %c0_115], %180 {strides = array<i32>} : memref<16x256xbf16, #tpu.memory_space<vmem>>, vector<8x128xbf16>,
    %c0_116 = arith.constant 0 : index
    %c128_117 = arith.constant 128 : index
    %182 = vector.load %arg29[%c0_116, %c128_117] : memref<16x256xbf16, #tpu.memory_space<vmem>>, vector<8x128xbf16>
    %c0_118 = arith.constant 0 : index
    %c128_119 = arith.constant 128 : index
    %183 = vector.load %arg30[%c0_118, %c128_119] : memref<32x512xbf16, #tpu.memory_space<vmem>>, vector<16x128xbf16>
    %c0_120 = arith.constant 0 : index
    %c384_121 = arith.constant 384 : index
    %184 = vector.load %arg30[%c0_120, %c384_121] : memref<32x512xbf16, #tpu.memory_space<vmem>>, vector<16x128xbf16>
    %cst_122 = arith.constant dense<0.000000e+00> : vector<8x16xf32>
    %185 = tpu.matmul %182, %183, %cst_122 {dimension_numbers = #tpu.dot_dimension_numbers<[1], [1], [0], [0], [0, 0, 1, 0], [], []>} : vector<8x128xbf16>, vector<16x128xbf16>, vector<8x16xf32> -> vector<8x16xf32>
    %186 = vector.broadcast %161 : vector<1x16xf32> to vector<8x16xf32>
    %187 = arith.addf %185, %186 : vector<8x16xf32>
    %cst_123 = arith.constant dense<0xFF800000> : vector<8xf32>
    %188 = vector.multi_reduction <maximumf>, %187, %cst_123 [1] : vector<8x16xf32> to vector<8xf32>
    %189 = vector.shape_cast %188 : vector<8xf32> to vector<8x1xf32>
    %190 = vector.broadcast %189 : vector<8x1xf32> to vector<8x16xf32>
    %191 = arith.subf %187, %190 : vector<8x16xf32>
    %192 = math.exp %191 : vector<8x16xf32>
    %cst_124 = arith.constant dense<0.000000e+00> : vector<8xf32>
    %193 = vector.multi_reduction <add>, %192, %cst_124 [1] : vector<8x16xf32> to vector<8xf32>
    %194 = vector.shape_cast %193 : vector<8xf32> to vector<8x1xf32>
    %195 = tpu.reciprocal %194 {approx = true} : vector<8x1xf32> -> vector<8x1xf32>
    %196 = vector.broadcast %195 : vector<8x1xf32> to vector<8x16xf32>
    %197 = arith.mulf %192, %196 : vector<8x16xf32>
    %198 = arith.truncf %197 : vector<8x16xf32> to vector<8x16xbf16>
    %cst_125 = arith.constant dense<0.000000e+00> : vector<8x128xf32>
    %199 = tpu.matmul %198, %184, %cst_125 {dimension_numbers = #tpu.dot_dimension_numbers<[1], [0], [0], [1], [0, 0, 1, 1], [], []>} : vector<8x16xbf16>, vector<16x128xbf16>, vector<8x128xf32> -> vector<8x128xf32>
    %200 = arith.truncf %199 : vector<8x128xf32> to vector<8x128xbf16>
    %c0_126 = arith.constant 0 : index
    %c128_127 = arith.constant 128 : index
    %201 = vector.load %arg31[%c0_126, %c128_127] : memref<16x256xbf16, #tpu.memory_space<vmem>>, vector<8x128xbf16>
    tpu.vector_store %arg31[%c0_126, %c128_127], %200 {strides = array<i32>} : memref<16x256xbf16, #tpu.memory_space<vmem>>, vector<8x128xbf16>,
    %c1_128 = arith.constant 1 : index
    %c0_129 = arith.constant 0 : index
    %c0_130 = arith.constant 0 : index
    %202 = vector.load %arg6[%c1_128, %c0_129, %c0_130] : memref<2x1x16xf32, #tpu.memory_space<vmem>>, vector<1x1x16xf32>
    %203 = vector.shape_cast %202 : vector<1x1x16xf32> to vector<1x16xf32>
    %c8_131 = arith.constant 8 : index
    %c0_132 = arith.constant 0 : index
    %204 = vector.load %arg29[%c8_131, %c0_132] : memref<16x256xbf16, #tpu.memory_space<vmem>>, vector<8x128xbf16>
    %c16 = arith.constant 16 : index
    %c0_133 = arith.constant 0 : index
    %205 = vector.load %arg30[%c16, %c0_133] : memref<32x512xbf16, #tpu.memory_space<vmem>>, vector<16x128xbf16>
    %c16_134 = arith.constant 16 : index
    %c256_135 = arith.constant 256 : index
    %206 = vector.load %arg30[%c16_134, %c256_135] : memref<32x512xbf16, #tpu.memory_space<vmem>>, vector<16x128xbf16>
    %cst_136 = arith.constant dense<0.000000e+00> : vector<8x16xf32>
    %207 = tpu.matmul %204, %205, %cst_136 {dimension_numbers = #tpu.dot_dimension_numbers<[1], [1], [0], [0], [0, 0, 1, 0], [], []>} : vector<8x128xbf16>, vector<16x128xbf16>, vector<8x16xf32> -> vector<8x16xf32>
    %208 = vector.broadcast %203 : vector<1x16xf32> to vector<8x16xf32>
    %209 = arith.addf %207, %208 : vector<8x16xf32>
    %cst_137 = arith.constant dense<0xFF800000> : vector<8xf32>
    %210 = vector.multi_reduction <maximumf>, %209, %cst_137 [1] : vector<8x16xf32> to vector<8xf32>
    %211 = vector.shape_cast %210 : vector<8xf32> to vector<8x1xf32>
    %212 = vector.broadcast %211 : vector<8x1xf32> to vector<8x16xf32>
    %213 = arith.subf %209, %212 : vector<8x16xf32>
    %214 = math.exp %213 : vector<8x16xf32>
    %cst_138 = arith.constant dense<0.000000e+00> : vector<8xf32>
    %215 = vector.multi_reduction <add>, %214, %cst_138 [1] : vector<8x16xf32> to vector<8xf32>
    %216 = vector.shape_cast %215 : vector<8xf32> to vector<8x1xf32>
    %217 = tpu.reciprocal %216 {approx = true} : vector<8x1xf32> -> vector<8x1xf32>
    %218 = vector.broadcast %217 : vector<8x1xf32> to vector<8x16xf32>
    %219 = arith.mulf %214, %218 : vector<8x16xf32>
    %220 = arith.truncf %219 : vector<8x16xf32> to vector<8x16xbf16>
    %cst_139 = arith.constant dense<0.000000e+00> : vector<8x128xf32>
    %221 = tpu.matmul %220, %206, %cst_139 {dimension_numbers = #tpu.dot_dimension_numbers<[1], [0], [0], [1], [0, 0, 1, 1], [], []>} : vector<8x16xbf16>, vector<16x128xbf16>, vector<8x128xf32> -> vector<8x128xf32>
    %222 = arith.truncf %221 : vector<8x128xf32> to vector<8x128xbf16>
    %c8_140 = arith.constant 8 : index
    %c0_141 = arith.constant 0 : index
    %223 = vector.load %arg31[%c8_140, %c0_141] : memref<16x256xbf16, #tpu.memory_space<vmem>>, vector<8x128xbf16>
    tpu.vector_store %arg31[%c8_140, %c0_141], %222 {strides = array<i32>} : memref<16x256xbf16, #tpu.memory_space<vmem>>, vector<8x128xbf16>,
    %c8_142 = arith.constant 8 : index
    %c128_143 = arith.constant 128 : index
    %224 = vector.load %arg29[%c8_142, %c128_143] : memref<16x256xbf16, #tpu.memory_space<vmem>>, vector<8x128xbf16>
    %c16_144 = arith.constant 16 : index
    %c128_145 = arith.constant 128 : index
    %225 = vector.load %arg30[%c16_144, %c128_145] : memref<32x512xbf16, #tpu.memory_space<vmem>>, vector<16x128xbf16>
    %c16_146 = arith.constant 16 : index
    %c384_147 = arith.constant 384 : index
    %226 = vector.load %arg30[%c16_146, %c384_147] : memref<32x512xbf16, #tpu.memory_space<vmem>>, vector<16x128xbf16>
    %cst_148 = arith.constant dense<0.000000e+00> : vector<8x16xf32>
    %227 = tpu.matmul %224, %225, %cst_148 {dimension_numbers = #tpu.dot_dimension_numbers<[1], [1], [0], [0], [0, 0, 1, 0], [], []>} : vector<8x128xbf16>, vector<16x128xbf16>, vector<8x16xf32> -> vector<8x16xf32>
    %228 = vector.broadcast %203 : vector<1x16xf32> to vector<8x16xf32>
    %229 = arith.addf %227, %228 : vector<8x16xf32>
    %cst_149 = arith.constant dense<0xFF800000> : vector<8xf32>
    %230 = vector.multi_reduction <maximumf>, %229, %cst_149 [1] : vector<8x16xf32> to vector<8xf32>
    %231 = vector.shape_cast %230 : vector<8xf32> to vector<8x1xf32>
    %232 = vector.broadcast %231 : vector<8x1xf32> to vector<8x16xf32>
    %233 = arith.subf %229, %232 : vector<8x16xf32>
    %234 = math.exp %233 : vector<8x16xf32>
    %cst_150 = arith.constant dense<0.000000e+00> : vector<8xf32>
    %235 = vector.multi_reduction <add>, %234, %cst_150 [1] : vector<8x16xf32> to vector<8xf32>
    %236 = vector.shape_cast %235 : vector<8xf32> to vector<8x1xf32>
    %237 = tpu.reciprocal %236 {approx = true} : vector<8x1xf32> -> vector<8x1xf32>
    %238 = vector.broadcast %237 : vector<8x1xf32> to vector<8x16xf32>
    %239 = arith.mulf %234, %238 : vector<8x16xf32>
    %240 = arith.truncf %239 : vector<8x16xf32> to vector<8x16xbf16>
    %cst_151 = arith.constant dense<0.000000e+00> : vector<8x128xf32>
    %241 = tpu.matmul %240, %226, %cst_151 {dimension_numbers = #tpu.dot_dimension_numbers<[1], [0], [0], [1], [0, 0, 1, 1], [], []>} : vector<8x16xbf16>, vector<16x128xbf16>, vector<8x128xf32> -> vector<8x128xf32>
    %242 = arith.truncf %241 : vector<8x128xf32> to vector<8x128xbf16>
    %c8_152 = arith.constant 8 : index
    %c128_153 = arith.constant 128 : index
    %243 = vector.load %arg31[%c8_152, %c128_153] : memref<16x256xbf16, #tpu.memory_space<vmem>>, vector<8x128xbf16>
    tpu.vector_store %arg31[%c8_152, %c128_153], %242 {strides = array<i32>} : memref<16x256xbf16, #tpu.memory_space<vmem>>, vector<8x128xbf16>,
    %c0_154 = arith.constant 0 : index
    %c0_155 = arith.constant 0 : index
    %244 = vector.load %arg31[%c0_154, %c0_155] : memref<16x256xbf16, #tpu.memory_space<vmem>>, vector<16x256xbf16>
    %c0_156 = arith.constant 0 : index
    %c0_157 = arith.constant 0 : index
    %c0_158 = arith.constant 0 : index
    %245 = vector.load %arg17[%c0_156, %c0_157, %c0_158] : memref<1x256x128xbf16, #tpu.memory_space<vmem>>, vector<1x256x128xbf16>
    %246 = vector.shape_cast %245 : vector<1x256x128xbf16> to vector<256x128xbf16>
    %cst_159 = arith.constant dense<0.000000e+00> : vector<16x128xf32>
    %247 = tpu.matmul %244, %246, %cst_159 {dimension_numbers = #tpu.dot_dimension_numbers<[1], [0], [0], [1], [0, 0, 1, 1], [], []>} : vector<16x256xbf16>, vector<256x128xbf16>, vector<16x128xf32> -> vector<16x128xf32>
    %c0_160 = arith.constant 0 : index
    %c0_161 = arith.constant 0 : index
    %c0_162 = arith.constant 0 : index
    %248 = vector.load %arg18[%c0_160, %c0_161, %c0_162] : memref<1x1x128xf32, #tpu.memory_space<vmem>>, vector<1x1x128xf32>
    %249 = vector.shape_cast %248 : vector<1x1x128xf32> to vector<1x128xf32>
    %250 = vector.broadcast %249 : vector<1x128xf32> to vector<16x128xf32>
    %251 = arith.addf %247, %250 : vector<16x128xf32>
    %252 = arith.addf %251, %139 : vector<16x128xf32>
    %cst_163 = arith.constant dense<0.000000e+00> : vector<16xf32>
    %253 = vector.multi_reduction <add>, %252, %cst_163 [1] : vector<16x128xf32> to vector<16xf32>
    %254 = vector.shape_cast %253 : vector<16xf32> to vector<16x1xf32>
    %cst_164 = arith.constant 1.280000e+02 : f32
    %255 = vector.broadcast %cst_164 : f32 to vector<16x1xf32>
    %256 = arith.divf %254, %255 : vector<16x1xf32>
    %257 = vector.broadcast %256 : vector<16x1xf32> to vector<16x128xf32>
    %258 = arith.subf %252, %257 : vector<16x128xf32>
    %259 = arith.mulf %258, %258 : vector<16x128xf32>
    %cst_165 = arith.constant dense<0.000000e+00> : vector<16xf32>
    %260 = vector.multi_reduction <add>, %259, %cst_165 [1] : vector<16x128xf32> to vector<16xf32>
    %261 = vector.shape_cast %260 : vector<16xf32> to vector<16x1xf32>
    %cst_166 = arith.constant 1.280000e+02 : f32
    %262 = vector.broadcast %cst_166 : f32 to vector<16x1xf32>
    %263 = arith.divf %261, %262 : vector<16x1xf32>
    %cst_167 = arith.constant 9.99999974E-6 : f32
    %264 = vector.broadcast %cst_167 : f32 to vector<16x1xf32>
    %265 = arith.addf %263, %264 : vector<16x1xf32>
    %266 = math.rsqrt %265 : vector<16x1xf32>
    %267 = vector.broadcast %266 : vector<16x1xf32> to vector<16x128xf32>
    %268 = arith.mulf %258, %267 : vector<16x128xf32>
    %c0_168 = arith.constant 0 : index
    %c0_169 = arith.constant 0 : index
    %c0_170 = arith.constant 0 : index
    %269 = vector.load %arg19[%c0_168, %c0_169, %c0_170] : memref<1x1x128xf32, #tpu.memory_space<vmem>>, vector<1x1x128xf32>
    %270 = vector.shape_cast %269 : vector<1x1x128xf32> to vector<1x128xf32>
    %271 = vector.broadcast %270 : vector<1x128xf32> to vector<16x128xf32>
    %272 = arith.mulf %268, %271 : vector<16x128xf32>
    %c0_171 = arith.constant 0 : index
    %c0_172 = arith.constant 0 : index
    %c0_173 = arith.constant 0 : index
    %273 = vector.load %arg20[%c0_171, %c0_172, %c0_173] : memref<1x1x128xf32, #tpu.memory_space<vmem>>, vector<1x1x128xf32>
    %274 = vector.shape_cast %273 : vector<1x1x128xf32> to vector<1x128xf32>
    %275 = vector.broadcast %274 : vector<1x128xf32> to vector<16x128xf32>
    %276 = arith.addf %272, %275 : vector<16x128xf32>
    %277 = vector.broadcast %4 : vector<16x1xf32> to vector<16x128xf32>
    %278 = arith.mulf %276, %277 : vector<16x128xf32>
    %279 = arith.truncf %278 : vector<16x128xf32> to vector<16x128xbf16>
    %c0_174 = arith.constant 0 : index
    %c0_175 = arith.constant 0 : index
    %c0_176 = arith.constant 0 : index
    %280 = vector.load %arg21[%c0_174, %c0_175, %c0_176] : memref<1x128x256xbf16, #tpu.memory_space<vmem>>, vector<1x128x256xbf16>
    %281 = vector.shape_cast %280 : vector<1x128x256xbf16> to vector<128x256xbf16>
    %cst_177 = arith.constant dense<0.000000e+00> : vector<16x256xf32>
    %282 = tpu.matmul %279, %281, %cst_177 {dimension_numbers = #tpu.dot_dimension_numbers<[1], [0], [0], [1], [0, 0, 1, 1], [], []>} : vector<16x128xbf16>, vector<128x256xbf16>, vector<16x256xf32> -> vector<16x256xf32>
    %c0_178 = arith.constant 0 : index
    %c0_179 = arith.constant 0 : index
    %c0_180 = arith.constant 0 : index
    %283 = vector.load %arg22[%c0_178, %c0_179, %c0_180] : memref<1x1x256xf32, #tpu.memory_space<vmem>>, vector<1x1x256xf32>
    %284 = vector.shape_cast %283 : vector<1x1x256xf32> to vector<1x256xf32>
    %285 = vector.broadcast %284 : vector<1x256xf32> to vector<16x256xf32>
    %286 = arith.addf %282, %285 : vector<16x256xf32>
    %cst_181 = arith.constant 0.000000e+00 : f32
    %287 = vector.broadcast %cst_181 : f32 to vector<16x256xf32>
    %288 = arith.maximumf %286, %287 : vector<16x256xf32>
    %289 = arith.truncf %288 : vector<16x256xf32> to vector<16x256xbf16>
    %c0_182 = arith.constant 0 : index
    %c0_183 = arith.constant 0 : index
    %c0_184 = arith.constant 0 : index
    %290 = vector.load %arg23[%c0_182, %c0_183, %c0_184] : memref<1x256x128xbf16, #tpu.memory_space<vmem>>, vector<1x256x128xbf16>
    %291 = vector.shape_cast %290 : vector<1x256x128xbf16> to vector<256x128xbf16>
    %cst_185 = arith.constant dense<0.000000e+00> : vector<16x128xf32>
    %292 = tpu.matmul %289, %291, %cst_185 {dimension_numbers = #tpu.dot_dimension_numbers<[1], [0], [0], [1], [0, 0, 1, 1], [], []>} : vector<16x256xbf16>, vector<256x128xbf16>, vector<16x128xf32> -> vector<16x128xf32>
    %c0_186 = arith.constant 0 : index
    %c0_187 = arith.constant 0 : index
    %c0_188 = arith.constant 0 : index
    %293 = vector.load %arg24[%c0_186, %c0_187, %c0_188] : memref<1x1x128xf32, #tpu.memory_space<vmem>>, vector<1x1x128xf32>
    %294 = vector.shape_cast %293 : vector<1x1x128xf32> to vector<1x128xf32>
    %295 = vector.broadcast %294 : vector<1x128xf32> to vector<16x128xf32>
    %296 = arith.addf %292, %295 : vector<16x128xf32>
    %297 = arith.addf %296, %278 : vector<16x128xf32>
    %cst_189 = arith.constant dense<0.000000e+00> : vector<16xf32>
    %298 = vector.multi_reduction <add>, %297, %cst_189 [1] : vector<16x128xf32> to vector<16xf32>
    %299 = vector.shape_cast %298 : vector<16xf32> to vector<16x1xf32>
    %cst_190 = arith.constant 1.280000e+02 : f32
    %300 = vector.broadcast %cst_190 : f32 to vector<16x1xf32>
    %301 = arith.divf %299, %300 : vector<16x1xf32>
    %302 = vector.broadcast %301 : vector<16x1xf32> to vector<16x128xf32>
    %303 = arith.subf %297, %302 : vector<16x128xf32>
    %304 = arith.mulf %303, %303 : vector<16x128xf32>
    %cst_191 = arith.constant dense<0.000000e+00> : vector<16xf32>
    %305 = vector.multi_reduction <add>, %304, %cst_191 [1] : vector<16x128xf32> to vector<16xf32>
    %306 = vector.shape_cast %305 : vector<16xf32> to vector<16x1xf32>
    %cst_192 = arith.constant 1.280000e+02 : f32
    %307 = vector.broadcast %cst_192 : f32 to vector<16x1xf32>
    %308 = arith.divf %306, %307 : vector<16x1xf32>
    %cst_193 = arith.constant 9.99999974E-6 : f32
    %309 = vector.broadcast %cst_193 : f32 to vector<16x1xf32>
    %310 = arith.addf %308, %309 : vector<16x1xf32>
    %311 = math.rsqrt %310 : vector<16x1xf32>
    %312 = vector.broadcast %311 : vector<16x1xf32> to vector<16x128xf32>
    %313 = arith.mulf %303, %312 : vector<16x128xf32>
    %c0_194 = arith.constant 0 : index
    %c0_195 = arith.constant 0 : index
    %c0_196 = arith.constant 0 : index
    %314 = vector.load %arg25[%c0_194, %c0_195, %c0_196] : memref<1x1x128xf32, #tpu.memory_space<vmem>>, vector<1x1x128xf32>
    %315 = vector.shape_cast %314 : vector<1x1x128xf32> to vector<1x128xf32>
    %316 = vector.broadcast %315 : vector<1x128xf32> to vector<16x128xf32>
    %317 = arith.mulf %313, %316 : vector<16x128xf32>
    %c0_197 = arith.constant 0 : index
    %c0_198 = arith.constant 0 : index
    %c0_199 = arith.constant 0 : index
    %318 = vector.load %arg26[%c0_197, %c0_198, %c0_199] : memref<1x1x128xf32, #tpu.memory_space<vmem>>, vector<1x1x128xf32>
    %319 = vector.shape_cast %318 : vector<1x1x128xf32> to vector<1x128xf32>
    %320 = vector.broadcast %319 : vector<1x128xf32> to vector<16x128xf32>
    %321 = arith.addf %317, %320 : vector<16x128xf32>
    %322 = vector.broadcast %4 : vector<16x1xf32> to vector<16x128xf32>
    %323 = arith.mulf %321, %322 : vector<16x128xf32>
    %c0_200 = arith.constant 0 : index
    %c0_201 = arith.constant 0 : index
    %324 = vector.load %arg27[%c0_200, %c0_201] : memref<16x128xf32, #tpu.memory_space<vmem>>, vector<16x128xf32>
    tpu.vector_store %arg27[%c0_200, %c0_201], %323 {strides = array<i32>} : memref<16x128xf32, #tpu.memory_space<vmem>>, vector<16x128xf32>,
    return
  }
  func.func @transform_0(%arg0: i32, %arg1: i32) -> (i32, i32) {
    %c0_i32 = arith.constant 0 : i32
    %c0_i32_0 = arith.constant 0 : i32
    return %arg0, %c0_i32 : i32, i32
  }
  func.func @transform_1(%arg0: i32, %arg1: i32) -> (i32, i32) {
    %c0_i32 = arith.constant 0 : i32
    %c0_i32_0 = arith.constant 0 : i32
    return %arg0, %c0_i32 : i32, i32
  }
  func.func @transform_2(%arg0: i32, %arg1: i32) -> (i32, i32) {
    %c0_i32 = arith.constant 0 : i32
    %c0_i32_0 = arith.constant 0 : i32
    return %arg0, %c0_i32 : i32, i32
  }
  func.func @transform_3(%arg0: i32, %arg1: i32) -> (i32, i32, i32) {
    %c0_i32 = arith.constant 0 : i32
    %c0_i32_0 = arith.constant 0 : i32
    %c0_i32_1 = arith.constant 0 : i32
    return %arg0, %c0_i32, %c0_i32_0 : i32, i32, i32
  }
  func.func @transform_4(%arg0: i32, %arg1: i32) -> (i32, i32, i32) {
    %c0_i32 = arith.constant 0 : i32
    %c0_i32_0 = arith.constant 0 : i32
    %c0_i32_1 = arith.constant 0 : i32
    return %arg0, %c0_i32, %c0_i32_0 : i32, i32, i32
  }
  func.func @transform_5(%arg0: i32, %arg1: i32) -> (i32, i32, i32) {
    %c0_i32 = arith.constant 0 : i32
    %c0_i32_0 = arith.constant 0 : i32
    %c0_i32_1 = arith.constant 0 : i32
    return %arg1, %c0_i32, %c0_i32_0 : i32, i32, i32
  }
  func.func @transform_6(%arg0: i32, %arg1: i32) -> (i32, i32, i32) {
    %c0_i32 = arith.constant 0 : i32
    %c0_i32_0 = arith.constant 0 : i32
    %c0_i32_1 = arith.constant 0 : i32
    return %arg1, %c0_i32, %c0_i32_0 : i32, i32, i32
  }
  func.func @transform_7(%arg0: i32, %arg1: i32) -> (i32, i32, i32) {
    %c0_i32 = arith.constant 0 : i32
    %c0_i32_0 = arith.constant 0 : i32
    %c0_i32_1 = arith.constant 0 : i32
    return %arg1, %c0_i32, %c0_i32_0 : i32, i32, i32
  }
  func.func @transform_8(%arg0: i32, %arg1: i32) -> (i32, i32, i32) {
    %c0_i32 = arith.constant 0 : i32
    %c0_i32_0 = arith.constant 0 : i32
    %c0_i32_1 = arith.constant 0 : i32
    return %arg1, %c0_i32, %c0_i32_0 : i32, i32, i32
  }
  func.func @transform_9(%arg0: i32, %arg1: i32) -> (i32, i32, i32) {
    %c0_i32 = arith.constant 0 : i32
    %c0_i32_0 = arith.constant 0 : i32
    %c0_i32_1 = arith.constant 0 : i32
    return %arg1, %c0_i32, %c0_i32_0 : i32, i32, i32
  }
  func.func @transform_10(%arg0: i32, %arg1: i32) -> (i32, i32, i32) {
    %c0_i32 = arith.constant 0 : i32
    %c0_i32_0 = arith.constant 0 : i32
    %c0_i32_1 = arith.constant 0 : i32
    return %arg1, %c0_i32, %c0_i32_0 : i32, i32, i32
  }
  func.func @transform_11(%arg0: i32, %arg1: i32) -> (i32, i32, i32) {
    %c0_i32 = arith.constant 0 : i32
    %c0_i32_0 = arith.constant 0 : i32
    %c0_i32_1 = arith.constant 0 : i32
    return %arg1, %c0_i32, %c0_i32_0 : i32, i32, i32
  }
  func.func @transform_12(%arg0: i32, %arg1: i32) -> (i32, i32, i32) {
    %c0_i32 = arith.constant 0 : i32
    %c0_i32_0 = arith.constant 0 : i32
    %c0_i32_1 = arith.constant 0 : i32
    return %arg1, %c0_i32, %c0_i32_0 : i32, i32, i32
  }
  func.func @transform_13(%arg0: i32, %arg1: i32) -> (i32, i32, i32) {
    %c0_i32 = arith.constant 0 : i32
    %c0_i32_0 = arith.constant 0 : i32
    %c0_i32_1 = arith.constant 0 : i32
    return %arg1, %c0_i32, %c0_i32_0 : i32, i32, i32
  }
  func.func @transform_14(%arg0: i32, %arg1: i32) -> (i32, i32, i32) {
    %c0_i32 = arith.constant 0 : i32
    %c0_i32_0 = arith.constant 0 : i32
    %c0_i32_1 = arith.constant 0 : i32
    return %arg1, %c0_i32, %c0_i32_0 : i32, i32, i32
  }
  func.func @transform_15(%arg0: i32, %arg1: i32) -> (i32, i32, i32) {
    %c0_i32 = arith.constant 0 : i32
    %c0_i32_0 = arith.constant 0 : i32
    %c0_i32_1 = arith.constant 0 : i32
    return %arg1, %c0_i32, %c0_i32_0 : i32, i32, i32
  }
  func.func @transform_16(%arg0: i32, %arg1: i32) -> (i32, i32, i32) {
    %c0_i32 = arith.constant 0 : i32
    %c0_i32_0 = arith.constant 0 : i32
    %c0_i32_1 = arith.constant 0 : i32
    return %arg1, %c0_i32, %c0_i32_0 : i32, i32, i32
  }
  func.func @transform_17(%arg0: i32, %arg1: i32) -> (i32, i32, i32) {
    %c0_i32 = arith.constant 0 : i32
    %c0_i32_0 = arith.constant 0 : i32
    %c0_i32_1 = arith.constant 0 : i32
    return %arg1, %c0_i32, %c0_i32_0 : i32, i32, i32
  }
  func.func @transform_18(%arg0: i32, %arg1: i32) -> (i32, i32, i32) {
    %c0_i32 = arith.constant 0 : i32
    %c0_i32_0 = arith.constant 0 : i32
    %c0_i32_1 = arith.constant 0 : i32
    return %arg1, %c0_i32, %c0_i32_0 : i32, i32, i32
  }
  func.func @transform_19(%arg0: i32, %arg1: i32) -> (i32, i32, i32) {
    %c0_i32 = arith.constant 0 : i32
    %c0_i32_0 = arith.constant 0 : i32
    %c0_i32_1 = arith.constant 0 : i32
    return %arg1, %c0_i32, %c0_i32_0 : i32, i32, i32
  }
  func.func @transform_20(%arg0: i32, %arg1: i32) -> (i32, i32, i32) {
    %c0_i32 = arith.constant 0 : i32
    %c0_i32_0 = arith.constant 0 : i32
    %c0_i32_1 = arith.constant 0 : i32
    return %arg1, %c0_i32, %c0_i32_0 : i32, i32, i32
  }
  func.func @transform_21(%arg0: i32, %arg1: i32) -> (i32, i32, i32) {
    %c0_i32 = arith.constant 0 : i32
    %c0_i32_0 = arith.constant 0 : i32
    %c0_i32_1 = arith.constant 0 : i32
    return %arg1, %c0_i32, %c0_i32_0 : i32, i32, i32
  }
  func.func @transform_22(%arg0: i32, %arg1: i32) -> (i32, i32, i32) {
    %c0_i32 = arith.constant 0 : i32
    %c0_i32_0 = arith.constant 0 : i32
    %c0_i32_1 = arith.constant 0 : i32
    return %arg1, %c0_i32, %c0_i32_0 : i32, i32, i32
  }
  func.func @transform_23(%arg0: i32, %arg1: i32) -> (i32, i32, i32) {
    %c0_i32 = arith.constant 0 : i32
    %c0_i32_0 = arith.constant 0 : i32
    %c0_i32_1 = arith.constant 0 : i32
    return %arg1, %c0_i32, %c0_i32_0 : i32, i32, i32
  }
  func.func @transform_24(%arg0: i32, %arg1: i32) -> (i32, i32, i32) {
    %c0_i32 = arith.constant 0 : i32
    %c0_i32_0 = arith.constant 0 : i32
    %c0_i32_1 = arith.constant 0 : i32
    return %arg1, %c0_i32, %c0_i32_0 : i32, i32, i32
  }
  func.func @transform_25(%arg0: i32, %arg1: i32) -> (i32, i32) {
    %c0_i32 = arith.constant 0 : i32
    %c0_i32_0 = arith.constant 0 : i32
    return %arg0, %c0_i32 : i32, i32
  }
}

</mosaic_0001>

<bundles_post_ra>
// kernel: tpu_custom_call.1
= control target key start
LH: loop header
LB: loop body
LE: loop exit
PB: predicated region body
PF: predicated region fallthrough
CT: control target
= control target key end

     0   :  { %s6748_s0 = inlined_call_operand.vmem [shape: f32[16,128], index: 0, kind: input, shape index: {}]   ;;  %s6749_s1 = inlined_call_operand.hbm [shape: bf16[32,128], index: 1, kind: input, shape index: {}]   ;;  %s6750_s2 = inlined_call_operand.vmem [shape: f32[16,1], index: 2, kind: input, shape index: {}]   ;;  %s6751_s3 = inlined_call_operand.hbm [shape: f32[2,1,8], index: 3, kind: input, shape index: {}]   ;;  %s6752_s4 = inlined_call_operand.vmem [shape: f32[2,1,16], index: 4, kind: input, shape index: {}]   ;;  %s6753_s5 = inlined_call_operand.hbm [shape: bf16[2,128,768], index: 5, kind: input, shape index: {}]   ;;  %s6754_s6 = inlined_call_operand.vmem [shape: f32[2,1,768], index: 6, kind: input, shape index: {}]   ;;  %s6755_s7 = inlined_call_operand.hbm [shape: bf16[2,256,128], index: 7, kind: input, shape index: {}]   ;;  %s6756_s8 = inlined_call_operand.hbm [shape: f32[2,1,128], index: 8, kind: input, shape index: {}]   ;;  %s6757_s9 = inlined_call_operand.vmem [shape: f32[2,1,128], index: 9, kind: input, shape index: {}]   ;;  %s6758_s10 = inlined_call_operand.vmem [shape: f32[2,1,128], index: 10, kind: input, shape index: {}]   ;;  %s6759_s11 = inlined_call_operand.hbm [shape: bf16[2,128,256], index: 11, kind: input, shape index: {}]   ;;  %s6760_s12 = inlined_call_operand.vmem [shape: f32[2,1,256], index: 12, kind: input, shape index: {}]   ;;  %s6761_s13 = inlined_call_operand.hbm [shape: bf16[2,128,512], index: 13, kind: input, shape index: {}]   ;;  %s6762_s14 = inlined_call_operand.vmem [shape: f32[2,1,512], index: 14, kind: input, shape index: {}]   ;;  %s6763_s15 = inlined_call_operand.hbm [shape: bf16[2,256,128], index: 15, kind: input, shape index: {}]   ;;  %s6764_s16 = inlined_call_operand.vmem [shape: f32[2,1,128], index: 16, kind: input, shape index: {}]   ;;  %s6765_s17 = inlined_call_operand.vmem [shape: f32[2,1,128], index: 17, kind: input, shape index: {}]   ;;  %s6766_s18 = inlined_call_operand.vmem [shape: f32[2,1,128], index: 18, kind: input, shape index: {}]   ;;  %s6767_s19 = inlined_call_operand.hbm [shape: bf16[2,128,256], index: 19, kind: input, shape index: {}]   ;;  %s6768_s20 = inlined_call_operand.vmem [shape: f32[2,1,256], index: 20, kind: input, shape index: {}]   ;;  %s6769_s21 = inlined_call_operand.hbm [shape: bf16[2,256,128], index: 21, kind: input, shape index: {}]   ;;  %s6770_s22 = inlined_call_operand.vmem [shape: f32[2,1,128], index: 22, kind: input, shape index: {}]   ;;  %s6771_s23 = inlined_call_operand.vmem [shape: f32[2,1,128], index: 23, kind: input, shape index: {}]   ;;  %s6772_s24 = inlined_call_operand.vmem [shape: f32[2,1,128], index: 24, kind: input, shape index: {}]   ;;  %s6773_s25 = inlined_call_operand.hbm [shape: f32[16,128], index: 25, kind: output, shape index: {}]  }
   0x1   :  { %6815 = sst [smem:[#allocation33_spill]] %s6748_s0 }
   0x2   :  { %6816 = sst [smem:[#allocation34_spill]] %s6749_s1 }
   0x3   :  { %6817 = sst [smem:[#allocation35_spill]] %s6750_s2 }
   0x4   :  { %6818 = sst [smem:[#allocation36_spill]] %s6751_s3 }
   0x5   :  { %6819 = sst [smem:[#allocation37_spill]] %s6752_s4 }
   0x6   :  { %6820 = sst [smem:[#allocation38_spill]] %s6753_s5 }
   0x7   :  { %6821 = sst [smem:[#allocation39_spill]] %s6754_s6 }
   0x8   :  { %6822 = sst [smem:[#allocation40_spill]] %s6755_s7 }
   0x9   :  { %6823 = sst [smem:[#allocation41_spill]] %s6756_s8 }
   0xa   :  { %6824 = sst [smem:[#allocation42_spill]] %s6757_s9 }
   0xb   :  { %6825 = sst [smem:[#allocation43_spill]] %s6758_s10 }
   0xc   :  { %6826 = sst [smem:[#allocation44_spill]] %s6759_s11 }
   0xd   :  { %6827 = sst [smem:[#allocation45_spill]] %s6760_s12 }
   0xe   :  { %6828 = sst [smem:[#allocation46_spill]] %s6761_s13 }
   0xf   :  { %6829 = sst [smem:[#allocation47_spill]] %s6762_s14 }
  0x10   :  { %6830 = sst [smem:[#allocation48_spill]] %s6763_s15 }
  0x11   :  { %6831 = sst [smem:[#allocation49_spill]] %s6764_s16 }
  0x12   :  { %6832 = sst [smem:[#allocation50_spill]] %s6765_s17 }
  0x13   :  { %6833 = sst [smem:[#allocation51_spill]] %s6766_s18 }
  0x14   :  { %6834 = sst [smem:[#allocation52_spill]] %s6767_s19 }
  0x15   :  { %6835 = sst [smem:[#allocation53_spill]] %s6768_s20 }
  0x16   :  { %6836 = sst [smem:[#allocation54_spill]] %s6769_s21 }
  0x17   :  { %6837 = sst [smem:[#allocation55_spill]] %s6770_s22 }
  0x18   :  { %6838 = sst [smem:[#allocation56_spill]] %s6771_s23 }
  0x19   :  { %6839 = sst [smem:[#allocation57_spill]] %s6772_s24 }
  0x1a   :  { %6840 = sst [smem:[#allocation58_spill]] %s6773_s25 }
  0x1b   :  { %30 = vsyncpa [#allocation7], 0 }
  0x1c   :  { %31 = vsyncpa [#allocation10], 0 }
  0x1d   :  { %32 = vsyncpa [#allocation8], 0  ;;  %s5800_s29 = smov 0   ;;  %s5802_s2 = smov 0  }
  0x1e   :  { %s5804_s6 = smov 0   ;;  %s5806_s30 = smov 0  }
  0x1f   :  { %s5808_s7 = smov 0   ;;  %s5810_s3 = smov 0  }
  0x20 LB: > { %6841 = sst [smem:[#allocation24_spill]] %s5627_s2  ;;  %s5829_s26 = sadd.s32 4294967295, %s5643_s3   ;;  %s5643_s3 = sphi %s5810_s3, %s38_s3   ;;  %s5639_s7 = sphi %s5808_s7, %s6922_s7   ;;  %s5635_s30 = sphi %s5806_s30, %s6921_s30   ;;  %s5631_s6 = sphi %s5804_s6, %s6920_s6   ;;  %s5627_s2 = sphi %s5802_s2, %s6919_s2   ;;  %s5623_s29 = sphi %s5800_s29, %s6918_s29  }
  0x21   : > { %6842 = sst [smem:[#allocation25_spill]] %s5631_s6  ;;  %p194_p0 = scmp.ne.s32.totalorder %s5631_s6, %s5627_s2 }
  0x22   : > { %6843 = sst [smem:[#allocation26_spill]] %s5635_s30  ;;  %p195_p1 = scmp.eq.s32.totalorder %s5643_s3, 0 }
  0x23   : > { %6844 = sst [smem:[#allocation27_spill]] %s5639_s7  ;;  %p200_p2 = scmp.ne.s32.totalorder %s5627_s2, %s5623_s29 }
  0x24   : > { %6845 = sst [smem:[#allocation28_spill]] %s5643_s3  ;;  %p6783_p3 = scmp.eq.s32.totalorder %s5829_s26, 0 }
  0x25   : > { %6846 = sst [smem:[#allocation29_spill]] %s5829_s26  ;;  %p196_p4 = por %p195_p1, %p194_p0 }
  0x26   : > { %p4431_p5 = scmp.ge.s32.totalorder %s5643_s3, 1  ;;  %p5840_p6 = por %p6783_p3, %p200_p2 }
  0x27   : > { %p731_p7 = scmp.lt.s32.totalorder %s5643_s3, 3  ;;  %s5645_s4 = smov [#allocation6]  }
  0x28   : > { %s6847_s8 = scalar_select %p5840_p6, 1, 0 }
  0x29   : > { %p5845_p8 = pnand %p4431_p5, %p731_p7  ;;  %s755_s28 = sshll.u32 %s5645_s4, 4  ;;  %s756_s28 = int_to_ptr.vmem [resolvable:$true] %s755_s28 }
  0x2a   : > { %6848 = sst [smem:[#allocation30_spill]] %s6847_s8  ;;  %p4925_p10 = scmp.lt.s32.totalorder %s5643_s3, 2 }
  0x2b   : > { %s6849_s27 = scalar_select %p5845_p8, 1, 0 }
  0x2c   : > { %p4891_p9 = pneg %p5845_p8  ;;  %p5858_p12 = pnand %p4925_p10, %p196_p4 }
  0x2d   : > { %s47_s0 = sadd.s32 1, %s5639_s7  ;;  %s6852_s25 = sld [smem:[#allocation34_spill]] }
  0x2e   : > { %p5854_p11 = pnand %p4891_p9, %p6783_p3 }
  0x2f   : > { %s6851_s5 = scalar_select %p5858_p12, 1, 0 }
  0x30   : > { %s6850_s9 = scalar_select %p5854_p11, 1, 0 }
  0x31   : > { %p6792_p0 = pneg %p5854_p11 }
  0x33   : > { %s5259_s4 = scalar_lea.hbm %s6852_s25, 256 }
  0x34   : > { %p5260_p13 = scmp.ne.s32.totalorder %s6852_s25, %s5259_s4  ;;  %p5266_p4 = scmp.lt.u32.totalorder %s5259_s4, %s6852_s25 }
  0x36   : > { %p5262_p1 = pnand %p6792_p0, %p5260_p13 }
  0x38   : > { %p5263_p2 = pneg %p5262_p1 }
  0x3a   : > { %p5268_p5 = pnand %p5266_p4, %p5263_p2 }
  0x3c   : > { %5271 = shalt.err (!%p5268_p5)
}
  0x3d   : > { %s5272_s18 = scalar_lea.vmem %s756_s28, 256  ;;  %p5280_p3 = scmp.lt.s32.totalorder %s756_s28, %s756_s28 }
  0x3e   : > { %p5273_p7 = scmp.ne.s32.totalorder %s756_s28, %s5272_s18  ;;  %p5281_p6 = scmp.lt.s32.totalorder %s5272_s18, %s5272_s18 }
  0x40   : > { %p5275_p9 = pnand %p5273_p7, %p6792_p0  ;;  %p5282_p8 = por %p5281_p6, %p5280_p3 }
  0x42   : > { %p5276_p10 = pneg %p5275_p9 }
  0x44   : > { %p5283_p12 = pnand %p5282_p8, %p5276_p10 }
  0x46   : > { %5286 = shalt.err (!%p5283_p12)
}
  0x47   : > { %s6787_s23 = smov 64   ;;  %s6789_s20 = smov 4  }
  0x48   : > { %4894 = dma.hbm_to_vmem [thread:$0]  (!%p5854_p11), %s6852_s25, 256, %s756_s28, [#allocation7], %s6787_s23, %s6787_s23, %s6789_s20  }
  0x49   : > { %p48_p3 = scmp.ge.s32.totalorder %s47_s0, 2  ;;  %s802_s18 = sand.u32 1, %s5643_s3  }
  0x4a   : > { %s5890_s1 = sand.u32 1, %s5631_s6   ;;  %s4860_s17 = smul.u32 6144, %s5639_s7 }
  0x4b   : > { %s6924_s0 = smov (%p48_p3, %s47_s0), 0  ;;  %s4859_s29 = smul.u32 384, %s5890_s1 }
  0x4c   : > { %6853 = sst [smem:[#allocation31_spill]] %s6924_s0  ;;  %s184_s4 = ssub.s32 %s5639_s7, %s6924_s0 }
  0x4d   : > { %p185_p6 = scmp.eq.s32.totalorder %s184_s4, 0  ;;  %s6854_s12 = sld [smem:[#allocation38_spill]] }
  0x4e   : > { %s806_s28 = scalar_lea.vmem [#allocation11], %s4859_s29  ;;  %s6855_s24 = sadd.s32 1, %s5631_s6 }
  0x4f   : > { %s813_s22 = sshll.u32 %s806_s28, 4  ;;  %s5911_s20 = sshll.u32 %s5890_s1, 7  ;;  %s5908_s22 = int_to_ptr.vmem [resolvable:$true] %s813_s22 }
  0x50   : > { %s5906_s23 = scalar_select %p185_p6, %s5631_s6, %s6855_s24  }
  0x51   : > { %s5913_s25 = scalar_lea.sflag [#allocation7], %s802_s18  ;;  %p6857_p12 = scmp.ne.s32.totalorder %s6851_s5, 0 }
  0x52   : > { %6856 = sst [smem:[#allocation32_spill]] %s5906_s23 }
  0x53   : > { %s5901_s10 = scalar_lea.hbm %s6854_s12, %s4860_s17  ;;  %p5919_p13 = pneg %p6857_p12 }
  0x54   : > { %s5287_s4 = scalar_lea.hbm %s5901_s10, 6144  ;;  %s5292_s29 = scalar_lea.hbm %s6854_s12, 12288 }
  0x55   : > { %p5288_p8 = scmp.ne.s32.totalorder %s5901_s10, %s5287_s4  ;;  %p5293_p4 = scmp.lt.u32.totalorder %s5901_s10, %s6854_s12 }
  0x56   : > { %s6858_s14 = scalar_select %p5919_p13, 1, 0 }
  0x57   : > { %p5290_p1 = pnand %p5919_p13, %p5288_p8  ;;  %p5294_p5 = scmp.lt.u32.totalorder %s5292_s29, %s5287_s4 }
  0x58   : > { %p5296_p9 = scmp.lt.u32.totalorder %s5287_s4, %s5901_s10 }
  0x59   : > { %p5291_p2 = pneg %p5290_p1  ;;  %p5295_p7 = por %p5294_p5, %p5293_p4 }
  0x5b   : > { %p5297_p10 = por %p5296_p9, %p5295_p7 }
  0x5d   : > { %p5298_p3 = pnand %p5297_p10, %p5291_p2 }
  0x5f   : > { %5301 = shalt.err (!%p5298_p3)
}
  0x60   : > { %s5302_s18 = scalar_lea.vmem %s5908_s22, 6144  ;;  %s5648_s16 = smov [#allocation11]  }
  0x61   : > { %p5303_p6 = scmp.ne.s32.totalorder %s5908_s22, %s5302_s18  ;;  %s5307_s17 = sshll.u32 %s5648_s16, 4  ;;  %s5308_s17 = int_to_ptr.vmem [resolvable:$false] %s5307_s17 }
  0x62   : > { %s5309_s28 = scalar_lea.vmem %s5308_s17, 12288  ;;  %p5310_p0 = scmp.lt.s32.totalorder %s5908_s22, %s5308_s17 }
  0x63   : > { %p5305_p8 = pnand %p5303_p6, %p5919_p13  ;;  %p5311_p11 = scmp.lt.s32.totalorder %s5309_s28, %s5302_s18 }
  0x65   : > { %p5306_p1 = pneg %p5305_p8  ;;  %p5312_p4 = por %p5311_p11, %p5310_p0 }
  0x67   : > { %p5313_p5 = pnand %p5312_p4, %p5306_p1 }
  0x69   : > { %5316 = shalt.err (!%p5313_p5)
}
  0x6a   : > { %s5649_s4 = smov 384   ;;  %s5650_s29 = smov 24  }
  0x6b   : > { %4901 = dma.hbm_to_vmem [thread:$0]  (!%p6857_p12), %s5901_s10, 6144, %s5908_s22, %s5913_s25, %s5649_s4, %s5649_s4, %s5650_s29  }
  0x6c   : > { %s5944_s24 = sshll.u32 %s5639_s7, 11  ;;  %s6859_s18 = sld [smem:[#allocation40_spill]] }
  0x6d   : > { %s834_s12 = scalar_lea.vmem [#allocation12], %s5911_s20 }
  0x6e   : > { %s841_s0 = sshll.u32 %s834_s12, 4  ;;  %s5953_s0 = int_to_ptr.vmem [resolvable:$true] %s841_s0 }
  0x72   : > { %s5950_s28 = scalar_lea.hbm %s6859_s18, %s5944_s24  ;;  %s5322_s4 = scalar_lea.hbm %s6859_s18, 4096 }
  0x73   : > { %s5317_s23 = scalar_lea.hbm %s5950_s28, 2048  ;;  %p5323_p7 = scmp.lt.u32.totalorder %s5950_s28, %s6859_s18 }
  0x74   : > { %p5318_p11 = scmp.ne.s32.totalorder %s5950_s28, %s5317_s23  ;;  %p5324_p9 = scmp.lt.u32.totalorder %s5322_s4, %s5317_s23 }
  0x75   : > { %p5326_p3 = scmp.lt.u32.totalorder %s5317_s23, %s5950_s28 }
  0x76   : > { %p5320_p0 = pnand %p5318_p11, %p5919_p13  ;;  %p5325_p10 = por %p5324_p9, %p5323_p7 }
  0x78   : > { %p5321_p2 = pneg %p5320_p0  ;;  %p5327_p6 = por %p5326_p3, %p5325_p10 }
  0x7a   : > { %p5328_p8 = pnand %p5327_p6, %p5321_p2 }
  0x7c   : > { %5331 = shalt.err (!%p5328_p8)
}
  0x7d   : > { %s5332_s12 = scalar_lea.vmem %s5953_s0, 2048  ;;  %s5651_s17 = smov [#allocation12]  }
  0x7e   : > { %p5333_p1 = scmp.ne.s32.totalorder %s5953_s0, %s5332_s12  ;;  %s5337_s10 = sshll.u32 %s5651_s17, 4  ;;  %s5338_s10 = int_to_ptr.vmem [resolvable:$false] %s5337_s10 }
  0x7f   : > { %s5339_s22 = scalar_lea.vmem %s5338_s10, 4096  ;;  %p5340_p11 = scmp.lt.s32.totalorder %s5953_s0, %s5338_s10 }
  0x80   : > { %p5335_p4 = pnand %p5333_p1, %p5919_p13  ;;  %p5341_p0 = scmp.lt.s32.totalorder %s5339_s22, %s5332_s12 }
  0x82   : > { %p5336_p5 = pneg %p5335_p4  ;;  %p5342_p7 = por %p5341_p0, %p5340_p11 }
  0x84   : > { %p5343_p9 = pnand %p5342_p7, %p5336_p5 }
  0x86   : > { %5346 = shalt.err (!%p5343_p9)
}
  0x87   : > { %s6860_s23 = smov 4   ;;  %s6861_s4 = smov 64  }
  0x88   : > { %4904 = dma.hbm_to_vmem [thread:$0]  (!%p6857_p12), %s5950_s28, 2048, %s5953_s0, %s5913_s25, %s6861_s4, %s6861_s4, %s6860_s23  }
  0x89   : > { %s4442_s29 = sshll.u32 %s5639_s7, 4  ;;  %s854_s16 = scalar_lea.vmem [#allocation13], %s5890_s1 }
  0x8a   : > { %s861_s17 = sshll.u32 %s854_s16, 4  ;;  %s6862_s22 = sld [smem:[#allocation41_spill]]  ;;  %s862_s17 = int_to_ptr.vmem [resolvable:$true] %s861_s17 }
  0x90   : > { %s859_s18 = scalar_lea.hbm %s6862_s22, %s4442_s29  ;;  %s5352_s8 = scalar_lea.hbm %s6862_s22, 32 }
  0x91   : > { %s5347_s6 = scalar_lea.hbm %s859_s18, 16  ;;  %p5353_p6 = scmp.lt.u32.totalorder %s859_s18, %s6862_s22 }
  0x92   : > { %p5348_p2 = scmp.ne.s32.totalorder %s859_s18, %s5347_s6  ;;  %p5354_p8 = scmp.lt.u32.totalorder %s5352_s8, %s5347_s6 }
  0x93   : > { %p5356_p4 = scmp.lt.u32.totalorder %s5347_s6, %s859_s18 }
  0x94   : > { %p5350_p10 = pnand %p5348_p2, %p5919_p13  ;;  %p5355_p1 = por %p5354_p8, %p5353_p6 }
  0x96   : > { %p5351_p3 = pneg %p5350_p10  ;;  %p5357_p5 = por %p5356_p4, %p5355_p1 }
  0x98   : > { %p5358_p11 = pnand %p5357_p5, %p5351_p3 }
  0x9a   : > { %5361 = shalt.err (!%p5358_p11)
}
  0x9b   : > { %s5362_s0 = scalar_lea.vmem %s862_s17, 16  ;;  %s5652_s28 = smov [#allocation13]  }
  0x9c   : > { %p5363_p0 = scmp.ne.s32.totalorder %s862_s17, %s5362_s0  ;;  %s5367_s29 = sshll.u32 %s5652_s28, 4  ;;  %s5368_s29 = int_to_ptr.vmem [resolvable:$false] %s5367_s29 }
  0x9d   : > { %s5369_s30 = scalar_lea.vmem %s5368_s29, 32  ;;  %p5370_p2 = scmp.lt.s32.totalorder %s862_s17, %s5368_s29 }
  0x9e   : > { %p5365_p7 = pnand %p5363_p0, %p5919_p13  ;;  %p5371_p10 = scmp.lt.s32.totalorder %s5369_s30, %s5362_s0 }
  0xa0   : > { %p5366_p9 = pneg %p5365_p7  ;;  %p5372_p12 = por %p5371_p10, %p5370_p2 }
  0xa2   : > { %p5373_p6 = pnand %p5372_p12, %p5366_p9 }
  0xa4   : > { %5376 = shalt.err (!%p5373_p6)
}
  0xa5   : > { %p6863_p8 = scmp.ne.s32.totalorder %s6851_s5, 0  ;;  %s6864_s11 = sld [smem:[#allocation44_spill]] }
  0xa6   : > { %s884_s26 = scalar_lea.vmem [#allocation14], %s5911_s20 }
  0xa7   : > { %4907 = dma.hbm_to_vmem [thread:$0]  (!%p6863_p8), %s859_s18, 16, %s862_s17, %s5913_s25  }
  0xa8   : > { %s891_s8 = sshll.u32 %s884_s26, 4  ;;  %s6005_s8 = int_to_ptr.vmem [resolvable:$true] %s891_s8 }
  0xab   : > { %s6002_s3 = scalar_lea.hbm %s6864_s11, %s5944_s24  ;;  %s5382_s17 = scalar_lea.hbm %s6864_s11, 4096 }
  0xac   : > { %s5377_s16 = scalar_lea.hbm %s6002_s3, 2048  ;;  %p5383_p4 = scmp.lt.u32.totalorder %s6002_s3, %s6864_s11 }
  0xad   : > { %p5378_p12 = scmp.ne.s32.totalorder %s6002_s3, %s5377_s16  ;;  %p5384_p5 = scmp.lt.u32.totalorder %s5382_s17, %s5377_s16 }
  0xae   : > { %p5386_p0 = scmp.lt.u32.totalorder %s5377_s16, %s6002_s3 }
  0xaf   : > { %p5380_p3 = pnand %p5378_p12, %p5919_p13  ;;  %p5385_p11 = por %p5384_p5, %p5383_p4 }
  0xb1   : > { %p5381_p1 = pneg %p5380_p3  ;;  %p5387_p7 = por %p5386_p0, %p5385_p11 }
  0xb3   : > { %p5388_p9 = pnand %p5387_p7, %p5381_p1 }
  0xb5   : > { %5391 = shalt.err (!%p5388_p9)
}
  0xb6   : > { %s5392_s28 = scalar_lea.vmem %s6005_s8, 2048  ;;  %s5653_s29 = smov [#allocation14]  }
  0xb7   : > { %p5393_p2 = scmp.ne.s32.totalorder %s6005_s8, %s5392_s28  ;;  %s5397_s30 = sshll.u32 %s5653_s29, 4  ;;  %s5398_s30 = int_to_ptr.vmem [resolvable:$false] %s5397_s30 }
  0xb8   : > { %s5399_s2 = scalar_lea.vmem %s5398_s30, 4096  ;;  %p5400_p12 = scmp.lt.s32.totalorder %s6005_s8, %s5398_s30 }
  0xb9   : > { %p5395_p10 = pnand %p5393_p2, %p5919_p13  ;;  %p5401_p3 = scmp.lt.s32.totalorder %s5399_s2, %s5392_s28 }
  0xbb   : > { %p5396_p6 = pneg %p5395_p10  ;;  %p5402_p4 = por %p5401_p3, %p5400_p12 }
  0xbd   : > { %p5403_p5 = pnand %p5402_p4, %p5396_p6 }
  0xbf   : > { %5406 = shalt.err (!%p5403_p5)
}
  0xc0   : > { %s5654_s6 = smov 128   ;;  %s5655_s26 = smov 8  }
  0xc1   : > { %4910 = dma.hbm_to_vmem [thread:$0]  (!%p6863_p8), %s6002_s3, 2048, %s6005_s8, %s5913_s25, %s5654_s6, %s5654_s6, %s5655_s26  }
  0xc2   : > { %s4446_s16 = sshll.u32 %s5890_s1, 8  ;;  %s4661_s10 = sshll.u32 %s5639_s7, 12 }
  0xc3   : > { %s6865_s13 = sld [smem:[#allocation46_spill]]  ;;  %s912_s0 = scalar_lea.vmem [#allocation15], %s4446_s16 }
  0xc4   : > { %s919_s28 = sshll.u32 %s912_s0, 4  ;;  %s6039_s28 = int_to_ptr.vmem [resolvable:$true] %s919_s28 }
  0xc9   : > { %s6037_s12 = scalar_lea.hbm %s6865_s13, %s4661_s10  ;;  %s5412_s8 = scalar_lea.hbm %s6865_s13, 8192 }
  0xca   : > { %s5407_s29 = scalar_lea.hbm %s6037_s12, 4096  ;;  %p5413_p7 = scmp.lt.u32.totalorder %s6037_s12, %s6865_s13 }
  0xcb   : > { %p5408_p1 = scmp.ne.s32.totalorder %s6037_s12, %s5407_s29  ;;  %p5414_p9 = scmp.lt.u32.totalorder %s5412_s8, %s5407_s29 }
  0xcc   : > { %p5416_p10 = scmp.lt.u32.totalorder %s5407_s29, %s6037_s12 }
  0xcd   : > { %p5410_p11 = pnand %p5408_p1, %p5919_p13  ;;  %p5415_p2 = por %p5414_p9, %p5413_p7 }
  0xcf   : > { %p5411_p0 = pneg %p5410_p11  ;;  %p5417_p6 = por %p5416_p10, %p5415_p2 }
  0xd1   : > { %p5418_p12 = pnand %p5417_p6, %p5411_p0 }
  0xd3   : > { %5421 = shalt.err (!%p5418_p12)
}
  0xd4   : > { %s5422_s16 = scalar_lea.vmem %s6039_s28, 4096  ;;  %s5656_s10 = smov [#allocation15]  }
  0xd5   : > { %p5423_p3 = scmp.ne.s32.totalorder %s6039_s28, %s5422_s16  ;;  %s5427_s18 = sshll.u32 %s5656_s10, 4  ;;  %s5428_s18 = int_to_ptr.vmem [resolvable:$false] %s5427_s18 }
  0xd6   : > { %s5429_s17 = scalar_lea.vmem %s5428_s18, 8192  ;;  %p5430_p1 = scmp.lt.s32.totalorder %s6039_s28, %s5428_s18 }
  0xd7   : > { %p5425_p4 = pnand %p5423_p3, %p5919_p13  ;;  %p5431_p11 = scmp.lt.s32.totalorder %s5429_s17, %s5422_s16 }
  0xd9   : > { %p5426_p5 = pneg %p5425_p4  ;;  %p5432_p7 = por %p5431_p11, %p5430_p1 }
  0xdb   : > { %p5433_p9 = pnand %p5432_p7, %p5426_p5 }
  0xdd   : > { %5436 = shalt.err (!%p5433_p9)
}
  0xde   : > { %s5657_s0 = smov 256   ;;  %s6808_s29 = smov 16  }
  0xdf   : > { %4913 = dma.hbm_to_vmem [thread:$0]  (!%p6863_p8), %s6037_s12, 4096, %s6039_s28, %s5913_s25, %s5657_s0, %s5657_s0, %s6808_s29  }
  0xe0   : > { %s6866_s15 = sld [smem:[#allocation48_spill]]  ;;  %s940_s30 = scalar_lea.vmem [#allocation16], %s5911_s20 }
  0xe1   : > { %s947_s2 = sshll.u32 %s940_s30, 4  ;;  %s6867_s19 = sld [smem:[#allocation52_spill]]  ;;  %s6071_s2 = int_to_ptr.vmem [resolvable:$true] %s947_s2 }
  0xe6   : > { %s6068_s8 = scalar_lea.hbm %s6866_s15, %s5944_s24  ;;  %s5442_s0 = scalar_lea.hbm %s6866_s15, 4096 }
  0xe7   : > { %s6077_s18 = scalar_lea.hbm %s6867_s19, %s5944_s24  ;;  %s5437_s17 = scalar_lea.hbm %s6068_s8, 2048 }
  0xe8   : > { %p5438_p0 = scmp.ne.s32.totalorder %s6068_s8, %s5437_s17  ;;  %p5443_p6 = scmp.lt.u32.totalorder %s6068_s8, %s6866_s15 }
  0xe9   : > { %p5444_p12 = scmp.lt.u32.totalorder %s5442_s0, %s5437_s17  ;;  %p5446_p4 = scmp.lt.u32.totalorder %s5437_s17, %s6068_s8 }
  0xea   : > { %p5440_p2 = pnand %p5438_p0, %p5919_p13 }
  0xeb   : > { %p5445_p3 = por %p5444_p12, %p5443_p6 }
  0xec   : > { %p5441_p10 = pneg %p5440_p2 }
  0xed   : > { %p5447_p5 = por %p5446_p4, %p5445_p3 }
  0xef   : > { %p5448_p1 = pnand %p5447_p5, %p5441_p10 }
  0xf1   : > { %5451 = shalt.err (!%p5448_p1)
}
  0xf2   : > { %s5452_s30 = scalar_lea.vmem %s6071_s2, 2048  ;;  %s5659_s16 = smov [#allocation16]  }
  0xf3   : > { %p5453_p11 = scmp.ne.s32.totalorder %s6071_s2, %s5452_s30  ;;  %s5457_s10 = sshll.u32 %s5659_s16, 4  ;;  %s5458_s10 = int_to_ptr.vmem [resolvable:$false] %s5457_s10 }
  0xf4   : > { %s5459_s12 = scalar_lea.vmem %s5458_s10, 4096  ;;  %p5460_p0 = scmp.lt.s32.totalorder %s6071_s2, %s5458_s10 }
  0xf5   : > { %p5455_p7 = pnand %p5453_p11, %p5919_p13  ;;  %p5461_p2 = scmp.lt.s32.totalorder %s5459_s12, %s5452_s30 }
  0xf7   : > { %p5456_p9 = pneg %p5455_p7  ;;  %p5462_p6 = por %p5461_p2, %p5460_p0 }
  0xf9   : > { %p5463_p12 = pnand %p5462_p6, %p5456_p9 }
  0xfb   : > { %5466 = shalt.err (!%p5463_p12)
}
  0xfc   : > { %4916 = dma.hbm_to_vmem [thread:$0]  (!%p6863_p8), %s6068_s8, 2048, %s6071_s2, %s5913_s25, %s6861_s4, %s6861_s4, %s6860_s23  }
  0xfd   : > { %s979_s17 = scalar_lea.vmem [#allocation17], %s5911_s20  ;;  %s5660_s0 = smov [#allocation9]  }
  0xfe   : > { %s986_s28 = sshll.u32 %s979_s17, 4  ;;  %s6107_s1 = sshll.u32 %s5660_s0, 4  ;;  %s6105_s28 = int_to_ptr.vmem [resolvable:$true] %s986_s28  ;;  %s781_s1 = int_to_ptr.vmem [resolvable:$true] %s6107_s1 }
  0xff   : > { %s5467_s3 = scalar_lea.hbm %s6077_s18, 2048  ;;  %s5472_s10 = scalar_lea.hbm %s6867_s19, 4096 }
 0x100   : > { %p5468_p10 = scmp.ne.s32.totalorder %s6077_s18, %s5467_s3  ;;  %p5473_p5 = scmp.lt.u32.totalorder %s6077_s18, %s6867_s19 }
 0x101   : > { %p5474_p1 = scmp.lt.u32.totalorder %s5472_s10, %s5467_s3  ;;  %p5476_p7 = scmp.lt.u32.totalorder %s5467_s3, %s6077_s18 }
 0x102   : > { %p5470_p3 = pnand %p5468_p10, %p5919_p13 }
 0x103   : > { %p5475_p11 = por %p5474_p1, %p5473_p5 }
 0x104   : > { %p5471_p4 = pneg %p5470_p3 }
 0x105   : > { %p5477_p9 = por %p5476_p7, %p5475_p11 }
 0x107   : > { %p5478_p0 = pnand %p5477_p9, %p5471_p4 }
 0x109   : > { %5481 = shalt.err (!%p5478_p0)
}
 0x10a   : > { %s5482_s8 = scalar_lea.vmem %s6105_s28, 2048  ;;  %s5661_s2 = smov [#allocation17]  }
 0x10b   : > { %p5483_p2 = scmp.ne.s32.totalorder %s6105_s28, %s5482_s8  ;;  %s5487_s17 = sshll.u32 %s5661_s2, 4  ;;  %s5488_s17 = int_to_ptr.vmem [resolvable:$false] %s5487_s17 }
 0x10c   : > { %s5489_s29 = scalar_lea.vmem %s5488_s17, 4096  ;;  %p5490_p10 = scmp.lt.s32.totalorder %s6105_s28, %s5488_s17 }
 0x10d   : > { %p5485_p6 = pnand %p5483_p2, %p5919_p13  ;;  %p5491_p3 = scmp.lt.s32.totalorder %s5489_s29, %s5482_s8 }
 0x10f   : > { %p5486_p12 = pneg %p5485_p6  ;;  %p5492_p5 = por %p5491_p3, %p5490_p10 }
 0x111   : > { %p5493_p1 = pnand %p5492_p5, %p5486_p12 }
 0x113   : > { %5496 = shalt.err (!%p5493_p1)
}
 0x114   : > { %4919 = dma.hbm_to_vmem [thread:$0]  (!%p6863_p8), %s6077_s18, 2048, %s6105_s28, %s5913_s25, %s5654_s6, %s5654_s6, %s5655_s26  }
 0x115   : > { %s6868_s30 = sld [smem:[#allocation36_spill]]  ;;  %p6870_p11 = scmp.ne.s32.totalorder %s6850_s9, 0 }
 0x117   : > { %p6871_p7 = pneg %p6870_p11 }
 0x11b   : > { %s6869_s16 = smov %s6868_s30  ;;  %s5497_s10 = scalar_lea.hbm %s6868_s30, 32 }
 0x11c   : > { %p5498_p4 = scmp.ne.s32.totalorder %s6869_s16, %s5497_s10  ;;  %p5504_p2 = scmp.lt.u32.totalorder %s5497_s10, %s6869_s16 }
 0x11e   : > { %p5500_p9 = pnand %p5498_p4, %p6871_p7 }
 0x120   : > { %p5501_p0 = pneg %p5500_p9 }
 0x122   : > { %p5506_p6 = pnand %p5504_p2, %p5501_p0 }
 0x124   : > { %5509 = shalt.err (!%p5506_p6)
}
 0x125   : > { %s5510_s6 = scalar_lea.vmem %s781_s1, 32  ;;  %p6872_p10 = pmov %p6871_p7 }
 0x126   : > { %p5511_p12 = scmp.ne.s32.totalorder %s781_s1, %s5510_s6  ;;  %p5518_p1 = scmp.lt.s32.totalorder %s781_s1, %s781_s1 }
 0x127   : > { %p5519_p8 = scmp.lt.s32.totalorder %s5510_s6, %s5510_s6 }
 0x128   : > { %p5513_p3 = pnand %p5511_p12, %p6872_p10 }
 0x129   : > { %p5520_p13 = por %p5519_p8, %p5518_p1 }
 0x12a   : > { %p5514_p5 = pneg %p5513_p3 }
 0x12c   : > { %p5521_p4 = pnand %p5520_p13, %p5514_p5 }
 0x12e   : > { %5524 = shalt.err (!%p5521_p4)
}
 0x12f   : > { %s5662_s26 = smov 1   ;;  %s6873_s18 = smov 16  }
 0x130   : > { %4897 = dma.hbm_to_vmem [thread:$0]  (!%p6870_p11), %s6869_s16, 32, %s781_s1, [#allocation10], %s6873_s18, %s6873_s18, %s5662_s26  }
 0x131   : > { %s6874_s21 = sld [smem:[#allocation54_spill]]  ;;  %s1007_s10 = scalar_lea.vmem [#allocation18], %s5911_s20 }
 0x132   : > { %s1014_s9 = sshll.u32 %s1007_s10, 4  ;;  %p6875_p8 = scmp.ne.s32.totalorder %s6858_s14, 0  ;;  %s6164_s9 = int_to_ptr.vmem [resolvable:$true] %s1014_s9 }
 0x137   : > { %s6161_s30 = scalar_lea.hbm %s6874_s21, %s5944_s24  ;;  %s5530_s2 = scalar_lea.hbm %s6874_s21, 4096 }
 0x138   : > { %s5525_s12 = scalar_lea.hbm %s6161_s30, 2048  ;;  %p5531_p11 = scmp.lt.u32.totalorder %s6161_s30, %s6874_s21 }
 0x139   : > { %p5526_p13 = scmp.ne.s32.totalorder %s6161_s30, %s5525_s12  ;;  %p5532_p0 = scmp.lt.u32.totalorder %s5530_s2, %s5525_s12 }
 0x13a   : > { %p5534_p6 = scmp.lt.u32.totalorder %s5525_s12, %s6161_s30 }
 0x13b   : > { %p5528_p7 = pnand %p5526_p13, %p6875_p8  ;;  %p5533_p2 = por %p5532_p0, %p5531_p11 }
 0x13d   : > { %p5529_p9 = pneg %p5528_p7  ;;  %p5535_p12 = por %p5534_p6, %p5533_p2 }
 0x13f   : > { %p5536_p10 = pnand %p5535_p12, %p5529_p9 }
 0x141   : > { %5539 = shalt.err (!%p5536_p10)
}
 0x142   : > { %s5540_s20 = scalar_lea.vmem %s6164_s9, 2048  ;;  %s5663_s6 = smov [#allocation18]  }
 0x143   : > { %p5541_p3 = scmp.ne.s32.totalorder %s6164_s9, %s5540_s20  ;;  %s5545_s26 = sshll.u32 %s5663_s6, 4  ;;  %s5546_s26 = int_to_ptr.vmem [resolvable:$false] %s5545_s26 }
 0x144   : > { %s5547_s18 = scalar_lea.vmem %s5546_s26, 4096  ;;  %p5548_p4 = scmp.lt.s32.totalorder %s6164_s9, %s5546_s26 }
 0x145   : > { %p5543_p5 = pnand %p5541_p3, %p6875_p8  ;;  %p5549_p13 = scmp.lt.s32.totalorder %s5547_s18, %s5540_s20 }
 0x147   : > { %p5544_p1 = pneg %p5543_p5  ;;  %p5550_p7 = por %p5549_p13, %p5548_p4 }
 0x149   : > { %p5551_p11 = pnand %p5550_p7, %p5544_p1 }
 0x14b   : > { %5554 = shalt.err (!%p5551_p11)
}
 0x14c   : > { %p6876_p9 = scmp.ne.s32.totalorder %s6851_s5, 0  ;;  %p6877_p8 = scmp.ne.s32.totalorder %s6849_s27, 0 }
 0x14d   : > { %s6878_s14 = sld [smem:[#allocation29_spill]] (!%p6877_p8) }
 0x14e   : > { %4922 = dma.hbm_to_vmem [thread:$0]  (!%p6876_p9), %s6161_s30, 2048, %s6164_s9, %s5913_s25, %s6861_s4, %s6861_s4, %s6860_s23  }
 0x14f   : > { %1044 = sbr.rel (%p6877_p8) target bundleno = 5873 (0x16f1), region = 120 }
 0x153   : > { %p6879_p0 = scmp.eq.s32.totalorder (!%p6877_p8), %s6878_s14, 0 }
 0x156   : > { %5606 = dma.done.wait (%p6879_p0), [#allocation7], 256   ;;  %p6880_p2 = pmov %p6879_p0 }
 0x157   : > { %p6881_p6 = pmov %p6879_p0 }
 0x158   : > { %5608 = vsyncadd (%p6880_p2), [#allocation7], 4294967040 }
 0x159   : > { %5610 = dma.done.wait (%p6881_p6), [#allocation10], 32   ;;  %p6882_p12 = pmov %p6879_p0 }
 0x15a   : > { %s6883_s5 = sld [smem:[#allocation24_spill]]  ;;  %s1054_s29 = sand.u32 1, %s6878_s14  }
 0x15b   : > { %5612 = vsyncadd (%p6882_p12), [#allocation10], 4294967264  ;;  %s6884_s28 = sld [smem:[#allocation30_spill]]  ;;  %s1055_s23 = scalar_lea.sflag [#allocation7], %s1054_s29 }
 0x160   : > { %s6203_s25 = sand.u32 1, %s6883_s5  }
 0x161   : > { %s4861_s27 = smul.u32 384, %s6203_s25  ;;  %p6885_p10 = scmp.ne.s32.totalorder %s6884_s28, 0 }
 0x163   : > { %s6206_s4 = scalar_lea.vmem [#allocation11], %s4861_s27 }
 0x164   : > { %5614 = dma.done.wait (%p6885_p10), %s1055_s23, 20496  }
 0x165   : > { %5616 = vsyncadd (%p6885_p10), %s1055_s23, 4294946800  ;;  %s6886_s0 = sld [smem:[#allocation26_spill]]  ;;  %s4461_s3 = sshll.u32 %s6203_s25, 7 }
 0x166   : > { %s4463_s30 = sshll.u32 %s6203_s25, 8  ;;  %s6889_s5 = sld [smem:[#allocation39_spill]] }
 0x167   : > { %s6890_s23 = sld [smem:[#allocation45_spill]]  ;;  %s6892_s17 = sld [smem:[#allocation47_spill]] }
 0x168   : > { %s6894_s19 = sld [smem:[#allocation51_spill]]  ;;  %s6895_s21 = sld [smem:[#allocation53_spill]] }
 0x169   : > { %s6896_s8 = sld [smem:[#allocation55_spill]]  ;;  %s6897_s2 = sld [smem:[#allocation56_spill]] }
 0x16a   : > { %s6898_s20 = sld [smem:[#allocation57_spill]]  ;;  %s6276_s14 = scalar_lea.vmem [#allocation14], %s4461_s3 }
 0x16b   : > { %p1289_p3 = scmp.lt.s32.totalorder %s6886_s0, 1  ;;  %s6284_s27 = scalar_lea.vmem [#allocation18], %s4461_s3 }
 0x16c   : > { %p4470_p5 = scmp.ne.s32.totalorder %s6886_s0, 0 }
 0x16d   : > { %s6216_s10 = scalar_select %p1289_p3, %s6886_s0, 1 }
 0x16e   : > { %s6899_s7 = sld [smem:[#allocation33_spill]] (!%p4470_p5) }
 0x16f   : > { %s4862_s9 = smul.u32 6, %s6216_s10  ;;  %s4467_s26 = sshll.u32 %s6216_s10, 1 }
 0x170   : > { %s6236_s11 = scalar_lea.vmem %s6890_s23, %s4467_s26  ;;  %s4468_s13 = sshll.u32 %s6216_s10, 2 }
 0x171   : > { %s6231_s28 = scalar_lea.vmem %s6889_s5, %s4862_s9  ;;  %s6246_s24 = scalar_lea.vmem %s6892_s17, %s4468_s13 }
 0x172   : > { %s1315_s29 = scalar_lea.vmem %s6894_s19, %s6216_s10  ;;  %s6259_s22 = scalar_lea.vmem %s6895_s21, %s4467_s26 }
 0x173   : > { %s1322_s1 = scalar_lea.vmem %s6896_s8, %s6216_s10  ;;  %s1325_s17 = scalar_lea.vmem %s6897_s2, %s6216_s10 }
 0x174   : > { %s1328_s18 = scalar_lea.vmem %s6898_s20, %s6216_s10  ;;  %s6273_s9 = scalar_lea.vmem [#allocation12], %s4461_s3  ;;  %v1335_v0 = vld [vmem:[%s6899_s7] sm:$0xff] (!%p4470_p5) }
 0x175   : > { %s1075_s19 = scalar_lea.vmem [#allocation13], %s6203_s25  ;;  %s6278_s5 = scalar_lea.vmem [#allocation15], %s4463_s30  ;;  %1337 = vst [vmem:[#allocation19] sm:$0xff] (!%p4470_p5), %v1335_v0 }
 0x176   : > { %s6280_s21 = scalar_lea.vmem [#allocation16], %s4461_s3  ;;  %s6282_s26 = scalar_lea.vmem [#allocation17], %s4461_s3 }
 0x177   : > { %1334 = sbr.rel (%p4470_p5) target bundleno = 382 (0x17e), region = 164  ;;  %s6900_s12 = smov (!%p4470_p5), %s6899_s7 }
 0x178   : > { %v1336_v1 = vld [vmem:[%s6900_s12 + $0x8] sm:$0xff] (!%p4470_p5) }
 0x179   : > { %1338 = vst [vmem:[#allocation19 + $0x8] sm:$0xff] (!%p4470_p5), %v1336_v1 }
 0x17e PF: > { %v4997_v2 = vld [vmem:[%s6206_s4 + $0xc] ss:$24 sps:$4 sm:$0xff]   ;;  %v4999_v3 = vld [vmem:[%s6206_s4 + $0x8] ss:$24 sps:$4 sm:$0xff]   ;;  %v5664_v4 = vmov 0   ;;  %v5665_v38 = vmov 0.0   ;;  %v1343_v39 = vlaneseq }
 0x17f   : > { %1745 = vmatprep.mubr.bf16.mxu1 %v5664_v4  ;;  %1702 = vmatprep.mubr.bf16.mxu0 %v5664_v4  ;;  %v5000_v5 = vld [vmem:[%s6206_s4 + $0x3c] ss:$24 sps:$4 sm:$0xff]   ;;  %v5004_v7 = vld [vmem:[%s6206_s4 + $0x38] ss:$24 sps:$4 sm:$0xff]   ;;  %v5006_v9 = vld [vmem:[%s6206_s4 + $0x6c] ss:$24 sps:$4 sm:$0xff]  }
 0x180   : > { %1713 = vmatprep.subr.bf16.mxu1 %v4997_v2  ;;  %4995 = vset.pattern.permute.xlu0 %v5664_v4  ;;  %v5002_v6 = vld [vmem:[%s6206_s4 + $0x4] ss:$24 sps:$4 sm:$0xff]   ;;  %v5005_v8 = vld [vmem:[%s6206_s4] ss:$24 sps:$4 sm:$0xff]   ;;  %v5008_v10 = vld [vmem:[%s6206_s4 + $0x34] ss:$24 sps:$4 sm:$0xff]  }
 0x181   : > { %1714 = vmatpush1.bf16.msra.mxu1 %v4999_v3  ;;  %4996 = vset.pattern.permute.xlu1 %v5664_v4  ;;  %v5011_v11 = vld [vmem:[%s6206_s4 + $0x30] ss:$24 sps:$4 sm:$0xff]   ;;  %v5012_v13 = vld [vmem:[%s6206_s4 + $0x9c] ss:$24 sps:$4 sm:$0xff]   ;;  %v5017_v15 = vld [vmem:[%s6206_s4 + $0x60] ss:$24 sps:$4 sm:$0xff]  }
 0x182   : > { %1715 = vmatprep.subr.bf16.mxu1 %v5000_v5  ;;  %1670 = vmatprep.subr.bf16.mxu0 %v5002_v6  ;;  %v5010_v12 = vld [vmem:[%s6206_s4 + $0x68] ss:$24 sps:$4 sm:$0xff]   ;;  %v5014_v14 = vld [vmem:[%s6206_s4 + $0x64] ss:$24 sps:$4 sm:$0xff]   ;;  %v5016_v16 = vld [vmem:[%s6206_s4 + $0x98] ss:$24 sps:$4 sm:$0xff]  }
 0x183   : > { %1671 = vmatpush1.bf16.msra.mxu0 %v5005_v8  ;;  %v5020_v17 = vld [vmem:[%s6206_s4 + $0x94] ss:$24 sps:$4 sm:$0xff]   ;;  %v5022_v19 = vld [vmem:[%s6206_s4 + $0xc8] ss:$24 sps:$4 sm:$0xff]   ;;  %v5026_v21 = vld [vmem:[%s6206_s4 + $0xc4] ss:$24 sps:$4 sm:$0xff]  }
 0x184   : > { %1672 = vmatprep.subr.bf16.mxu0 %v5008_v10  ;;  %v5018_v18 = vld [vmem:[%s6206_s4 + $0xcc] ss:$24 sps:$4 sm:$0xff]   ;;  %v5023_v20 = vld [vmem:[%s6206_s4 + $0x90] ss:$24 sps:$4 sm:$0xff]   ;;  %v5024_v22 = vld [vmem:[%s6206_s4 + $0xfc] ss:$24 sps:$4 sm:$0xff]  }
 0x185   : > { %1716 = vmatpush1.bf16.msra.mxu1 %v5004_v7  ;;  %v5029_v23 = vld [vmem:[%s6206_s4 + $0xc0] ss:$24 sps:$4 sm:$0xff]   ;;  %v5032_v25 = vld [vmem:[%s6206_s4 + $0xf4] ss:$24 sps:$4 sm:$0xff]   ;;  %v5035_v28 = vld [vmem:[%s6206_s4 + $0xf0] ss:$24 sps:$4 sm:$0xff]  }
 0x186   : > { %1717 = vmatprep.subr.bf16.mxu1 %v5006_v9  ;;  %v5028_v24 = vld [vmem:[%s6206_s4 + $0xf8] ss:$24 sps:$4 sm:$0xff]   ;;  %v5030_v26 = vld [vmem:[%s6206_s4 + $0x12c] ss:$24 sps:$4 sm:$0xff]   ;;  %v5034_v27 = vld [vmem:[%s6206_s4 + $0x128] ss:$24 sps:$4 sm:$0xff]  }
 0x187   : > { %1673 = vmatpush1.bf16.msra.mxu0 %v5011_v11  ;;  %v5036_v29 = vld [vmem:[%s6206_s4 + $0x15c] ss:$24 sps:$4 sm:$0xff]   ;;  %v5041_v31 = vld [vmem:[%s6206_s4 + $0x120] ss:$24 sps:$4 sm:$0xff]   ;;  %v6329_v34 = vld [vmem:[#allocation19 + $0x8] sm:$0xff]  ;;  %vm5666_vm0 = vmmov 0  }
 0x188   : > { %1674 = vmatprep.subr.bf16.mxu0 %v5014_v14  ;;  %v5038_v30 = vld [vmem:[%s6206_s4 + $0x124] ss:$24 sps:$4 sm:$0xff]   ;;  %v5040_v32 = vld [vmem:[%s6206_s4 + $0x158] ss:$24 sps:$4 sm:$0xff]   ;;  %v5042_v35 = vld [vmem:[%s6206_s4 + $0x154] ss:$24 sps:$4 sm:$0xff]  }
 0x189   : > { %1718 = vmatpush1.bf16.msra.mxu1 %v5010_v12  ;;  %v6327_v33 = vld [vmem:[#allocation19] sm:$0xff]  ;;  %v6344_v40 = vshrl.u32 %v1343_v39, 7  ;;  %v5047_v10 = vld [vmem:[%s6206_s4 + $0x14] ss:$24 sps:$4 sm:$0xff]   ;;  %vm1862_vm2 = vcmask 64512   ;;  %vm1878_vm3 = vcmask 1043456  }
 0x18a   : > { %1719 = vmatprep.subr.bf16.mxu1 %v5012_v13  ;;  %v5044_v36 = vld [vmem:[%s6206_s4 + $0x150] ss:$24 sps:$4 sm:$0xff]   ;;  %v6335_v37 = vpack.c.bf16 %v6329_v34, %v6327_v33  ;;  %v6348_v42 = vld [vmem:[%s6231_s28] sm:$0x3f]  ;;  %v5053_v13 = vld [vmem:[%s6206_s4 + $0x74] ss:$24 sps:$4 sm:$0xff]  }
 0x18b   : > { %1675 = vmatpush1.bf16.msra.mxu0 %v5017_v15  ;;  %v1410_v41 = vsub.s32 2, %v6344_v40  ;;  %v1414_v43 = vsub.s32 3, %v6344_v40  ;;  %v6352_v44 = vsub.s32 0, %v6344_v40  ;;  %v6355_v45 = vsub.s32 1, %v6344_v40  ;;  %v5045_v9 = vld [vmem:[%s6206_s4 + $0x10] ss:$24 sps:$4 sm:$0xff]  }
 0x18c   : > { %1676 = vmatprep.subr.bf16.mxu0 %v5020_v17  ;;  %v5050_v11 = vld [vmem:[%s6206_s4 + $0x44] ss:$24 sps:$4 sm:$0xff]   ;;  %v5048_v12 = vld [vmem:[%s6206_s4 + $0x40] ss:$24 sps:$4 sm:$0xff]   ;;  %v5051_v14 = vld [vmem:[%s6206_s4 + $0x70] ss:$24 sps:$4 sm:$0xff]  }
 0x18d   : > { %1720 = vmatpush1.bf16.msra.mxu1 %v5016_v16  ;;  %v1411_v46 = vrot.slane %v6348_v42, %v1410_v41  ;;  %v1415_v48 = vrot.slane %v6348_v42, %v1414_v43  ;;  %v1403_v49 = vrot.slane %v6348_v42, %v6352_v44  ;;  %v1407_v51 = vrot.slane %v6348_v42, %v6355_v45  ;;  %v5056_v15 = vld [vmem:[%s6206_s4 + $0xa4] ss:$24 sps:$4 sm:$0xff]   ;;  %v5054_v16 = vld [vmem:[%s6206_s4 + $0xa0] ss:$24 sps:$4 sm:$0xff]   ;;  %v5059_v17 = vld [vmem:[%s6206_s4 + $0xd4] ss:$24 sps:$4 sm:$0xff]  }
 0x18e   : > { %1721 = vmatprep.subr.bf16.mxu1 %v5018_v18  ;;  %v5057_v18 = vld [vmem:[%s6206_s4 + $0xd0] ss:$24 sps:$4 sm:$0xff]   ;;  %s6901_s0 = sld [smem:[#allocation35_spill]]  ;;  %s6902_s13 = sld [smem:[#allocation42_spill]]  ;;  %vm3055_vm4 = vcmask 130048  }
 0x18f   : > { %1677 = vmatpush1.bf16.msra.mxu0 %v5023_v20  ;;  %v5060_v20 = vld [vmem:[%s6206_s4 + $0x100] ss:$24 sps:$4 sm:$0xff]   ;;  %s6906_s23 = sld [smem:[#allocation37_spill]]  ;;  %s6907_s8 = sld [smem:[#allocation49_spill]] }
 0x190   : > { %1678 = vmatprep.subr.bf16.mxu0 %v5026_v21  ;;  %v5065_v21 = vld [vmem:[%s6206_s4 + $0x134] ss:$24 sps:$4 sm:$0xff]  }
 0x191   : > { %1722 = vmatpush1.bf16.msra.mxu1 %v5022_v19  ;;  %v5062_v19 = vld [vmem:[%s6206_s4 + $0x104] ss:$24 sps:$4 sm:$0xff]  }
 0x192   : > { %1723 = vmatprep.subr.bf16.mxu1 %v5024_v22  ;;  %v5063_v22 = vld [vmem:[%s6206_s4 + $0x130] ss:$24 sps:$4 sm:$0xff]  }
 0x193   : > { %1679 = vmatpush1.bf16.msra.mxu0 %v5029_v23  ;;  %v5068_v23 = vld [vmem:[%s6206_s4 + $0x164] ss:$24 sps:$4 sm:$0xff]  }
 0x194   : > { %1680 = vmatprep.subr.bf16.mxu0 %v5032_v25  ;;  %v1346_v25 = vand.u32 127, %v1343_v39  ;;  %v1422_v39 = vsub.s32 5, %v6344_v40  ;;  %s6903_s2 = scalar_lea.vmem %s6902_s13, %s6216_s10 }
 0x195   : > { %1724 = vmatpush1.bf16.msra.mxu1 %v5028_v24  ;;  %v5066_v24 = vld [vmem:[%s6206_s4 + $0x160] ss:$24 sps:$4 sm:$0xff]   ;;  %s6908_s16 = scalar_lea.vmem %s6907_s8, %s6216_s10  ;;  %s6909_s4 = sld [smem:[#allocation50_spill]] }
 0x196   : > { %1725 = vmatprep.subr.bf16.mxu1 %v5030_v26  ;;  %vm1347_vm1 = vcmp.gt.s32.totalorder %v1346_v25, %v6344_v40 }
 0x197   : > { %1681 = vmatpush1.bf16.msra.mxu0 %v5035_v28  ;;  %v6390_v26 = vsel %vm1347_vm1, -1e+30, %v5665_v38 }
 0x198   : > { %1682 = vmatprep.subr.bf16.mxu0 %v5038_v30 }
 0x199   : > { %1726 = vmatpush1.bf16.msra.mxu1 %v5034_v27  ;;  %v4519_v27 = vld [vmem:[#allocation9] ss:$0 sm:$0xff] }
 0x19a   : > { %1727 = vmatprep.subr.bf16.mxu1 %v5036_v29  ;;  %v1818_v28 = vadd.f32 %v4519_v27, %v6390_v26 }
 0x19b   : > { %1683 = vmatpush1.bf16.msra.mxu0 %v5041_v31  ;;  %s6910_s3 = scalar_lea.vmem %s6909_s4, %s6216_s10 }
 0x19c   : > { %1684 = vmatprep.subr.bf16.mxu0 %v5042_v35 }
 0x19d   : > { %1728 = vmatpush1.bf16.msra.mxu1 %v5040_v32 }
 0x19e   : > { %4763 = vmatprep.subr.bf16.mxu1 %v5665_v38 }
 0x19f   : > { %1685 = vmatpush1.bf16.msra.mxu0 %v5044_v36 }
 0x1a0   : > { %1746 = vmatmul.mubr.bf16.vlgmr.msra.gmra.mrb[0].mxu1 %v6335_v37  ;;  %1756 = vmatprep.subr.bf16.mxu0 %v5047_v10 }
 0x1a1   : > { %4765 = vmatprep.mubr.msk.bf16.mxu1 %vm5666_vm0, %v5665_v38 }
 0x1a2   : > { %1703 = vmatmul.mubr.bf16.vlgmr.msra.gmra.mrb[0].mxu0 %v6335_v37 }
 0x1a3   : > { %1788 = vmatprep.mubr.bf16.mxu0 %v5664_v4  ;;  %1757 = vmatpush1.bf16.msra.mxu0 %v5045_v9 }
 0x1a4   : > { %1758 = vmatprep.subr.bf16.mxu0 %v5050_v11 }
 0x1a7   : > { %1759 = vmatpush1.bf16.msra.mxu0 %v5048_v12 }
 0x1a8   : > { %1760 = vmatprep.subr.bf16.mxu0 %v5053_v13 }
 0x1ab   : > { %1761 = vmatpush1.bf16.msra.mxu0 %v5051_v14 }
 0x1ac   : > { %1762 = vmatprep.subr.bf16.mxu0 %v5056_v15 }
 0x1af   : > { %1763 = vmatpush1.bf16.msra.mxu0 %v5054_v16 }
 0x1b0   : > { %1764 = vmatprep.subr.bf16.mxu0 %v5059_v17 }
 0x1b3   : > { %1765 = vmatpush1.bf16.msra.mxu0 %v5057_v18 }
 0x1b4   : > { %1766 = vmatprep.subr.bf16.mxu0 %v5062_v19 }
 0x1b7   : > { %1767 = vmatpush1.bf16.msra.mxu0 %v5060_v20 }
 0x1b8   : > { %1768 = vmatprep.subr.bf16.mxu0 %v5065_v21 }
 0x1bb   : > { %1769 = vmatpush1.bf16.msra.mxu0 %v5063_v22 }
 0x1bc   : > { %1770 = vmatprep.subr.bf16.mxu0 %v5068_v23 }
 0x1bf   : > { %1771 = vmatpush1.bf16.msra.mxu0 %v5066_v24 }
 0x1c2   : > { %1789 = vmatmul.mubr.bf16.vlgmr.msra.gmra.mrb[4].mxu0 %v6335_v37  ;;  %v1418_v37 = vsub.s32 4, %v6344_v40 }
 0x273   : > { %v1747_v47 = vpop.f32.mrb[0].mxu1 }
 0x274   : > { %v1749_v50 = vpop.f32.mrb[1].mxu1  ;;  %v1748_v53 = vadd.f32 %v1747_v47, %v1411_v46  ;;  %v1423_v47 = vrot.slane %v6348_v42, %v1422_v39 }
 0x275   : > { %v1751_v52 = vpop.f32.mrb[2].mxu1  ;;  %v1704_v56 = vpop.f32.mrb[0].mxu0  ;;  %v1750_v57 = vadd.f32 %v1749_v50, %v1415_v48 }
 0x276   : > { %v1752_v54 = vadd.f32 %v1751_v52, %v1411_v46  ;;  %v1753_v55 = vpop.f32.mrb[3].mxu1  ;;  %v1705_v59 = vadd.f32 %v1704_v56, %v1403_v49  ;;  %v1706_v60 = vpop.f32.mrb[1].mxu0  ;;  %v1419_v46 = vrot.slane %v6348_v42, %v1418_v37 }
 0x277   : > { %v1754_v58 = vadd.f32 %v1753_v55, %v1415_v48  ;;  %v1707_v62 = vadd.f32 %v1706_v60, %v1407_v51  ;;  %v1708_v63 = vpop.f32.mrb[2].mxu0 }
 0x278   : > { %v1801_v61 = vpack.c.bf16 %v1752_v54, %v1748_v53  ;;  %v1709_v1 = vadd.f32 %v1708_v63, %v1403_v49  ;;  %v1710_v2 = vpop.f32.mrb[3].mxu0 }
 0x279   : > { %v1802_v0 = vpack.c.bf16 %v1754_v58, %v1750_v57  ;;  %v1711_v3 = vadd.f32 %v1710_v2, %v1407_v51 }
 0x27a   : > { %1807 = vst [vmem:[#allocation2 + $0x10] sm:$0xff] %v1801_v61  ;;  %v1799_v5 = vpack.c.bf16 %v1709_v1, %v1705_v59 }
 0x27b   : > { %1808 = vst [vmem:[#allocation2 + $0x18] sm:$0xff] %v1802_v0  ;;  %v1800_v6 = vpack.c.bf16 %v1711_v3, %v1707_v62 }
 0x27c   : > { %1805 = vst [vmem:[#allocation2] sm:$0xff] %v1799_v5 }
 0x27d   : > { %1806 = vst [vmem:[#allocation2 + $0x8] sm:$0xff] %v1800_v6 }
 0x281   : > { %v1820_v7 = vld [vmem:[#allocation2 + $0x10] sm:$0xf] }
 0x282   : > { %4764 = vmatpush3.bf16.xpose.msra.mxu1 %v1820_v7  ;;  %v1925_v5 = vld [vmem:[#allocation2 + $0x18] sm:$0xf] }
 0x283   : > { %4769 = vmatprep.subr.bf16.mxu1 %v5665_v38  ;;  %v1819_v8 = vld [vmem:[#allocation2] sm:$0xf] }
 0x284   : > { %v1924_v7 = vld [vmem:[#allocation2 + $0x8] sm:$0xf] }
 0x289   : > { %4766 = vmatmul.mubr.bf16.vlgmr.msra.gmra.mrb[4].mxu1 %v1819_v8 }
 0x28a   : > { %4771 = vmatprep.mubr.msk.bf16.mxu1 %vm5666_vm0, %v5665_v38 }
 0x295   : > { %v1790_v48 = vpop.f32.mrb[4].mxu0 }
 0x296   : > { %v1791_v49 = vadd.f32 %v1790_v48, %v1419_v46  ;;  %v1792_v50 = vpop.f32.mrb[5].mxu0 }
 0x297   : > { %v1793_v51 = vadd.f32 %v1792_v50, %v1423_v47  ;;  %v1794_v52 = vpop.f32.mrb[6].mxu0  ;;  %v4522_v50 = vld [vmem:[#allocation9 + $0x1] ss:$0 sm:$0xff] }
 0x298   : > { %v1795_v53 = vadd.f32 %v1794_v52, %v1419_v46  ;;  %v1796_v54 = vpop.f32.mrb[7].mxu0  ;;  %v2035_v52 = vadd.f32 %v4522_v50, %v6390_v26 }
 0x299   : > { %v1797_v55 = vadd.f32 %v1796_v54, %v1423_v47 }
 0x29a   : > { %v1803_v56 = vpack.c.bf16 %v1795_v53, %v1791_v49 }
 0x29b   : > { %v1804_v57 = vpack.c.bf16 %v1797_v55, %v1793_v51 }
 0x29c   : > { %1809 = vst [vmem:[#allocation2 + $0x20] sm:$0xff] %v1803_v56 }
 0x29d   : > { %1810 = vst [vmem:[#allocation2 + $0x28] sm:$0xff] %v1804_v57 }
 0x2a3   : > { %v1821_v42 = vld [vmem:[#allocation2 + $0x20] sm:$0xf] }
 0x2a4   : > { %v1880_v63 = vsel %vm1878_vm3, %v1821_v42, 0  ;;  %v1926_v6 = vld [vmem:[#allocation2 + $0x28] sm:$0xf] }
 0x2a5   : > { %4770 = vmatpush3.bf16.msra.mxu1 %v1880_v63  ;;  %v1983_v8 = vsel %vm1878_vm3, %v1926_v6, 0  ;;  %v2150_v6 = vld [vmem:[#allocation2 + $0x8] sm:$0xf0] }
 0x2a6   : > { %4775 = vmatprep.subr.bf16.mxu1 %v5665_v38 }
 0x35c   : > { %v1856_v29 = vpop.f32.mrb[4].mxu1 }
 0x35d   : > { %v1857_v30 = vadd.f32 %v1856_v29, %v1818_v28  ;;  %v4767_v31 = vpop.f32.mrb[5].mxu1 }
 0x35e   : > { %v1859_v32 = vpop.f32.mrb[6].mxu1 }
 0x35f   : > { %v4768_v35 = vpop.f32.mrb[7].mxu1  ;;  %v1863_v36 = vsel %vm1862_vm2, %v1857_v30, -inf  ;;  %v2038_v32 = vld [vmem:[#allocation2 + $0x20] sm:$0xf0] }
 0x360   : > { %1864 = vmax.xlane.f32.xlu0 %v1863_v36  ;;  %v2036_v35 = vld [vmem:[#allocation2] sm:$0xf0]  ;;  %v2098_v36 = vrot.slane %v2038_v32, 4  ;;  %v5073_v32 = vld [vmem:[%s6273_s9 + $0x50] sm:$0xff]  }
 0x361   : > { %v2040_v37 = vrot.slane %v2036_v35, 4  ;;  %v5074_v35 = vld [vmem:[%s6273_s9 + $0x10] sm:$0xff]  }
 0x362   : > { %v2103_v39 = vsel %vm1878_vm3, %v2098_v36, 0  ;;  %v5075_v36 = vld [vmem:[%s6273_s9 + $0x58] sm:$0xff]  }
 0x3ed   : > { %v1865_v58 = vpop.xlane.xlu0 %1864 }
 0x3ee   : > { %v1866_v59 = vsub.f32 %v1857_v30, %v1865_v58  ;;  %v2037_v30 = vld [vmem:[#allocation2 + $0x10] sm:$0xf0] }
 0x3ef   : > { %v2043_v31 = vrot.slane %v2037_v30, 4  ;;  %v5070_v30 = vld [vmem:[%s6273_s9] sm:$0xff]  }
 0x3f0   : > { %v1867_v60 = vmul.f32 1.442695, %v1866_v59 }
 0x3f2   : > { %5215 = vpow2.f32 %v1867_v60 }
 0x3fc   : > { %v5216_v61 = vpop.eup %5215 }
 0x3fd   : > { %v1869_v62 = vsel %vm1862_vm2, %v5216_v61, 0.0 }
 0x3fe   : > { %1870 = vadd.xlane.f32.xlu0 %v1869_v62 }
 0x48b   : > { %v1871_v0 = vpop.xlane.xlu0 %1870 }
 0x48c   : > { %5217 = vrcp.f32 %v1871_v0 }
 0x496   : > { %v5218_v1 = vpop.eup %5217 }
 0x497   : > { %v1873_v2 = vmul.f32 %v5218_v1, %v5216_v61  ;;  %v2151_v1 = vld [vmem:[#allocation2 + $0x18] sm:$0xf0] }
 0x499   : > { %v1874_v3 = vpack.c.bf16 %v1873_v2, %v1873_v2 }
 0x49b   : > { %4772 = vmatmul.mubr.msk.bf16.vlgmr.msra.gmra.mrb[8].mxu1 %vm1862_vm2, %v1874_v3  ;;  %v2157_v3 = vrot.slane %v2151_v1, 4 }
 0x49c   : > { %4776 = vmatpush3.bf16.xpose.msra.mxu1 %v1925_v5  ;;  %4777 = vmatprep.mubr.msk.bf16.mxu1 %vm5666_vm0, %v5665_v38  ;;  %v2152_v5 = vld [vmem:[#allocation2 + $0x28] sm:$0xf0] }
 0x49d   : > { %4781 = vmatprep.subr.bf16.mxu1 %v5665_v38 }
 0x4a3   : > { %4778 = vmatmul.mubr.bf16.vlgmr.msra.gmra.mrb[12].mxu1 %v1924_v7  ;;  %v2212_v7 = vrot.slane %v2152_v5, 4 }
 0x4a4   : > { %4782 = vmatpush3.bf16.msra.mxu1 %v1983_v8  ;;  %4783 = vmatprep.mubr.msk.bf16.mxu1 %vm5666_vm0, %v5665_v38  ;;  %v2154_v8 = vrot.slane %v2150_v6, 4 }
 0x4a5   : > { %4787 = vmatprep.subr.bf16.mxu1 %v5665_v38 }
 0x56e   : > { %v1916_v9 = vpop.f32.mrb[8].mxu1 }
 0x56f   : > { %v1922_v10 = vpack.c.bf16 %v1916_v9, %v1916_v9  ;;  %v4773_v11 = vpop.f32.mrb[9].mxu1  ;;  %v2217_v9 = vsel %vm1878_vm3, %v2212_v7, 0 }
 0x570   : > { %v1919_v12 = vpop.f32.mrb[10].mxu1 }
 0x571   : > { %1923 = vst [vmem:[#allocation5] sm:$0xf] %v1922_v10  ;;  %v4774_v13 = vpop.f32.mrb[11].mxu1 }
 0x576   : > { %v1961_v14 = vpop.f32.mrb[12].mxu1 }
 0x577   : > { %v1962_v15 = vadd.f32 %v1961_v14, %v1818_v28  ;;  %v4779_v16 = vpop.f32.mrb[13].mxu1 }
 0x578   : > { %v1964_v17 = vpop.f32.mrb[14].mxu1 }
 0x579   : > { %v4780_v18 = vpop.f32.mrb[15].mxu1  ;;  %v1967_v19 = vsel %vm1862_vm2, %v1962_v15, -inf }
 0x57a   : > { %1968 = vmax.xlane.f32.xlu1 %v1967_v19 }
 0x607   : > { %v1969_v20 = vpop.xlane.xlu1 %1968 }
 0x608   : > { %v1970_v21 = vsub.f32 %v1962_v15, %v1969_v20 }
 0x60a   : > { %v1971_v22 = vmul.f32 1.442695, %v1970_v21 }
 0x60c   : > { %5219 = vpow2.f32 %v1971_v22 }
 0x616   : > { %v5220_v23 = vpop.eup %5219 }
 0x617   : > { %v1973_v24 = vsel %vm1862_vm2, %v5220_v23, 0.0 }
 0x618   : > { %1974 = vadd.xlane.f32.xlu1 %v1973_v24 }
 0x6a5   : > { %v1975_v25 = vpop.xlane.xlu1 %1974 }
 0x6a6   : > { %5221 = vrcp.f32 %v1975_v25 }
 0x6b0   : > { %v5222_v27 = vpop.eup %5221 }
 0x6b1   : > { %v1977_v29 = vmul.f32 %v5222_v27, %v5220_v23 }
 0x6b3   : > { %v1978_v28 = vpack.c.bf16 %v1977_v29, %v1977_v29  ;;  %v5069_v29 = vld [vmem:[%s6273_s9 + $0x40] sm:$0xff]  }
 0x6b4   : > { %4681 = vmatprep.subr.bf16.mxu0 %v5069_v29 }
 0x6b5   : > { %4784 = vmatmul.mubr.msk.bf16.vlgmr.msra.gmra.mrb[16].mxu1 %vm1862_vm2, %v1978_v28  ;;  %v5071_v28 = vld [vmem:[%s6273_s9 + $0x48] sm:$0xff]   ;;  %4682 = vmatpush3.bf16.msra.mxu0 %v5070_v30 }
 0x6b6   : > { %4788 = vmatpush3.bf16.xpose.msra.mxu1 %v2043_v31  ;;  %4789 = vmatprep.mubr.msk.bf16.mxu1 %vm5666_vm0, %v5665_v38  ;;  %v5072_v31 = vld [vmem:[%s6273_s9 + $0x8] sm:$0xff]  }
 0x6b7   : > { %4793 = vmatprep.subr.bf16.mxu1 %v5665_v38  ;;  %4683 = vmatprep.subr.bf16.mxu0 %v5071_v28  ;;  %v1342_v28 = vld [vmem:[%s6901_s0 + $0x8] sm:$0xff] }
 0x6b9   : > { %4684 = vmatpush3.bf16.msra.mxu0 %v5072_v31  ;;  %v5108_v31 = vld [vmem:[%s6276_s14 + $0x24] ss:$8 sps:$4 sm:$0xff]  }
 0x6ba   : > { %4685 = vmatprep.subr.bf16.mxu0 %v5073_v32  ;;  %v5106_v32 = vld [vmem:[%s6276_s14 + $0x20] ss:$8 sps:$4 sm:$0xff]  }
 0x6bd   : > { %4790 = vmatmul.mubr.bf16.vlgmr.msra.gmra.mrb[20].mxu1 %v2040_v37  ;;  %4686 = vmatpush3.bf16.msra.mxu0 %v5074_v35  ;;  %v5076_v37 = vld [vmem:[%s6273_s9 + $0x18] sm:$0xff]   ;;  %v5103_v35 = vld [vmem:[%s6278_s5 + $0x80] ss:$16 sps:$4 sm:$0xff]  }
 0x6be   : > { %4794 = vmatpush3.bf16.msra.mxu1 %v2103_v39  ;;  %4795 = vmatprep.mubr.msk.bf16.mxu1 %vm5666_vm0, %v5665_v38  ;;  %v5077_v39 = vld [vmem:[%s6273_s9 + $0x60] sm:$0xff]  }
 0x6bf   : > { %4799 = vmatprep.subr.bf16.mxu1 %v5665_v38  ;;  %4687 = vmatprep.subr.bf16.mxu0 %v5075_v36  ;;  %v5105_v36 = vld [vmem:[%s6278_s5 + $0x84] ss:$16 sps:$4 sm:$0xff]  }
 0x6c1   : > { %4688 = vmatpush3.bf16.msra.mxu0 %v5076_v37  ;;  %v1341_v37 = vld [vmem:[%s6901_s0] sm:$0xff] }
 0x6c2   : > { %4689 = vmatprep.subr.bf16.mxu0 %v5077_v39  ;;  %v5111_v39 = vld [vmem:[%s6278_s5 + $0xa4] ss:$16 sps:$4 sm:$0xff]  }
 0x788   : > { %v2019_v46 = vpop.f32.mrb[16].mxu1 }
 0x789   : > { %v2025_v47 = vpack.c.bf16 %v2019_v46, %v2019_v46  ;;  %v4785_v48 = vpop.f32.mrb[17].mxu1  ;;  %v5078_v46 = vld [vmem:[%s6273_s9 + $0x20] sm:$0xff]  }
 0x78a   : > { %v2022_v49 = vpop.f32.mrb[18].mxu1  ;;  %4690 = vmatpush3.bf16.msra.mxu0 %v5078_v46  ;;  %v5112_v46 = vld [vmem:[%s6276_s14 + $0x30] ss:$8 sps:$4 sm:$0xff]  }
 0x78b   : > { %2026 = vst [vmem:[#allocation5 + $0x8] sm:$0xf] %v2025_v47  ;;  %v4786_v51 = vpop.f32.mrb[19].mxu1 }
 0x78c   : > { %v5079_v51 = vld [vmem:[%s6273_s9 + $0x68] sm:$0xff]  }
 0x78d   : > { %4691 = vmatprep.subr.bf16.mxu0 %v5079_v51  ;;  %v5118_v51 = vld [vmem:[%s6276_s14 + $0x40] ss:$8 sps:$4 sm:$0xff]  }
 0x790   : > { %v2079_v53 = vpop.f32.mrb[20].mxu1 }
 0x791   : > { %v2080_v54 = vadd.f32 %v2079_v53, %v2035_v52  ;;  %v4791_v55 = vpop.f32.mrb[21].mxu1  ;;  %v5081_v53 = vld [vmem:[%s6273_s9 + $0x70] sm:$0xff]  }
 0x792   : > { %v2082_v56 = vpop.f32.mrb[22].mxu1  ;;  %v5083_v55 = vld [vmem:[%s6273_s9 + $0x78] sm:$0xff]  }
 0x793   : > { %v4792_v57 = vpop.f32.mrb[23].mxu1  ;;  %v2085_v58 = vsel %vm1862_vm2, %v2080_v54, -inf  ;;  %v5084_v56 = vld [vmem:[%s6273_s9 + $0x38] sm:$0xff]  }
 0x794   : > { %2086 = vmax.xlane.f32.xlu0 %v2085_v58 }
 0x821   : > { %v2087_v59 = vpop.xlane.xlu0 %2086 }
 0x822   : > { %v2088_v60 = vsub.f32 %v2080_v54, %v2087_v59  ;;  %v5082_v54 = vld [vmem:[%s6273_s9 + $0x30] sm:$0xff]  }
 0x824   : > { %v2089_v61 = vmul.f32 1.442695, %v2088_v60 }
 0x826   : > { %5223 = vpow2.f32 %v2089_v61 }
 0x830   : > { %v5224_v62 = vpop.eup %5223 }
 0x831   : > { %v2091_v42 = vsel %vm1862_vm2, %v5224_v62, 0.0 }
 0x832   : > { %2092 = vadd.xlane.f32.xlu1 %v2091_v42 }
 0x8bf   : > { %v2093_v63 = vpop.xlane.xlu1 %2092 }
 0x8c0   : > { %5225 = vrcp.f32 %v2093_v63 }
 0x8ca   : > { %v5226_v0 = vpop.eup %5225 }
 0x8cb   : > { %v2095_v26 = vmul.f32 %v5226_v0, %v5224_v62 }
 0x8cd   : > { %v2096_v2 = vpack.c.bf16 %v2095_v26, %v2095_v26  ;;  %v4525_v26 = vld [vmem:[%s1075_s19] ss:$0 sm:$0xff]  ;;  %s6904_s19 = sld [smem:[#allocation43_spill]] }
 0x8cf   : > { %4796 = vmatmul.mubr.msk.bf16.vlgmr.msra.gmra.mrb[24].mxu1 %vm1862_vm2, %v2096_v2 }
 0x8d0   : > { %4800 = vmatpush3.bf16.xpose.msra.mxu1 %v2157_v3  ;;  %4801 = vmatprep.mubr.msk.bf16.mxu1 %vm5666_vm0, %v5665_v38 }
 0x8d1   : > { %4805 = vmatprep.subr.bf16.mxu1 %v5665_v38 }
 0x8d7   : > { %4802 = vmatmul.mubr.bf16.vlgmr.msra.gmra.mrb[28].mxu1 %v2154_v8 }
 0x8d8   : > { %4806 = vmatpush3.bf16.msra.mxu1 %v2217_v9  ;;  %4807 = vmatprep.mubr.msk.bf16.mxu1 %vm5666_vm0, %v5665_v38 }
 0x9a2   : > { %v2139_v10 = vpop.f32.mrb[24].mxu1 }
 0x9a3   : > { %v2145_v11 = vpack.c.bf16 %v2139_v10, %v2139_v10  ;;  %v4797_v12 = vpop.f32.mrb[25].mxu1 }
 0x9a4   : > { %v2142_v13 = vpop.f32.mrb[26].mxu1  ;;  %v5087_v12 = vld [vmem:[%s6278_s5 + $0x4] ss:$16 sps:$4 sm:$0xff]  }
 0x9a5   : > { %v2147_v14 = vrot.slane %v2145_v11, 4  ;;  %v4798_v15 = vpop.f32.mrb[27].mxu1  ;;  %v5085_v11 = vld [vmem:[%s6278_s5] ss:$16 sps:$4 sm:$0xff]   ;;  %v5090_v13 = vld [vmem:[%s6278_s5 + $0x24] ss:$16 sps:$4 sm:$0xff]  }
 0x9a6   : > { %v5096_v15 = vld [vmem:[%s6276_s14 + $0x4] ss:$8 sps:$4 sm:$0xff]  }
 0x9a7   : > { %2149 = vst [vmem:[#allocation5] sm:$0xf0] %v2147_v14  ;;  %v5094_v14 = vld [vmem:[%s6276_s14] ss:$8 sps:$4 sm:$0xff]   ;;  %2606 = vmatprep.subr.bf16.mxu1 %v5096_v15 }
 0x9aa   : > { %v2193_v16 = vpop.f32.mrb[28].mxu1 }
 0x9ab   : > { %v2194_v17 = vadd.f32 %v2193_v16, %v2035_v52  ;;  %v4803_v18 = vpop.f32.mrb[29].mxu1  ;;  %v5080_v52 = vld [vmem:[%s6273_s9 + $0x28] sm:$0xff]   ;;  %v5088_v16 = vld [vmem:[%s6278_s5 + $0x20] ss:$16 sps:$4 sm:$0xff]  }
 0x9ac   : > { %v2196_v19 = vpop.f32.mrb[30].mxu1  ;;  %4692 = vmatpush3.bf16.msra.mxu0 %v5080_v52  ;;  %v5100_v18 = vld [vmem:[%s6276_s14 + $0x10] ss:$8 sps:$4 sm:$0xff]  }
 0x9ad   : > { %v4804_v20 = vpop.f32.mrb[31].mxu1  ;;  %v2199_v21 = vsel %vm1862_vm2, %v2194_v17, -inf  ;;  %4693 = vmatprep.subr.bf16.mxu0 %v5081_v53  ;;  %v5099_v19 = vld [vmem:[%s6278_s5 + $0x64] ss:$16 sps:$4 sm:$0xff]   ;;  %v5115_v52 = vld [vmem:[%s6278_s5 + $0xc0] ss:$16 sps:$4 sm:$0xff]  }
 0x9ae   : > { %2200 = vmax.xlane.f32.xlu0 %v2199_v21  ;;  %v2264_v63 = vld [vmem:[#allocation5] sm:$0xff] }
 0x9af   : > { %v5097_v20 = vld [vmem:[%s6278_s5 + $0x60] ss:$16 sps:$4 sm:$0xff]   ;;  %v5126_v53 = vld [vmem:[%s6276_s14 + $0x54] ss:$8 sps:$4 sm:$0xff]  }
 0x9b0   : > { %4694 = vmatpush3.bf16.msra.mxu0 %v5082_v54  ;;  %v5123_v54 = vld [vmem:[%s6278_s5 + $0xe4] ss:$16 sps:$4 sm:$0xff]  }
 0x9b1   : > { %4695 = vmatprep.subr.bf16.mxu0 %v5083_v55  ;;  %v5124_v55 = vld [vmem:[%s6276_s14 + $0x50] ss:$8 sps:$4 sm:$0xff]  }
 0x9b4   : > { %4696 = vmatpush3.bf16.msra.mxu0 %v5084_v56  ;;  %v5121_v56 = vld [vmem:[%s6278_s5 + $0xe0] ss:$16 sps:$4 sm:$0xff]  }
 0x9b5   : > { %2883 = vmatprep.subr.bf16.mxu0 %v5087_v12 }
 0xa3b   : > { %v2201_v22 = vpop.xlane.xlu0 %2200 }
 0xa3c   : > { %v2202_v23 = vsub.f32 %v2194_v17, %v2201_v22  ;;  %v5093_v17 = vld [vmem:[%s6278_s5 + $0x44] ss:$16 sps:$4 sm:$0xff]  }
 0xa3e   : > { %v2203_v24 = vmul.f32 1.442695, %v2202_v23 }
 0xa40   : > { %5227 = vpow2.f32 %v2203_v24 }
 0xa4a   : > { %v5228_v25 = vpop.eup %5227 }
 0xa4b   : > { %v2205_v27 = vsel %vm1862_vm2, %v5228_v25, 0.0 }
 0xa4c   : > { %2206 = vadd.xlane.f32.xlu1 %v2205_v27 }
 0xad9   : > { %v2207_v47 = vpop.xlane.xlu1 %2206 }
 0xada   : > { %5229 = vrcp.f32 %v2207_v47  ;;  %v5109_v47 = vld [vmem:[%s6278_s5 + $0xa0] ss:$16 sps:$4 sm:$0xff]  }
 0xae4   : > { %v5230_v48 = vpop.eup %5229 }
 0xae5   : > { %v2209_v49 = vmul.f32 %v5230_v48, %v5228_v25  ;;  %v5114_v48 = vld [vmem:[%s6276_s14 + $0x34] ss:$8 sps:$4 sm:$0xff]  }
 0xae7   : > { %v2210_v50 = vpack.c.bf16 %v2209_v49, %v2209_v49  ;;  %v5117_v49 = vld [vmem:[%s6278_s5 + $0xc4] ss:$16 sps:$4 sm:$0xff]  }
 0xae9   : > { %4808 = vmatmul.mubr.msk.bf16.vlgmr.msra.gmra.mrb[32].mxu1 %vm1862_vm2, %v2210_v50  ;;  %v5120_v50 = vld [vmem:[%s6276_s14 + $0x44] ss:$8 sps:$4 sm:$0xff]  }
 0xaea   : > { %2638 = vmatprep.mubr.bf16.mxu1 %v5664_v4  ;;  %2607 = vmatpush1.bf16.msra.mxu1 %v5094_v14 }
 0xbbc   : > { %v2253_v57 = vpop.f32.mrb[32].mxu1 }
 0xbbd   : > { %v2259_v58 = vpack.c.bf16 %v2253_v57, %v2253_v57  ;;  %v4809_v59 = vpop.f32.mrb[33].mxu1  ;;  %v5130_v57 = vld [vmem:[%s6276_s14 + $0x64] ss:$8 sps:$4 sm:$0xff]  }
 0xbbe   : > { %v2256_v60 = vpop.f32.mrb[34].mxu1  ;;  %v5128_v59 = vld [vmem:[%s6276_s14 + $0x60] ss:$8 sps:$4 sm:$0xff]  }
 0xbbf   : > { %v2261_v61 = vrot.slane %v2259_v58, 4  ;;  %v4810_v62 = vpop.f32.mrb[35].mxu1  ;;  %v6497_v58 = vld [vmem:[#allocation6] sm:$0xff]   ;;  %v5133_v60 = vld [vmem:[%s6276_s14 + $0x74] ss:$8 sps:$4 sm:$0xff]  }
 0xbc0   : > { %v6505_v62 = vld [vmem:[#allocation6 + $0x8] sm:$0xff]  }
 0xbc1   : > { %2263 = vst [vmem:[#allocation5 + $0x8] sm:$0xf0] %v2261_v61  ;;  %v5131_v61 = vld [vmem:[%s6276_s14 + $0x70] ss:$8 sps:$4 sm:$0xff]  }
 0xbc8   : > { %v2265_v42 = vld [vmem:[#allocation5 + $0x8] sm:$0xff] }
 0xbc9   : > { %2433 = vmatprep.mubr.bf16.mxu0 %v2265_v42 }
 0xbca   : > { %2434 = vmatmul.mubr.bf16.vlgmr.msra.gmra.mrb[8].mxu0 %v2264_v63 }
 0xbcb   : > { %2915 = vmatprep.mubr.bf16.mxu0 %v5664_v4  ;;  %2884 = vmatpush1.bf16.msra.mxu0 %v5085_v11 }
 0xbcc   : > { %2885 = vmatprep.subr.bf16.mxu0 %v5090_v13 }
 0xbcf   : > { %2886 = vmatpush1.bf16.msra.mxu0 %v5088_v16 }
 0xbd0   : > { %2887 = vmatprep.subr.bf16.mxu0 %v5093_v17 }
 0xc9d   : > { %v4697_v0 = vpop.f32.mrb[8].mxu0 }
 0xc9e   : > { %v4698_v1 = vpop.f32.mrb[9].mxu0 }
 0xc9f   : > { %v4699_v2 = vadd.f32 %v4698_v1, %v4697_v0  ;;  %v4700_v3 = vpop.f32.mrb[10].mxu0 }
 0xca0   : > { %v4701_v5 = vpop.f32.mrb[11].mxu0 }
 0xca1   : > { %v2436_v6 = vadd.f32 %v4699_v2, %v4525_v26  ;;  %v4702_v7 = vadd.f32 %v4701_v5, %v4700_v3  ;;  %v4542_v5 = vld [vmem:[%s6903_s2] ss:$0 sm:$0xff] }
 0xca3   : > { %v2439_v8 = vadd.f32 %v4702_v7, %v4525_v26  ;;  %v2442_v9 = vadd.f32 %v2436_v6, %v6327_v33  ;;  %v5102_v33 = vld [vmem:[%s6276_s14 + $0x14] ss:$8 sps:$4 sm:$0xff]   ;;  %s6905_s14 = scalar_lea.vmem %s6904_s19, %s6216_s10 }
 0xca4   : > { %2608 = vmatprep.subr.bf16.mxu1 %v5102_v33 }
 0xca5   : > { %2444 = vadd.xlane.f32.xlu0 %v2442_v9  ;;  %v2443_v10 = vadd.f32 %v2439_v8, %v6329_v34  ;;  %v5091_v34 = vld [vmem:[%s6278_s5 + $0x40] ss:$16 sps:$4 sm:$0xff]   ;;  %2609 = vmatpush1.bf16.msra.mxu1 %v5100_v18  ;;  %v4543_v8 = vld [vmem:[%s6905_s14] ss:$0 sm:$0xff] }
 0xca6   : > { %2888 = vmatpush1.bf16.msra.mxu0 %v5091_v34  ;;  %2610 = vmatprep.subr.bf16.mxu1 %v5108_v31  ;;  %v6536_v18 = vld [vmem:[%s6246_s24] sm:$0xf] }
 0xca7   : > { %2446 = vadd.xlane.f32.xlu1 %v2443_v10  ;;  %2889 = vmatprep.subr.bf16.mxu0 %v5099_v19  ;;  %v2694_v34 = vrot.slane %v6536_v18, %v6352_v44  ;;  %v2698_v19 = vrot.slane %v6536_v18, %v6355_v45 }
 0xca9   : > { %2611 = vmatpush1.bf16.msra.mxu1 %v5106_v32 }
 0xcaa   : > { %2890 = vmatpush1.bf16.msra.mxu0 %v5097_v20  ;;  %2612 = vmatprep.subr.bf16.mxu1 %v5114_v48 }
 0xcab   : > { %2891 = vmatprep.subr.bf16.mxu0 %v5105_v36 }
 0xcad   : > { %2613 = vmatpush1.bf16.msra.mxu1 %v5112_v46 }
 0xcae   : > { %2892 = vmatpush1.bf16.msra.mxu0 %v5103_v35  ;;  %2614 = vmatprep.subr.bf16.mxu1 %v5120_v50  ;;  %v2514_v50 = vld [vmem:[%s6236_s11] sm:$0x3]  ;;  %s5667_s11 = smov [#allocation19]  }
 0xcaf   : > { %2893 = vmatprep.subr.bf16.mxu0 %v5111_v39  ;;  %s4044_s24 = sshll.u32 %s5667_s11, 4  ;;  %s4045_s24 = int_to_ptr.vmem [resolvable:$true] %s4044_s24 }
 0xcb0   : > { %p5562_p11 = scmp.lt.s32.totalorder %s4045_s24, %s4045_s24 }
 0xcb1   : > { %2615 = vmatpush1.bf16.msra.mxu1 %v5118_v51  ;;  %v2519_v51 = vrot.slane %v2514_v50, %v6352_v44 }
 0xcb2   : > { %2894 = vmatpush1.bf16.msra.mxu0 %v5109_v47  ;;  %2616 = vmatprep.subr.bf16.mxu1 %v5126_v53  ;;  %v2523_v53 = vrot.slane %v2514_v50, %v6355_v45 }
 0xcb3   : > { %2895 = vmatprep.subr.bf16.mxu0 %v5117_v49 }
 0xcb5   : > { %2617 = vmatpush1.bf16.msra.mxu1 %v5124_v55 }
 0xcb6   : > { %2896 = vmatpush1.bf16.msra.mxu0 %v5115_v52  ;;  %2618 = vmatprep.subr.bf16.mxu1 %v5130_v57 }
 0xcb7   : > { %2897 = vmatprep.subr.bf16.mxu0 %v5123_v54 }
 0xcb9   : > { %2619 = vmatpush1.bf16.msra.mxu1 %v5128_v59 }
 0xcba   : > { %2898 = vmatpush1.bf16.msra.mxu0 %v5121_v56  ;;  %2620 = vmatprep.subr.bf16.mxu1 %v5133_v60 }
 0xcbb   : > { %4811 = vmatprep.subr.bf16.mxu0 %v5665_v38 }
 0xcbd   : > { %2916 = vmatmul.mubr.bf16.vlgmr.msra.gmra.mrb[12].mxu0 %v6497_v58  ;;  %2621 = vmatpush1.bf16.msra.mxu1 %v5131_v61 }
 0xcbe   : > { %2925 = vmatprep.mubr.bf16.mxu0 %v5664_v4 }
 0xcc5   : > { %2926 = vmatmul.mubr.bf16.gmra.mrb[16].mxu0 %v6505_v62 }
 0xcc6   : > { %4813 = vmatprep.mubr.msk.bf16.mxu0 %vm5666_vm0, %v5665_v38 }
 0xd32   : > { %v2445_v21 = vpop.xlane.xlu0 %2444 }
 0xd33   : > { %v2449_v22 = vmul.f32 0.0078125, %v2445_v21 }
 0xd34   : > { %v2447_v23 = vpop.xlane.xlu1 %2446 }
 0xd35   : > { %v6466_v24 = vsub.f32 %v2442_v9, %v2449_v22  ;;  %v2450_v25 = vmul.f32 0.0078125, %v2447_v23 }
 0xd37   : > { %v6468_v27 = vsub.f32 %v2443_v10, %v2450_v25  ;;  %v2453_v29 = vmul.f32 %v6466_v24, %v6466_v24 }
 0xd39   : > { %2455 = vadd.xlane.f32.xlu0 %v2453_v29  ;;  %v2454_v30 = vmul.f32 %v6468_v27, %v6468_v27 }
 0xd3b   : > { %2457 = vadd.xlane.f32.xlu1 %v2454_v30 }
 0xd4c   : > { %2492 = vperm.xlu1 %4996, %v1342_v28  }
 0xd4f   : > { %2487 = vperm.xlu0 %4995, %v1341_v37  }
 0xd90   : > { %v2917_v20 = vpop.f32.mrb[12].mxu0 }
 0xd91   : > { %v2918_v21 = vadd.f32 %v2917_v20, %v2694_v34  ;;  %v2919_v22 = vpop.f32.mrb[13].mxu0  ;;  %v5150_v20 = vld [vmem:[%s6278_s5 + $0xa8] ss:$16 sps:$4 sm:$0xff]  }
 0xd92   : > { %v2920_v23 = vadd.f32 %v2919_v22, %v2698_v19  ;;  %v5153_v22 = vld [vmem:[%s6278_s5 + $0xc8] ss:$16 sps:$4 sm:$0xff]  }
 0xdc6   : > { %v2456_v42 = vpop.xlane.xlu0 %2455 }
 0xdc7   : > { %v2459_v63 = vmul.f32 0.0078125, %v2456_v42 }
 0xdc8   : > { %v2458_v0 = vpop.xlane.xlu1 %2457 }
 0xdc9   : > { %v2461_v26 = vadd.f32 1e-05, %v2459_v63  ;;  %v2460_v1 = vmul.f32 0.0078125, %v2458_v0 }
 0xdcb   : > { %5231 = vrsqrt.f32 %v2461_v26  ;;  %v2462_v2 = vadd.f32 1e-05, %v2460_v1 }
 0xdcc   : > { %v6524_v14 = vpop.permute.xlu1 %2492 }
 0xdcd   : > { %5233 = vrsqrt.f32 %v2462_v2 }
 0xdce   : > { %v6522_v13 = vpop.permute.xlu0 %2487 }
 0xdd5   : > { %v5232_v3 = vpop.eup %5231 }
 0xdd6   : > { %v2465_v6 = vmul.f32 %v5232_v3, %v6466_v24  ;;  %v2921_v24 = vpop.f32.mrb[14].mxu0 }
 0xdd7   : > { %v5234_v7 = vpop.eup %5233  ;;  %v2922_v25 = vadd.f32 %v2921_v24, %v2694_v34  ;;  %v5156_v24 = vld [vmem:[%s6278_s5 + $0xe8] ss:$16 sps:$4 sm:$0xff]  }
 0xdd8   : > { %v2474_v9 = vmul.f32 %v4542_v5, %v2465_v6  ;;  %v2466_v10 = vmul.f32 %v5234_v7, %v6468_v27  ;;  %v2923_v27 = vpop.f32.mrb[15].mxu0  ;;  %v5135_v6 = vld [vmem:[%s6278_s5 + $0x8] ss:$16 sps:$4 sm:$0xff]   ;;  %v5137_v7 = vld [vmem:[%s6278_s5 + $0xc] ss:$16 sps:$4 sm:$0xff]  }
 0xdd9   : > { %v2924_v29 = vadd.f32 %v2923_v27, %v2698_v19  ;;  %v2989_v30 = vpack.c.bf16 %v2922_v25, %v2918_v21  ;;  %v2927_v31 = vpop.f32.mrb[16].mxu0  ;;  %2936 = vmatprep.subr.bf16.mxu1 %v5137_v7  ;;  %v5155_v21 = vld [vmem:[%s6278_s5 + $0xcc] ss:$16 sps:$4 sm:$0xff]  }
 0xdda   : > { %v2483_v11 = vadd.f32 %v4543_v8, %v2474_v9  ;;  %v2475_v12 = vmul.f32 %v4542_v5, %v2466_v10  ;;  %v2928_v32 = vadd.f32 %v2927_v31, %v2694_v34  ;;  %v2929_v35 = vpop.f32.mrb[17].mxu0  ;;  %v5138_v9 = vld [vmem:[%s6278_s5 + $0x28] ss:$16 sps:$4 sm:$0xff]   ;;  %v5143_v10 = vld [vmem:[%s6278_s5 + $0x4c] ss:$16 sps:$4 sm:$0xff]  }
 0xddb   : > { %v2990_v28 = vpack.c.bf16 %v2924_v29, %v2920_v23  ;;  %4812 = vmatpush3.bf16.xpose.msra.mxu0 %v2989_v30  ;;  %v2930_v36 = vadd.f32 %v2929_v35, %v2698_v19  ;;  %v2931_v37 = vpop.f32.mrb[18].mxu0  ;;  %v5158_v23 = vld [vmem:[%s6278_s5 + $0xec] ss:$16 sps:$4 sm:$0xff]  }
 0xddc   : > { %v2484_v15 = vadd.f32 %v4543_v8, %v2475_v12  ;;  %v6527_v16 = vmul.f32 %v6522_v13, %v2483_v11  ;;  %4823 = vmatprep.subr.bf16.mxu0 %v5665_v38  ;;  %v2932_v39 = vadd.f32 %v2931_v37, %v2694_v34  ;;  %v2933_v46 = vpop.f32.mrb[19].mxu0  ;;  %v5140_v8 = vld [vmem:[%s6278_s5 + $0x2c] ss:$16 sps:$4 sm:$0xff]   ;;  %v5141_v11 = vld [vmem:[%s6278_s5 + $0x48] ss:$16 sps:$4 sm:$0xff]  }
 0xddd   : > { %v2934_v47 = vadd.f32 %v2933_v46, %v2698_v19  ;;  %v5146_v12 = vld [vmem:[%s6278_s5 + $0x6c] ss:$16 sps:$4 sm:$0xff]   ;;  %v5147_v34 = vld [vmem:[%s6278_s5 + $0x88] ss:$16 sps:$4 sm:$0xff]  }
 0xdde   : > { %v6530_v17 = vmul.f32 %v6524_v14, %v2484_v15  ;;  %v2993_v48 = vpack.c.bf16 %v2932_v39, %v2928_v32  ;;  %v5144_v15 = vld [vmem:[%s6278_s5 + $0x68] ss:$16 sps:$4 sm:$0xff]   ;;  %v5152_v19 = vld [vmem:[%s6278_s5 + $0xac] ss:$16 sps:$4 sm:$0xff]  }
 0xddf   : > { %v2994_v49 = vpack.c.bf16 %v2934_v47, %v2930_v36  ;;  %v4594_v25 = vld [vmem:[%s6906_s23] ss:$0 sm:$0xff]  ;;  %v4598_v46 = vld [vmem:[%s6906_s23 + $0x1] ss:$0 sm:$0xff] }
 0xde0   : > { %v2497_v33 = vpack.c.bf16 %v6530_v17, %v6527_v16 }
 0xde2   : > { %2639 = vmatmul.mubr.bf16.vlgmr.msra.gmra.mrb[36].mxu1 %v2497_v33  ;;  %v5149_v33 = vld [vmem:[%s6278_s5 + $0x8c] ss:$16 sps:$4 sm:$0xff]  }
 0xde3   : > { %2968 = vmatprep.mubr.bf16.mxu1 %v5664_v4  ;;  %2937 = vmatpush1.bf16.msra.mxu1 %v5135_v6 }
 0xde4   : > { %2938 = vmatprep.subr.bf16.mxu1 %v5140_v8 }
 0xde7   : > { %2939 = vmatpush1.bf16.msra.mxu1 %v5138_v9 }
 0xde8   : > { %2940 = vmatprep.subr.bf16.mxu1 %v5143_v10 }
 0xdeb   : > { %2941 = vmatpush1.bf16.msra.mxu1 %v5141_v11 }
 0xdec   : > { %2942 = vmatprep.subr.bf16.mxu1 %v5146_v12 }
 0xdef   : > { %2943 = vmatpush1.bf16.msra.mxu1 %v5144_v15 }
 0xdf0   : > { %2944 = vmatprep.subr.bf16.mxu1 %v5149_v33 }
 0xdf3   : > { %2945 = vmatpush1.bf16.msra.mxu1 %v5147_v34 }
 0xdf4   : > { %2946 = vmatprep.subr.bf16.mxu1 %v5152_v19 }
 0xdf7   : > { %2947 = vmatpush1.bf16.msra.mxu1 %v5150_v20 }
 0xdf8   : > { %2948 = vmatprep.subr.bf16.mxu1 %v5155_v21 }
 0xdfb   : > { %2949 = vmatpush1.bf16.msra.mxu1 %v5153_v22 }
 0xdfc   : > { %2950 = vmatprep.subr.bf16.mxu1 %v5158_v23 }
 0xdff   : > { %2951 = vmatpush1.bf16.msra.mxu1 %v5156_v24 }
 0xe00   : > { %4817 = vmatprep.subr.bf16.mxu1 %v5665_v38 }
 0xe02   : > { %2969 = vmatmul.mubr.bf16.vlgmr.msra.gmra.mrb[40].mxu1 %v6497_v58 }
 0xe03   : > { %2978 = vmatprep.mubr.bf16.mxu1 %v5664_v4 }
 0xe0a   : > { %2979 = vmatmul.mubr.bf16.gmra.mrb[44].mxu1 %v6505_v62 }
 0xe0b   : > { %4819 = vmatprep.mubr.msk.bf16.mxu1 %vm5666_vm0, %v5665_v38 }
 0xeb5   : > { %v2640_v52 = vpop.f32.mrb[36].mxu1 }
 0xeb6   : > { %v2642_v54 = vpop.f32.mrb[37].mxu1  ;;  %v2641_v56 = vadd.f32 %v2640_v52, %v2519_v51 }
 0xeb7   : > { %v2644_v55 = vpop.f32.mrb[38].mxu1  ;;  %v2643_v60 = vadd.f32 %v2642_v54, %v2523_v53 }
 0xeb8   : > { %v2645_v57 = vadd.f32 %v2644_v55, %v2519_v51  ;;  %v2646_v59 = vpop.f32.mrb[39].mxu1 }
 0xeb9   : > { %v2647_v61 = vadd.f32 %v2646_v59, %v2523_v53 }
 0xeba   : > { %v2649_v42 = vpack.c.bf16 %v2645_v57, %v2641_v56 }
 0xebb   : > { %v2650_v63 = vpack.c.bf16 %v2647_v61, %v2643_v60  ;;  %v2702_v60 = vrot.slane %v6536_v18, %v1410_v41  ;;  %v2706_v61 = vrot.slane %v6536_v18, %v1414_v43 }
 0xebc   : > { %2651 = vst [vmem:[#allocation3] sm:$0xff] %v2649_v42 }
 0xebd   : > { %2652 = vst [vmem:[#allocation3 + $0x8] sm:$0xff] %v2650_v63 }
 0xec3   : > { %v3006_v0 = vld [vmem:[#allocation3] sm:$0xf]  ;;  %v3215_v1 = vld [vmem:[#allocation3] sm:$0xf0] }
 0xec4   : > { %4814 = vmatmul.mubr.bf16.vlgmr.msra.gmra.mrb[20].mxu0 %v3006_v0  ;;  %v3113_v26 = vld [vmem:[#allocation3 + $0x8] sm:$0xf]  ;;  %v3225_v2 = vrot.slane %v3215_v1, 4  ;;  %v3327_v3 = vld [vmem:[#allocation3 + $0x8] sm:$0xf0] }
 0xec5   : > { %4824 = vmatpush3.bf16.xpose.msra.mxu0 %v2990_v28  ;;  %4825 = vmatprep.mubr.msk.bf16.mxu0 %vm5666_vm0, %v5665_v38  ;;  %v3331_v5 = vrot.slane %v3327_v3, 4 }
 0xec6   : > { %4835 = vmatprep.subr.bf16.mxu0 %v5665_v38 }
 0xecc   : > { %4826 = vmatmul.mubr.bf16.vlgmr.msra.gmra.mrb[24].mxu0 %v3113_v26 }
 0xecd   : > { %4836 = vmatpush3.bf16.xpose.msra.mxu0 %v2993_v48  ;;  %4837 = vmatprep.mubr.msk.bf16.mxu0 %vm5666_vm0, %v5665_v38 }
 0xece   : > { %4847 = vmatprep.subr.bf16.mxu0 %v5665_v38 }
 0xed4   : > { %4838 = vmatmul.mubr.bf16.vlgmr.msra.gmra.mrb[28].mxu0 %v3225_v2 }
 0xed5   : > { %4848 = vmatpush3.bf16.xpose.msra.mxu0 %v2994_v49  ;;  %4849 = vmatprep.mubr.msk.bf16.mxu0 %vm5666_vm0, %v5665_v38  ;;  %v2970_v63 = vpop.f32.mrb[40].mxu1 }
 0xed6   : > { %v2971_v26 = vadd.f32 %v2970_v63, %v2702_v60  ;;  %v2972_v1 = vpop.f32.mrb[41].mxu1  ;;  %v5160_v63 = vld [vmem:[%s6280_s21] sm:$0xff]  }
 0xed7   : > { %v2973_v2 = vadd.f32 %v2972_v1, %v2706_v61  ;;  %v2974_v3 = vpop.f32.mrb[42].mxu1  ;;  %v5164_v1 = vld [vmem:[%s6280_s21 + $0x10] sm:$0xff]  }
 0xed8   : > { %v2975_v6 = vadd.f32 %v2974_v3, %v2702_v60  ;;  %v2976_v7 = vpop.f32.mrb[43].mxu1  ;;  %v5167_v3 = vld [vmem:[%s6280_s21 + $0x60] sm:$0xff]  }
 0xed9   : > { %v2977_v8 = vadd.f32 %v2976_v7, %v2706_v61  ;;  %v5170_v7 = vld [vmem:[%s6280_s21 + $0x28] sm:$0xff]  }
 0xeda   : > { %v2991_v9 = vpack.c.bf16 %v2975_v6, %v2971_v26  ;;  %v5162_v26 = vld [vmem:[%s6280_s21 + $0x8] sm:$0xff]  }
 0xedb   : > { %v2992_v10 = vpack.c.bf16 %v2977_v8, %v2973_v2  ;;  %v5166_v2 = vld [vmem:[%s6280_s21 + $0x18] sm:$0xff]   ;;  %v5169_v6 = vld [vmem:[%s6280_s21 + $0x68] sm:$0xff]   ;;  %v5171_v8 = vld [vmem:[%s6280_s21 + $0x70] sm:$0xff]  }
 0xedc   : > { %4850 = vmatmul.mubr.bf16.vlgmr.msra.gmra.mrb[32].mxu0 %v3331_v5  ;;  %4818 = vmatpush3.bf16.msra.mxu1 %v2991_v9  ;;  %v5172_v9 = vld [vmem:[%s6280_s21 + $0x30] sm:$0xff]  }
 0xedd   : > { %4829 = vmatprep.subr.bf16.mxu1 %v5665_v38 }
 0xf97   : > { %v3049_v27 = vpop.f32.mrb[20].mxu0 }
 0xf98   : > { %v3050_v29 = vadd.f32 %v4594_v25, %v3049_v27  ;;  %v4815_v30 = vpop.f32.mrb[21].mxu0 }
 0xf99   : > { %v3052_v28 = vpop.f32.mrb[22].mxu0 }
 0xf9a   : > { %v4816_v31 = vpop.f32.mrb[23].mxu0  ;;  %v3056_v32 = vsel %vm3055_vm4, %v3050_v29, -inf }
 0xf9b   : > { %3057 = vmax.xlane.f32.xlu1 %v3056_v32 }
 0xf9f   : > { %v3150_v58 = vpop.f32.mrb[24].mxu0 }
 0xfa0   : > { %v3151_v35 = vadd.f32 %v4594_v25, %v3150_v58  ;;  %v4827_v36 = vpop.f32.mrb[25].mxu0 }
 0xfa1   : > { %v3153_v62 = vpop.f32.mrb[26].mxu0 }
 0xfa2   : > { %v4828_v37 = vpop.f32.mrb[27].mxu0  ;;  %v3156_v39 = vsel %vm3055_vm4, %v3151_v35, -inf }
 0xfa3   : > { %3157 = vmax.xlane.f32.xlu0 %v3156_v39 }
 0xfa7   : > { %v3261_v47 = vpop.f32.mrb[28].mxu0 }
 0xfa8   : > { %v3262_v48 = vadd.f32 %v4598_v46, %v3261_v47  ;;  %v4839_v49 = vpop.f32.mrb[29].mxu0 }
 0xfa9   : > { %v3264_v50 = vpop.f32.mrb[30].mxu0 }
 0xfaa   : > { %v4840_v51 = vpop.f32.mrb[31].mxu0  ;;  %v3267_v52 = vsel %vm3055_vm4, %v3262_v48, -inf }
 0xfab   : > { %3268 = vmax.xlane.f32.xlu1 %v3267_v52 }
 0xfaf   : > { %v3367_v53 = vpop.f32.mrb[32].mxu0 }
 0xfb0   : > { %v3368_v54 = vadd.f32 %v4598_v46, %v3367_v53  ;;  %v4851_v55 = vpop.f32.mrb[33].mxu0 }
 0xfb1   : > { %v3370_v56 = vpop.f32.mrb[34].mxu0 }
 0xfb2   : > { %v4852_v57 = vpop.f32.mrb[35].mxu0  ;;  %v3373_v59 = vsel %vm3055_vm4, %v3368_v54, -inf }
 0xfb3   : > { %3374 = vmax.xlane.f32.xlu1 %v3373_v59 }
0x1028   : > { %v3058_v42 = vpop.xlane.xlu1 %3057 }
0x1029   : > { %v3059_v0 = vsub.f32 %v3050_v29, %v3058_v42  ;;  %v2980_v29 = vpop.f32.mrb[44].mxu1  ;;  %v5159_v42 = vld [vmem:[%s6280_s21 + $0x40] sm:$0xff]  }
0x102a   : > { %v2981_v30 = vadd.f32 %v2980_v29, %v2702_v60  ;;  %v2982_v28 = vpop.f32.mrb[45].mxu1  ;;  %4719 = vmatprep.subr.bf16.mxu0 %v5159_v42 }
0x102b   : > { %v3060_v5 = vmul.f32 1.442695, %v3059_v0  ;;  %v2983_v31 = vadd.f32 %v2982_v28, %v2706_v61  ;;  %v2984_v32 = vpop.f32.mrb[46].mxu1  ;;  %4720 = vmatpush3.bf16.msra.mxu0 %v5160_v63  ;;  %v5161_v0 = vld [vmem:[%s6280_s21 + $0x48] sm:$0xff]  }
0x102c   : > { %v2986_v58 = vpop.f32.mrb[47].mxu1  ;;  %4721 = vmatprep.subr.bf16.mxu0 %v5161_v0 }
0x102d   : > { %5235 = vpow2.f32 %v3060_v5  ;;  %v2987_v36 = vadd.f32 %v2986_v58, %v2706_v61  ;;  %v5168_v5 = vld [vmem:[%s6280_s21 + $0x20] sm:$0xff]  }
0x102f   : > { %v2996_v37 = vpack.c.bf16 %v2987_v36, %v2983_v31  ;;  %4722 = vmatpush3.bf16.msra.mxu0 %v5162_v26  ;;  %v5183_v26 = vld [vmem:[%s6282_s26 + $0x24] ss:$8 sps:$4 sm:$0xff]  }
0x1030   : > { %v3158_v41 = vpop.xlane.xlu0 %3157 }
0x1031   : > { %v3159_v40 = vsub.f32 %v3151_v35, %v3158_v41  ;;  %v2985_v35 = vadd.f32 %v2984_v32, %v2702_v60  ;;  %v5174_v41 = vld [vmem:[%s6280_s21 + $0x38] sm:$0xff]  }
0x1033   : > { %v3160_v43 = vmul.f32 1.442695, %v3159_v40  ;;  %v2995_v62 = vpack.c.bf16 %v2985_v35, %v2981_v30 }
0x1035   : > { %5237 = vpow2.f32 %v3160_v43 }
0x1037   : > { %v5236_v18 = vpop.eup %5235 }
0x1038   : > { %v3269_v11 = vpop.xlane.xlu1 %3268  ;;  %v3062_v12 = vsel %vm3055_vm4, %v5236_v18, 0.0 }
0x1039   : > { %v3270_v15 = vsub.f32 %v3262_v48, %v3269_v11  ;;  %3063 = vadd.xlane.f32.xlu1 %v3062_v12 }
0x103b   : > { %v3271_v33 = vmul.f32 1.442695, %v3270_v15 }
0x103d   : > { %5239 = vpow2.f32 %v3271_v33 }
0x103f   : > { %v5238_v34 = vpop.eup %5237 }
0x1040   : > { %v3375_v19 = vpop.xlane.xlu1 %3374  ;;  %v3162_v20 = vsel %vm3055_vm4, %v5238_v34, 0.0 }
0x1041   : > { %v3376_v21 = vsub.f32 %v3368_v54, %v3375_v19  ;;  %3163 = vadd.xlane.f32.xlu1 %v3162_v20 }
0x1043   : > { %v3377_v22 = vmul.f32 1.442695, %v3376_v21 }
0x1045   : > { %5241 = vpow2.f32 %v3377_v22 }
0x1047   : > { %v5240_v23 = vpop.eup %5239 }
0x1048   : > { %v3273_v24 = vsel %vm3055_vm4, %v5240_v23, 0.0 }
0x1049   : > { %3274 = vadd.xlane.f32.xlu1 %v3273_v24 }
0x104f   : > { %v5242_v25 = vpop.eup %5241 }
0x1050   : > { %v3379_v27 = vsel %vm3055_vm4, %v5242_v25, 0.0 }
0x1051   : > { %3380 = vadd.xlane.f32.xlu1 %v3379_v27 }
0x10c6   : > { %v3064_v39 = vpop.xlane.xlu1 %3063 }
0x10c7   : > { %5243 = vrcp.f32 %v3064_v39 }
0x10ce   : > { %v3164_v46 = vpop.xlane.xlu1 %3163 }
0x10cf   : > { %5245 = vrcp.f32 %v3164_v46 }
0x10d1   : > { %v5244_v47 = vpop.eup %5243 }
0x10d2   : > { %v3066_v48 = vmul.f32 %v5244_v47, %v5236_v18 }
0x10d4   : > { %v3067_v49 = vpack.c.bf16 %v3066_v48, %v3066_v48 }
0x10d6   : > { %4820 = vmatmul.mubr.msk.bf16.vlgmr.msra.gmra.mrb[48].mxu1 %vm3055_vm4, %v3067_v49  ;;  %v3275_v50 = vpop.xlane.xlu1 %3274 }
0x10d7   : > { %4830 = vmatpush3.bf16.msra.mxu1 %v2992_v10  ;;  %5247 = vrcp.f32 %v3275_v50  ;;  %4831 = vmatprep.mubr.msk.bf16.mxu1 %vm5666_vm0, %v5665_v38  ;;  %v5173_v10 = vld [vmem:[%s6280_s21 + $0x78] sm:$0xff]  }
0x10d8   : > { %4841 = vmatprep.subr.bf16.mxu1 %v5665_v38 }
0x10d9   : > { %v5246_v51 = vpop.eup %5245 }
0x10da   : > { %v3166_v52 = vmul.f32 %v5246_v51, %v5238_v34 }
0x10dc   : > { %v3167_v53 = vpack.c.bf16 %v3166_v52, %v3166_v52 }
0x10de   : > { %4832 = vmatmul.mubr.msk.bf16.vlgmr.msra.gmra.mrb[52].mxu1 %vm3055_vm4, %v3167_v53  ;;  %v3381_v54 = vpop.xlane.xlu1 %3380 }
0x10df   : > { %4842 = vmatpush3.bf16.msra.mxu1 %v2995_v62  ;;  %5249 = vrcp.f32 %v3381_v54  ;;  %4843 = vmatprep.mubr.msk.bf16.mxu1 %vm5666_vm0, %v5665_v38  ;;  %v5175_v54 = vld [vmem:[%s6282_s26] ss:$8 sps:$4 sm:$0xff]  }
0x10e0   : > { %4853 = vmatprep.subr.bf16.mxu1 %v5665_v38 }
0x10e1   : > { %v5248_v55 = vpop.eup %5247 }
0x10e2   : > { %v3277_v56 = vmul.f32 %v5248_v55, %v5240_v23  ;;  %v5177_v55 = vld [vmem:[%s6282_s26 + $0x4] ss:$8 sps:$4 sm:$0xff]  }
0x10e4   : > { %v3278_v57 = vpack.c.bf16 %v3277_v56, %v3277_v56  ;;  %v5180_v56 = vld [vmem:[%s6282_s26 + $0x14] ss:$8 sps:$4 sm:$0xff]  }
0x10e6   : > { %4844 = vmatmul.mubr.msk.bf16.vlgmr.msra.gmra.mrb[56].mxu1 %vm3055_vm4, %v3278_v57  ;;  %v5178_v57 = vld [vmem:[%s6282_s26 + $0x10] ss:$8 sps:$4 sm:$0xff]  }
0x10e7   : > { %4854 = vmatpush3.bf16.msra.mxu1 %v2996_v37  ;;  %4855 = vmatprep.mubr.msk.bf16.mxu1 %vm5666_vm0, %v5665_v38  ;;  %v5163_v38 = vld [vmem:[%s6280_s21 + $0x50] sm:$0xff]   ;;  %v4601_v37 = vld [vmem:[%s6908_s16] ss:$0 sm:$0xff] }
0x10e8   : > { %4723 = vmatprep.subr.bf16.mxu0 %v5163_v38  ;;  %3764 = vmatprep.subr.bf16.mxu1 %v5177_v55  ;;  %v5181_v38 = vld [vmem:[%s6282_s26 + $0x20] ss:$8 sps:$4 sm:$0xff]  }
0x10e9   : > { %v5250_v59 = vpop.eup %5249  ;;  %4724 = vmatpush3.bf16.msra.mxu0 %v5164_v1  ;;  %v5186_v1 = vld [vmem:[%s6282_s26 + $0x34] ss:$8 sps:$4 sm:$0xff]  }
0x10ea   : > { %v3383_v60 = vmul.f32 %v5250_v59, %v5242_v25 }
0x10ec   : > { %v3384_v61 = vpack.c.bf16 %v3383_v60, %v3383_v60 }
0x10ee   : > { %4856 = vmatmul.mubr.msk.bf16.vlgmr.msra.gmra.mrb[60].mxu1 %vm3055_vm4, %v3384_v61 }
0x10ef   : > { %3796 = vmatprep.mubr.bf16.mxu1 %v5664_v4  ;;  %v5165_v4 = vld [vmem:[%s6280_s21 + $0x58] sm:$0xff]   ;;  %3765 = vmatpush1.bf16.msra.mxu1 %v5175_v54 }
0x10f0   : > { %4725 = vmatprep.subr.bf16.mxu0 %v5165_v4  ;;  %3766 = vmatprep.subr.bf16.mxu1 %v5180_v56  ;;  %v5184_v4 = vld [vmem:[%s6282_s26 + $0x30] ss:$8 sps:$4 sm:$0xff]  }
0x10f1   : > { %4726 = vmatpush3.bf16.msra.mxu0 %v5166_v2  ;;  %v5189_v2 = vld [vmem:[%s6282_s26 + $0x44] ss:$8 sps:$4 sm:$0xff]  }
0x10f2   : > { %4727 = vmatprep.subr.bf16.mxu0 %v5167_v3  ;;  %v5187_v3 = vld [vmem:[%s6282_s26 + $0x40] ss:$8 sps:$4 sm:$0xff]  }
0x10f3   : > { %3767 = vmatpush1.bf16.msra.mxu1 %v5178_v57 }
0x10f4   : > { %3768 = vmatprep.subr.bf16.mxu1 %v5183_v26 }
0x10f5   : > { %4728 = vmatpush3.bf16.msra.mxu0 %v5168_v5  ;;  %v5192_v5 = vld [vmem:[%s6282_s26 + $0x54] ss:$8 sps:$4 sm:$0xff]  }
0x10f6   : > { %4729 = vmatprep.subr.bf16.mxu0 %v5169_v6  ;;  %v5190_v6 = vld [vmem:[%s6282_s26 + $0x50] ss:$8 sps:$4 sm:$0xff]  }
0x10f7   : > { %3769 = vmatpush1.bf16.msra.mxu1 %v5181_v38 }
0x10f8   : > { %3770 = vmatprep.subr.bf16.mxu1 %v5186_v1 }
0x10f9   : > { %4730 = vmatpush3.bf16.msra.mxu0 %v5170_v7  ;;  %v5193_v7 = vld [vmem:[%s6282_s26 + $0x60] ss:$8 sps:$4 sm:$0xff]  }
0x10fa   : > { %4731 = vmatprep.subr.bf16.mxu0 %v5171_v8  ;;  %v5195_v8 = vld [vmem:[%s6282_s26 + $0x64] ss:$8 sps:$4 sm:$0xff]  }
0x10fb   : > { %3771 = vmatpush1.bf16.msra.mxu1 %v5184_v4 }
0x10fc   : > { %3772 = vmatprep.subr.bf16.mxu1 %v5189_v2 }
0x10fd   : > { %4732 = vmatpush3.bf16.msra.mxu0 %v5172_v9  ;;  %v5198_v9 = vld [vmem:[%s6282_s26 + $0x74] ss:$8 sps:$4 sm:$0xff]  }
0x10fe   : > { %4733 = vmatprep.subr.bf16.mxu0 %v5173_v10  ;;  %v5196_v10 = vld [vmem:[%s6282_s26 + $0x70] ss:$8 sps:$4 sm:$0xff]  }
0x10ff   : > { %3773 = vmatpush1.bf16.msra.mxu1 %v5187_v3 }
0x1100   : > { %3774 = vmatprep.subr.bf16.mxu1 %v5192_v5 }
0x1101   : > { %4734 = vmatpush3.bf16.msra.mxu0 %v5174_v41  ;;  %v5199_v41 = vld [vmem:[%s6284_s27 + $0x40] sm:$0xff]  }
0x1102   : > { %4741 = vmatprep.subr.bf16.mxu0 %v5199_v41 }
0x1103   : > { %3775 = vmatpush1.bf16.msra.mxu1 %v5190_v6 }
0x1104   : > { %3776 = vmatprep.subr.bf16.mxu1 %v5195_v8 }
0x1107   : > { %3777 = vmatpush1.bf16.msra.mxu1 %v5193_v7 }
0x1108   : > { %3778 = vmatprep.subr.bf16.mxu1 %v5198_v9 }
0x110b   : > { %3779 = vmatpush1.bf16.msra.mxu1 %v5196_v10 }
0x11a9   : > { %v3105_v40 = vpop.f32.mrb[48].mxu1 }
0x11aa   : > { %v3111_v43 = vpack.c.bf16 %v3105_v40, %v3105_v40  ;;  %v4821_v18 = vpop.f32.mrb[49].mxu1  ;;  %v5200_v40 = vld [vmem:[%s6284_s27] sm:$0xff]  }
0x11ab   : > { %v3108_v11 = vpop.f32.mrb[50].mxu1  ;;  %v5202_v18 = vld [vmem:[%s6284_s27 + $0x8] sm:$0xff]  }
0x11ac   : > { %3112 = vst [vmem:[#allocation5] sm:$0xf] %v3111_v43  ;;  %v4822_v12 = vpop.f32.mrb[51].mxu1  ;;  %v5201_v43 = vld [vmem:[%s6284_s27 + $0x48] sm:$0xff]   ;;  %v5203_v11 = vld [vmem:[%s6284_s27 + $0x50] sm:$0xff]  }
0x11ad   : > { %v5204_v12 = vld [vmem:[%s6284_s27 + $0x10] sm:$0xff]  }
0x11b1   : > { %v3205_v15 = vpop.f32.mrb[52].mxu1 }
0x11b2   : > { %v3211_v33 = vpack.c.bf16 %v3205_v15, %v3205_v15  ;;  %v4833_v34 = vpop.f32.mrb[53].mxu1  ;;  %v5205_v15 = vld [vmem:[%s6284_s27 + $0x58] sm:$0xff]  }
0x11b3   : > { %v3208_v19 = vpop.f32.mrb[54].mxu1  ;;  %v5207_v34 = vld [vmem:[%s6284_s27 + $0x60] sm:$0xff]  }
0x11b4   : > { %3212 = vst [vmem:[#allocation5 + $0x8] sm:$0xf] %v3211_v33  ;;  %v4834_v20 = vpop.f32.mrb[55].mxu1  ;;  %v5206_v33 = vld [vmem:[%s6284_s27 + $0x18] sm:$0xff]   ;;  %v5208_v19 = vld [vmem:[%s6284_s27 + $0x20] sm:$0xff]  }
0x11b5   : > { %v5209_v20 = vld [vmem:[%s6284_s27 + $0x68] sm:$0xff]  }
0x11b9   : > { %v3316_v21 = vpop.f32.mrb[56].mxu1 }
0x11ba   : > { %v3322_v22 = vpack.c.bf16 %v3316_v21, %v3316_v21  ;;  %v4845_v23 = vpop.f32.mrb[57].mxu1 }
0x11bb   : > { %v3319_v24 = vpop.f32.mrb[58].mxu1 }
0x11bc   : > { %v3324_v25 = vrot.slane %v3322_v22, 4  ;;  %v4846_v27 = vpop.f32.mrb[59].mxu1 }
0x11be   : > { %3326 = vst [vmem:[#allocation5] sm:$0xf0] %v3324_v25 }
0x11c1   : > { %v3422_v29 = vpop.f32.mrb[60].mxu1 }
0x11c2   : > { %v3428_v30 = vpack.c.bf16 %v3422_v29, %v3422_v29  ;;  %v4857_v28 = vpop.f32.mrb[61].mxu1 }
0x11c3   : > { %v3425_v31 = vpop.f32.mrb[62].mxu1 }
0x11c4   : > { %v3430_v32 = vrot.slane %v3428_v30, 4  ;;  %v4858_v58 = vpop.f32.mrb[63].mxu1  ;;  %v4618_v30 = vld [vmem:[%s6910_s3] ss:$0 sm:$0xff] }
0x11c5   : > { %v3433_v36 = vld [vmem:[#allocation5] sm:$0xff] }
0x11c6   : > { %3432 = vst [vmem:[#allocation5 + $0x8] sm:$0xf0] %v3430_v32  ;;  %v4619_v32 = vld [vmem:[%s1315_s29] ss:$0 sm:$0xff] }
0x11cd   : > { %v3434_v35 = vld [vmem:[#allocation5 + $0x8] sm:$0xff] }
0x11ce   : > { %3602 = vmatprep.mubr.bf16.mxu0 %v3434_v35 }
0x11cf   : > { %3603 = vmatmul.mubr.bf16.vlgmr.msra.gmra.mrb[36].mxu0 %v3433_v36 }
0x11d0   : > { %4742 = vmatpush3.bf16.msra.mxu0 %v5200_v40 }
0x11d1   : > { %4743 = vmatprep.subr.bf16.mxu0 %v5201_v43 }
0x11d4   : > { %4744 = vmatpush3.bf16.msra.mxu0 %v5202_v18 }
0x11d5   : > { %4745 = vmatprep.subr.bf16.mxu0 %v5203_v11 }
0x11d8   : > { %4746 = vmatpush3.bf16.msra.mxu0 %v5204_v12 }
0x11d9   : > { %4747 = vmatprep.subr.bf16.mxu0 %v5205_v15 }
0x11dc   : > { %4748 = vmatpush3.bf16.msra.mxu0 %v5206_v33 }
0x11dd   : > { %4749 = vmatprep.subr.bf16.mxu0 %v5207_v34 }
0x11e0   : > { %4750 = vmatpush3.bf16.msra.mxu0 %v5208_v19 }
0x11e1   : > { %4751 = vmatprep.subr.bf16.mxu0 %v5209_v20 }
0x12a2   : > { %v4735_v62 = vpop.f32.mrb[36].mxu0 }
0x12a3   : > { %v4736_v39 = vpop.f32.mrb[37].mxu0 }
0x12a4   : > { %v4737_v46 = vadd.f32 %v4736_v39, %v4735_v62  ;;  %v4738_v47 = vpop.f32.mrb[38].mxu0 }
0x12a5   : > { %v4739_v48 = vpop.f32.mrb[39].mxu0 }
0x12a6   : > { %v3605_v49 = vadd.f32 %v4737_v46, %v4601_v37  ;;  %v4740_v50 = vadd.f32 %v4739_v48, %v4738_v47  ;;  %v5210_v48 = vld [vmem:[%s6284_s27 + $0x28] sm:$0xff]  }
0x12a7   : > { %4752 = vmatpush3.bf16.msra.mxu0 %v5210_v48 }
0x12a8   : > { %v3608_v51 = vadd.f32 %v4740_v50, %v4601_v37  ;;  %v3611_v52 = vadd.f32 %v3605_v49, %v6527_v16  ;;  %v5211_v49 = vld [vmem:[%s6284_s27 + $0x70] sm:$0xff]  }
0x12a9   : > { %v5212_v50 = vld [vmem:[%s6284_s27 + $0x30] sm:$0xff]   ;;  %4753 = vmatprep.subr.bf16.mxu0 %v5211_v49 }
0x12aa   : > { %3613 = vadd.xlane.f32.xlu0 %v3611_v52  ;;  %v3612_v53 = vadd.f32 %v3608_v51, %v6530_v17  ;;  %v5213_v51 = vld [vmem:[%s6284_s27 + $0x78] sm:$0xff]  }
0x12ab   : > { %4754 = vmatpush3.bf16.msra.mxu0 %v5212_v50 }
0x12ac   : > { %3615 = vadd.xlane.f32.xlu1 %v3612_v53  ;;  %4755 = vmatprep.subr.bf16.mxu0 %v5213_v51 }
0x1337   : > { %v3614_v59 = vpop.xlane.xlu0 %3613 }
0x1338   : > { %v3617_v60 = vmul.f32 0.0078125, %v3614_v59 }
0x1339   : > { %v3616_v61 = vpop.xlane.xlu1 %3615 }
0x133a   : > { %v6637_v16 = vsub.f32 %v3611_v52, %v3617_v60  ;;  %v3618_v17 = vmul.f32 0.0078125, %v3616_v61  ;;  %v5214_v52 = vld [vmem:[%s6284_s27 + $0x38] sm:$0xff]  }
0x133b   : > { %4756 = vmatpush3.bf16.msra.mxu0 %v5214_v52 }
0x133c   : > { %v6639_v42 = vsub.f32 %v3612_v53, %v3618_v17  ;;  %v3621_v63 = vmul.f32 %v6637_v16, %v6637_v16  ;;  %v3672_v53 = vld [vmem:[%s6259_s22] sm:$0x3] }
0x133d   : > { %v3677_v54 = vrot.slane %v3672_v53, %v6352_v44  ;;  %v3681_v55 = vrot.slane %v3672_v53, %v6355_v45  ;;  %v4636_v45 = vld [vmem:[%s1322_s1] ss:$0 sm:$0xff]  ;;  %s6913_s1 = sld [smem:[#allocation29_spill]] }
0x133e   : > { %3623 = vadd.xlane.f32.xlu0 %v3621_v63  ;;  %v3622_v0 = vmul.f32 %v6639_v42, %v6639_v42 }
0x1340   : > { %3625 = vadd.xlane.f32.xlu1 %v3622_v0 }
0x1343   : > { %p4928_p1 = scmp.eq.s32.totalorder %s6913_s1, 1 }
0x13cb   : > { %v3624_v21 = vpop.xlane.xlu0 %3623 }
0x13cc   : > { %v3627_v22 = vmul.f32 0.0078125, %v3624_v21 }
0x13cd   : > { %v3626_v23 = vpop.xlane.xlu1 %3625 }
0x13ce   : > { %v3629_v24 = vadd.f32 1e-05, %v3627_v22  ;;  %v3628_v25 = vmul.f32 0.0078125, %v3626_v23 }
0x13d0   : > { %5251 = vrsqrt.f32 %v3629_v24  ;;  %v3630_v27 = vadd.f32 1e-05, %v3628_v25 }
0x13d2   : > { %5253 = vrsqrt.f32 %v3630_v27  ;;  %v4653_v27 = vld [vmem:[%s1325_s17] ss:$0 sm:$0xff]  ;;  %s5555_s17 = scalar_lea.vmem %s4045_s24, 256 }
0x13d3   : > { %p5556_p4 = scmp.ne.s32.totalorder %s4045_s24, %s5555_s17  ;;  %p5563_p9 = scmp.lt.s32.totalorder %s5555_s17, %s5555_s17 }
0x13d5   : > { %p5557_p13 = pnand %p5556_p4, %p4928_p1  ;;  %p5564_p8 = por %p5563_p9, %p5562_p11 }
0x13d7   : > { %p5558_p7 = pneg %p5557_p13 }
0x13d9   : > { %p5565_p0 = pnand %p5564_p8, %p5558_p7 }
0x13da   : > { %v5252_v29 = vpop.eup %5251 }
0x13db   : > { %v3633_v28 = vmul.f32 %v5252_v29, %v6637_v16 }
0x13dc   : > { %v5254_v31 = vpop.eup %5253 }
0x13dd   : > { %v3634_v58 = vmul.f32 %v5254_v31, %v6639_v42  ;;  %v3642_v35 = vmul.f32 %v4618_v30, %v3633_v28  ;;  %v4654_v28 = vld [vmem:[%s1328_s18] ss:$0 sm:$0xff] }
0x13df   : > { %v3643_v36 = vmul.f32 %v4618_v30, %v3634_v58  ;;  %v3651_v62 = vadd.f32 %v4619_v32, %v3642_v35 }
0x13e1   : > { %v3652_v37 = vadd.f32 %v4619_v32, %v3643_v36  ;;  %v3653_v39 = vmul.f32 %v3651_v62, %v6522_v13 }
0x13e3   : > { %v3654_v46 = vmul.f32 %v3652_v37, %v6524_v14 }
0x13e5   : > { %v3655_v47 = vpack.c.bf16 %v3654_v46, %v3653_v39 }
0x13e7   : > { %3797 = vmatmul.mubr.bf16.vlgmr.msra.gmra.mrb[64].mxu1 %v3655_v47 }
0x14ba   : > { %v3798_v56 = vpop.f32.mrb[64].mxu1 }
0x14bb   : > { %v3799_v57 = vadd.f32 %v3798_v56, %v3677_v54  ;;  %v3800_v59 = vpop.f32.mrb[65].mxu1 }
0x14bc   : > { %v3801_v60 = vadd.f32 %v3800_v59, %v3681_v55  ;;  %v3802_v61 = vpop.f32.mrb[66].mxu1 }
0x14bd   : > { %v3803_v16 = vadd.f32 %v3802_v61, %v3677_v54  ;;  %v3804_v17 = vpop.f32.mrb[67].mxu1  ;;  %v3807_v63 = vmax.f32 %v3799_v57, 0.0 }
0x14be   : > { %v3805_v42 = vadd.f32 %v3804_v17, %v3681_v55  ;;  %v3808_v26 = vmax.f32 %v3801_v60, 0.0 }
0x14bf   : > { %v3809_v0 = vmax.f32 %v3803_v16, 0.0 }
0x14c0   : > { %v3810_v38 = vmax.f32 %v3805_v42, 0.0 }
0x14c1   : > { %v3811_v1 = vpack.c.bf16 %v3809_v0, %v3807_v63 }
0x14c2   : > { %v3812_v4 = vpack.c.bf16 %v3810_v38, %v3808_v26 }
0x14c4   : > { %3980 = vmatprep.mubr.bf16.mxu0 %v3812_v4 }
0x14c5   : > { %3981 = vmatmul.mubr.bf16.vlgmr.msra.gmra.mrb[40].mxu0 %v3811_v1 }
0x1598   : > { %v4757_v44 = vpop.f32.mrb[40].mxu0 }
0x1599   : > { %v4758_v2 = vpop.f32.mrb[41].mxu0 }
0x159a   : > { %v4759_v3 = vadd.f32 %v4758_v2, %v4757_v44  ;;  %v4760_v5 = vpop.f32.mrb[42].mxu0 }
0x159b   : > { %v4761_v6 = vpop.f32.mrb[43].mxu0 }
0x159c   : > { %v3983_v7 = vadd.f32 %v4759_v3, %v4636_v45  ;;  %v4762_v8 = vadd.f32 %v4761_v6, %v4760_v5 }
0x159e   : > { %v3986_v9 = vadd.f32 %v4762_v8, %v4636_v45  ;;  %v3989_v10 = vadd.f32 %v3983_v7, %v3653_v39 }
0x15a0   : > { %3991 = vadd.xlane.f32.xlu0 %v3989_v10  ;;  %v3990_v41 = vadd.f32 %v3986_v9, %v3654_v46 }
0x15a2   : > { %3993 = vadd.xlane.f32.xlu1 %v3990_v41 }
0x162d   : > { %v3992_v40 = vpop.xlane.xlu0 %3991 }
0x162e   : > { %v3995_v43 = vmul.f32 0.0078125, %v3992_v40 }
0x162f   : > { %v3994_v18 = vpop.xlane.xlu1 %3993 }
0x1630   : > { %v3997_v11 = vsub.f32 %v3989_v10, %v3995_v43  ;;  %v3996_v12 = vmul.f32 0.0078125, %v3994_v18 }
0x1632   : > { %v3998_v15 = vsub.f32 %v3990_v41, %v3996_v12  ;;  %v3999_v33 = vmul.f32 %v3997_v11, %v3997_v11 }
0x1634   : > { %4001 = vadd.xlane.f32.xlu0 %v3999_v33  ;;  %v4000_v34 = vmul.f32 %v3998_v15, %v3998_v15 }
0x1636   : > { %4003 = vadd.xlane.f32.xlu1 %v4000_v34 }
0x16c1   : > { %v4002_v19 = vpop.xlane.xlu0 %4001 }
0x16c2   : > { %v4005_v20 = vmul.f32 0.0078125, %v4002_v19 }
0x16c3   : > { %v4004_v21 = vpop.xlane.xlu1 %4003 }
0x16c4   : > { %v4007_v22 = vadd.f32 1e-05, %v4005_v20  ;;  %v4006_v23 = vmul.f32 0.0078125, %v4004_v21 }
0x16c6   : > { %5255 = vrsqrt.f32 %v4007_v22  ;;  %v4008_v24 = vadd.f32 1e-05, %v4006_v23 }
0x16c8   : > { %5257 = vrsqrt.f32 %v4008_v24 }
0x16d0   : > { %v5256_v25 = vpop.eup %5255 }
0x16d1   : > { %v4011_v29 = vmul.f32 %v5256_v25, %v3997_v11 }
0x16d2   : > { %v5258_v30 = vpop.eup %5257 }
0x16d3   : > { %v4020_v31 = vmul.f32 %v4653_v27, %v4011_v29  ;;  %v4012_v32 = vmul.f32 %v5258_v30, %v3998_v15 }
0x16d5   : > { %v4021_v58 = vmul.f32 %v4653_v27, %v4012_v32  ;;  %v4029_v35 = vadd.f32 %v4654_v28, %v4020_v31 }
0x16d7   : > { %v4030_v36 = vadd.f32 %v4654_v28, %v4021_v58  ;;  %v4031_v62 = vmul.f32 %v4029_v35, %v6522_v13 }
0x16d9   : > { %v4032_v37 = vmul.f32 %v4030_v36, %v6524_v14  ;;  %4033 = vst [vmem:[#allocation19] sm:$0xff] %v4031_v62 }
0x16db   : > { %4034 = vst [vmem:[#allocation19 + $0x8] sm:$0xff] %v4032_v37 }
0x16dc   : > { %5568 = shalt.err (!%p5565_p0)
}
0x16dd   : > { %s6916_s5 = sld [smem:[#allocation58_spill]] }
0x16e3   : > { %s5569_s15 = scalar_lea.hbm %s6916_s5, 256 }
0x16e4   : > { %p5570_p2 = scmp.ne.s32.totalorder %s6916_s5, %s5569_s15  ;;  %p5575_p10 = scmp.lt.u32.totalorder %s5569_s15, %s6916_s5 }
0x16e6   : > { %p5571_p6 = pnand %p5570_p2, %p4928_p1 }
0x16e8   : > { %p5572_p12 = pneg %p5571_p6 }
0x16ea   : > { %p5577_p3 = pnand %p5575_p10, %p5572_p12 }
0x16ec   : > { %5580 = shalt.err (!%p5577_p3)
}
0x16ed   : > { %s5668_s26 = smov 128   ;;  %s5669_s25 = smov 8  }
0x16ee   : > { %4888 = dma.vmem_to_hbm [thread:$0]  (%p4928_p1), %s4045_s24, 256, %s6916_s5, [#allocation8], %s5668_s26, %s5668_s26, %s5669_s25  }
0x16ef   : > { %5618 = dma.done.wait (%p4928_p1), [#allocation8], 256  }
0x16f0   : > { %5620 = vsyncadd (%p4928_p1), [#allocation8], 4294967040 }
0x16f1 PF: > { %s6917_s30 = sld [smem:[#allocation28_spill]]  ;;  %s6918_s29 = sld [smem:[#allocation24_spill]] }
0x16f2   : > { %s6919_s2 = sld [smem:[#allocation25_spill]]  ;;  %s6920_s6 = sld [smem:[#allocation32_spill]] }
0x16f3   : > { %s6922_s7 = sld [smem:[#allocation31_spill]] }
0x16f7   : > { %s38_s3 = sadd.s32 1, %s6917_s30   ;;  %s6921_s30 = sld [smem:[#allocation27_spill]] }
0x16f8   : > { %p35_p5 = scmp.ge.s32.totalorder %s38_s3, 4  }
0x16fa   :  { %37 = sbr.rel (!%p35_p5) target bundleno = 32 (0x20), region = 295 }
0x1701   :  { %4060 = vsyncpa [#allocation7], 1 }
0x1702   :  { %4062 = vsyncpa [#allocation7 + $0x1], 1 }
0x1703   :  { %4063 = vsyncpa [#allocation10], 1 }
0x1704   :  { %4064 = vsyncpa [#allocation8], 1 }
0x1705   :  { %4066 = vsyncpa [#allocation8 + $0x1], 1 }

</bundles_post_ra>
